<compile_context>
chip_gen: v7x
topology: tpu7x:2x2x1
jax: 0.10.0
libtpu: 0.0.40
codegen_flags: <defaults>
</compile_context>

<pallas_src>
import jax
import jax.numpy as jnp
from jax.experimental import pallas as pl
from jax.experimental.pallas import tpu as pltpu


def _cca_kernel(x_ref, wf_ref, bf_ref, gamma_ref, o_ref):
    # x_ref: (1, H, W, C) -- one batch element (NHWC), VMEM
    # wf_ref: (C, 2D+C) fused [Wq | Wk | Wv], bf_ref: (1, 2D+C) fused biases
    # gamma_ref: (1,) scalar in SMEM
    x = x_ref[0]                              # (H, W, C)
    H, W, C = x.shape
    F = wf_ref.shape[1]
    D = (F - C) // 2                          # = C // 8
    gamma = gamma_ref[0]                      # SMEM scalar

    # ---- fused 1x1 convs == one channel matmul on the MXU ----
    x2d = x.reshape(H * W, C)
    qkv = (jnp.dot(x2d, wf_ref[...], preferred_element_type=jnp.float32)
           + bf_ref[...])                     # (H*W, 2D+C)
    q = qkv[:, :D].reshape(H, W, D)           # (H, W, D)
    k = qkv[:, D:2 * D].reshape(H, W, D)      # (H, W, D)
    v = qkv[:, 2 * D:].reshape(H, W, C)       # (H, W, C)

    # column-branch operands in (W, H, *) layout (leading batch dim for MXU);
    # these are the only big relayouts besides the final out_H swap.
    q_wh = jnp.swapaxes(q, 0, 1)              # (W, H, D)
    k_wh = jnp.swapaxes(k, 0, 1)              # (W, H, D)
    v_wh = jnp.swapaxes(v, 0, 1)              # (W, H, C)

    # ---- energies ----
    # row branch:    e_w[h, w, v'] = <q[h, w, :], k[h, v', :]>
    e_w = jnp.einsum('hwd,hvd->hwv', q, k,
                     preferred_element_type=jnp.float32)          # (H, W, W)
    # column branch: e_h[w, h, g]  = <q[h, w, :], k[g, w, :]>
    e_h = jnp.einsum('whd,wgd->whg', q_wh, k_wh,
                     preferred_element_type=jnp.float32)          # (W, H, H)

    # additive diagonal mask (torch INF() term): 2-D, finite large negative
    row = jax.lax.broadcasted_iota(jnp.int32, (H, H), 0)
    col = jax.lax.broadcasted_iota(jnp.int32, (H, H), 1)
    diag_mask = jnp.where(row == col, jnp.float32(-1e30), jnp.float32(0.0))
    e_h = e_h + diag_mask[None, :, :]

    # ---- joint softmax over H+W without materializing the concat ----
    m_w = jnp.max(e_w, axis=2)                # (H, W)
    m_h = jnp.max(e_h, axis=2)                # (W, H)
    m_hw = jnp.maximum(m_w, m_h.T)            # (H, W)  joint max per pixel
    m_wh = m_hw.T                             # (W, H)

    p_w = jnp.exp(e_w - m_hw[:, :, None])     # (H, W, W)
    p_h = jnp.exp(e_h - m_wh[:, :, None])     # (W, H, H)

    denom = jnp.sum(p_w, axis=2) + jnp.sum(p_h, axis=2).T         # (H, W)
    # EUP approx reciprocal + one Newton step (only H*W elements — the
    # normalization is folded after the V matmuls, not over H*W*(H+W)).
    inv0 = pl.reciprocal(denom, approx=True)
    inv = inv0 * (2.0 - denom * inv0)

    # ---- weighted sums of V (unnormalized; normalization folded into scale) ----
    # out_W[h, w, c] = sum_v p_w[h, w, v] * V[h, v, c]
    out_w = jnp.einsum('hwv,hvc->hwc', p_w, v,
                       preferred_element_type=jnp.float32)        # (H, W, C)
    # out_H[w, h, c] = sum_g p_h[w, h, g] * V[g, w, c]
    out_h = jnp.einsum('whg,wgc->whc', p_h, v_wh,
                       preferred_element_type=jnp.float32)        # (W, H, C)
    out_h = jnp.swapaxes(out_h, 0, 1)                             # (H, W, C)

    scale = (gamma * inv)[:, :, None]                             # (H, W, 1)
    o_ref[0] = scale * (out_h + out_w) + x


def criss_cross_attention(x, params):
    """x: (B, H, W, C) float32 (NHWC). Returns (B, H, W, C)."""
    B, H, W, C = x.shape
    wq, bq, wk, bk, wv, bv, gamma = params
    D = wq.shape[1]

    # Fuse the three 1x1-conv projections into one weight / bias.
    w_fused = jnp.concatenate([wq, wk, wv], axis=1)               # (C, 2D+C)
    b_fused = jnp.concatenate([bq, bk, bv], axis=1)               # (1, 2D+C)
    gamma_s = jnp.asarray(gamma, jnp.float32).reshape((1,))       # SMEM scalar

    F = 2 * D + C
    return pl.pallas_call(
        _cca_kernel,
        out_shape=jax.ShapeDtypeStruct((B, H, W, C), x.dtype),
        grid=(B,),
        in_specs=[
            pl.BlockSpec((1, H, W, C), lambda b: (b, 0, 0, 0)),
            pl.BlockSpec((C, F), lambda b: (0, 0)),
            pl.BlockSpec((1, F), lambda b: (0, 0)),
            pl.BlockSpec(memory_space=pltpu.MemorySpace.SMEM),    # gamma scalar
        ],
        out_specs=pl.BlockSpec((1, H, W, C), lambda b: (b, 0, 0, 0)),
        compiler_params=pltpu.CompilerParams(
            dimension_semantics=("parallel",),
            vmem_limit_bytes=32 * 1024 * 1024),
    )(x, w_fused, b_fused, gamma_s)


def reference(x, params):
    """Pure-JAX reference of the PyTorch forward (NHWC layout)."""
    wq, bq, wk, bk, wv, bv, gamma = params
    B, H, W, C = x.shape
    q = jnp.einsum('bhwc,cd->bhwd', x, wq) + bq
    k = jnp.einsum('bhwc,cd->bhwd', x, wk) + bk
    v = jnp.einsum('bhwc,cd->bhwd', x, wv) + bv
    energy_H = jnp.einsum('bhwd,bgwd->bhwg', q, k)
    diag = jnp.eye(H, dtype=bool)[None, :, None, :]
    energy_H = jnp.where(diag, -jnp.inf, energy_H)
    energy_W = jnp.einsum('bhwd,bhvd->bhwv', q, k)
    att = jax.nn.softmax(jnp.concatenate([energy_H, energy_W], axis=3), axis=3)
    att_H, att_W = att[..., :H], att[..., H:]
    out_H = jnp.einsum('bhwg,bgwc->bhwc', att_H, v)
    out_W = jnp.einsum('bhwv,bhvc->bhwc', att_W, v)
    return jnp.asarray(gamma).reshape(())[None, None, None, None] * (out_H + out_W) + x


if __name__ == "__main__":
    B, C, H, W = 2, 32, 16, 16
    C8 = C // 8

    key = jax.random.PRNGKey(0)
    ks = jax.random.split(key, 8)

    # PyTorch-style NCHW input, converted once to the kernel's NHWC layout.
    x_nchw = jax.random.normal(ks[0], (B, C, H, W), jnp.float32)
    x = jnp.transpose(x_nchw, (0, 2, 3, 1))                       # (B, H, W, C)

    # Deterministic parameter init (shapes per Conv2d(kernel_size=1) in __init__).
    wq = jax.random.normal(ks[1], (C, C8), jnp.float32) * 0.1
    bq = jax.random.normal(ks[2], (1, C8), jnp.float32) * 0.01
    wk = jax.random.normal(ks[3], (C, C8), jnp.float32) * 0.1
    bk = jax.random.normal(ks[4], (1, C8), jnp.float32) * 0.01
    wv = jax.random.normal(ks[5], (C, C), jnp.float32) * 0.1
    bv = jax.random.normal(ks[6], (1, C), jnp.float32) * 0.01
    gamma = jnp.zeros((1,), jnp.float32)   # matches nn.Parameter(torch.zeros(1))

    params = (wq, bq, wk, bk, wv, bv, gamma)
    out = criss_cross_attention(x, params)
    jax.block_until_ready(out)

    # With gamma == 0 (as in __init__) the output must equal x.
    assert jnp.allclose(out, x, atol=1e-5), "gamma=0 identity check failed"

    # Exercise the attention math with a nonzero gamma and compare to reference.
    params_t = (wq, bq, wk, bk, wv, bv, jnp.full((1,), 0.5, jnp.float32))
    out_t = criss_cross_attention(x, params_t)
    ref_t = reference(x, params_t)
    jax.block_until_ready(out_t)
    err = float(jnp.max(jnp.abs(out_t - ref_t)))
    assert jnp.allclose(out_t, ref_t, atol=1e-3, rtol=1e-3), f"max err {err}"

    print("KERNEL_OK")
</pallas_src>

<mosaic_0001>
module attributes {stable_mosaic.version = 11 : i64} {
  func.func @_cca_kernel(%arg0: i32, %arg1: memref<1x16x16x32xf32, #tpu.memory_space<vmem>>, %arg2: memref<32x40xf32, #tpu.memory_space<vmem>>, %arg3: memref<1x40xf32, #tpu.memory_space<vmem>>, %arg4: memref<1xf32, #tpu.memory_space<smem>>, %arg5: memref<1x16x16x32xf32, #tpu.memory_space<vmem>>) attributes {dimension_semantics = [#tpu.dimension_semantics<parallel>], iteration_bounds = array<i64: 2>, scalar_prefetch = 0 : i64, scratch_operands = 0 : i64, tpu.core_type = #tpu.core_type<tc>, window_params = [{transform_indices = @transform_0, window_bounds = array<i64: 1, 16, 16, 32>}, {pipeline_mode = #tpu.pipeline_mode<synchronous>, transform_indices = @transform_1, window_bounds = array<i64: 32, 40>}, {pipeline_mode = #tpu.pipeline_mode<synchronous>, transform_indices = @transform_2, window_bounds = array<i64: 1, 40>}, {transform_indices = @transform_3, window_bounds = array<i64: 1>}, {transform_indices = @transform_4, window_bounds = array<i64: 1, 16, 16, 32>}]} {
    %c0 = arith.constant 0 : index
    %c0_0 = arith.constant 0 : index
    %c0_1 = arith.constant 0 : index
    %c0_2 = arith.constant 0 : index
    %0 = vector.load %arg1[%c0, %c0_0, %c0_1, %c0_2] : memref<1x16x16x32xf32, #tpu.memory_space<vmem>>, vector<1x16x16x32xf32>
    %1 = vector.shape_cast %0 : vector<1x16x16x32xf32> to vector<16x16x32xf32>
    %c0_3 = arith.constant 0 : index
    %2 = memref.load %arg4[%c0_3] : memref<1xf32, #tpu.memory_space<smem>>
    %3 = vector.shape_cast %1 : vector<16x16x32xf32> to vector<256x32xf32>
    %c0_4 = arith.constant 0 : index
    %c0_5 = arith.constant 0 : index
    %4 = vector.load %arg2[%c0_4, %c0_5] : memref<32x40xf32, #tpu.memory_space<vmem>>, vector<32x40xf32>
    %cst = arith.constant dense<0.000000e+00> : vector<256x40xf32>
    %5 = tpu.matmul %3, %4, %cst {dimension_numbers = #tpu.dot_dimension_numbers<[1], [0], [0], [1], [0, 0, 1, 1], [], []>} : vector<256x32xf32>, vector<32x40xf32>, vector<256x40xf32> -> vector<256x40xf32>
    %c0_6 = arith.constant 0 : index
    %c0_7 = arith.constant 0 : index
    %6 = vector.load %arg3[%c0_6, %c0_7] : memref<1x40xf32, #tpu.memory_space<vmem>>, vector<1x40xf32>
    %7 = vector.broadcast %6 : vector<1x40xf32> to vector<256x40xf32>
    %8 = arith.addf %5, %7 : vector<256x40xf32>
    %9 = vector.extract_strided_slice %8 {offsets = [0, 0], sizes = [256, 4], strides = [1, 1]} : vector<256x40xf32> to vector<256x4xf32>
    %10 = vector.shape_cast %9 : vector<256x4xf32> to vector<16x16x4xf32>
    %11 = vector.extract_strided_slice %8 {offsets = [0, 4], sizes = [256, 4], strides = [1, 1]} : vector<256x40xf32> to vector<256x4xf32>
    %12 = vector.shape_cast %11 : vector<256x4xf32> to vector<16x16x4xf32>
    %13 = vector.extract_strided_slice %8 {offsets = [0, 8], sizes = [256, 32], strides = [1, 1]} : vector<256x40xf32> to vector<256x32xf32>
    %14 = vector.shape_cast %13 : vector<256x32xf32> to vector<16x16x32xf32>
    %15 = tpu.transpose %10, [1, 0, 2] : vector<16x16x4xf32> -> vector<16x16x4xf32>
    %16 = tpu.transpose %12, [1, 0, 2] : vector<16x16x4xf32> -> vector<16x16x4xf32>
    %17 = tpu.transpose %14, [1, 0, 2] : vector<16x16x32xf32> -> vector<16x16x32xf32>
    "tpu.trace_start"() <{level = 10 : i32, message = "hwd,hvd->hwv"}> : () -> ()
    %cst_8 = arith.constant dense<0.000000e+00> : vector<16x16x16xf32>
    %18 = tpu.matmul %10, %12, %cst_8 {dimension_numbers = #tpu.dot_dimension_numbers<[2], [2], [1], [1], [0, 0, 0, 1, 1, 1], [0], [0]>} : vector<16x16x4xf32>, vector<16x16x4xf32>, vector<16x16x16xf32> -> vector<16x16x16xf32>
    "tpu.trace_stop"() : () -> ()
    "tpu.trace_start"() <{level = 10 : i32, message = "whd,wgd->whg"}> : () -> ()
    %cst_9 = arith.constant dense<0.000000e+00> : vector<16x16x16xf32>
    %19 = tpu.matmul %15, %16, %cst_9 {dimension_numbers = #tpu.dot_dimension_numbers<[2], [2], [1], [1], [0, 0, 0, 1, 1, 1], [0], [0]>} : vector<16x16x4xf32>, vector<16x16x4xf32>, vector<16x16x16xf32> -> vector<16x16x16xf32>
    "tpu.trace_stop"() : () -> ()
    %20 = tpu.iota {dimensions = array<i32: 0>} : vector<16x16xi32>
    %21 = tpu.iota {dimensions = array<i32: 1>} : vector<16x16xi32>
    %22 = arith.cmpi eq, %20, %21 : vector<16x16xi32>
    %cst_10 = arith.constant -1.000000e+30 : f32
    %cst_11 = arith.constant 0.000000e+00 : f32
    %23 = vector.broadcast %cst_10 : f32 to vector<16x16xf32>
    %24 = vector.broadcast %cst_11 : f32 to vector<16x16xf32>
    %25 = arith.select %22, %23, %24 : vector<16x16xi1>, vector<16x16xf32>
    %26 = vector.shape_cast %25 : vector<16x16xf32> to vector<1x16x16xf32>
    %27 = vector.broadcast %26 : vector<1x16x16xf32> to vector<16x16x16xf32>
    %28 = arith.addf %19, %27 : vector<16x16x16xf32>
    %cst_12 = arith.constant dense<0xFF800000> : vector<16x16xf32>
    %29 = vector.multi_reduction <maximumf>, %18, %cst_12 [2] : vector<16x16x16xf32> to vector<16x16xf32>
    %cst_13 = arith.constant dense<0xFF800000> : vector<16x16xf32>
    %30 = vector.multi_reduction <maximumf>, %28, %cst_13 [2] : vector<16x16x16xf32> to vector<16x16xf32>
    %31 = tpu.transpose %30, [1, 0] : vector<16x16xf32> -> vector<16x16xf32>
    %32 = arith.maximumf %29, %31 : vector<16x16xf32>
    %33 = tpu.transpose %32, [1, 0] : vector<16x16xf32> -> vector<16x16xf32>
    %34 = vector.shape_cast %32 : vector<16x16xf32> to vector<16x16x1xf32>
    %35 = vector.broadcast %34 : vector<16x16x1xf32> to vector<16x16x16xf32>
    %36 = arith.subf %18, %35 : vector<16x16x16xf32>
    %37 = math.exp %36 : vector<16x16x16xf32>
    %38 = vector.shape_cast %33 : vector<16x16xf32> to vector<16x16x1xf32>
    %39 = vector.broadcast %38 : vector<16x16x1xf32> to vector<16x16x16xf32>
    %40 = arith.subf %28, %39 : vector<16x16x16xf32>
    %41 = math.exp %40 : vector<16x16x16xf32>
    %cst_14 = arith.constant dense<0.000000e+00> : vector<16x16xf32>
    %42 = vector.multi_reduction <add>, %37, %cst_14 [2] : vector<16x16x16xf32> to vector<16x16xf32>
    %cst_15 = arith.constant dense<0.000000e+00> : vector<16x16xf32>
    %43 = vector.multi_reduction <add>, %41, %cst_15 [2] : vector<16x16x16xf32> to vector<16x16xf32>
    %44 = tpu.transpose %43, [1, 0] : vector<16x16xf32> -> vector<16x16xf32>
    %45 = arith.addf %42, %44 : vector<16x16xf32>
    %46 = tpu.reciprocal %45 {approx = true} : vector<16x16xf32> -> vector<16x16xf32>
    %47 = arith.mulf %45, %46 : vector<16x16xf32>
    %cst_16 = arith.constant 2.000000e+00 : f32
    %48 = vector.broadcast %cst_16 : f32 to vector<16x16xf32>
    %49 = arith.subf %48, %47 : vector<16x16xf32>
    %50 = arith.mulf %46, %49 : vector<16x16xf32>
    "tpu.trace_start"() <{level = 10 : i32, message = "hwv,hvc->hwc"}> : () -> ()
    %cst_17 = arith.constant dense<0.000000e+00> : vector<16x16x32xf32>
    %51 = tpu.matmul %37, %14, %cst_17 {dimension_numbers = #tpu.dot_dimension_numbers<[2], [1], [1], [2], [0, 0, 0, 1, 1, 2], [0], [0]>} : vector<16x16x16xf32>, vector<16x16x32xf32>, vector<16x16x32xf32> -> vector<16x16x32xf32>
    "tpu.trace_stop"() : () -> ()
    "tpu.trace_start"() <{level = 10 : i32, message = "whg,wgc->whc"}> : () -> ()
    %cst_18 = arith.constant dense<0.000000e+00> : vector<16x16x32xf32>
    %52 = tpu.matmul %41, %17, %cst_18 {dimension_numbers = #tpu.dot_dimension_numbers<[2], [1], [1], [2], [0, 0, 0, 1, 1, 2], [0], [0]>} : vector<16x16x16xf32>, vector<16x16x32xf32>, vector<16x16x32xf32> -> vector<16x16x32xf32>
    "tpu.trace_stop"() : () -> ()
    %53 = tpu.transpose %52, [1, 0, 2] : vector<16x16x32xf32> -> vector<16x16x32xf32>
    %54 = vector.broadcast %2 : f32 to vector<16x16xf32>
    %55 = arith.mulf %54, %50 : vector<16x16xf32>
    %56 = vector.shape_cast %55 : vector<16x16xf32> to vector<16x16x1xf32>
    %57 = arith.addf %53, %51 : vector<16x16x32xf32>
    %58 = vector.broadcast %56 : vector<16x16x1xf32> to vector<16x16x32xf32>
    %59 = arith.mulf %58, %57 : vector<16x16x32xf32>
    %60 = arith.addf %59, %1 : vector<16x16x32xf32>
    %c0_19 = arith.constant 0 : index
    %c0_20 = arith.constant 0 : index
    %c0_21 = arith.constant 0 : index
    %c0_22 = arith.constant 0 : index
    %61 = vector.load %arg5[%c0_19, %c0_20, %c0_21, %c0_22] : memref<1x16x16x32xf32, #tpu.memory_space<vmem>>, vector<1x16x16x32xf32>
    %62 = vector.shape_cast %61 : vector<1x16x16x32xf32> to vector<16x16x32xf32>
    %63 = vector.shape_cast %60 : vector<16x16x32xf32> to vector<1x16x16x32xf32>
    tpu.vector_store %arg5[%c0_19, %c0_20, %c0_21, %c0_22], %63 {strides = array<i32>} : memref<1x16x16x32xf32, #tpu.memory_space<vmem>>, vector<1x16x16x32xf32>,
    return
  }
  func.func @transform_0(%arg0: i32) -> (i32, i32, i32, i32) {
    %c0_i32 = arith.constant 0 : i32
    %c0_i32_0 = arith.constant 0 : i32
    %c0_i32_1 = arith.constant 0 : i32
    %c0_i32_2 = arith.constant 0 : i32
    return %arg0, %c0_i32, %c0_i32_0, %c0_i32_1 : i32, i32, i32, i32
  }
  func.func @transform_1(%arg0: i32) -> (i32, i32) {
    %c0_i32 = arith.constant 0 : i32
    %c0_i32_0 = arith.constant 0 : i32
    %c0_i32_1 = arith.constant 0 : i32
    return %c0_i32, %c0_i32_0 : i32, i32
  }
  func.func @transform_2(%arg0: i32) -> (i32, i32) {
    %c0_i32 = arith.constant 0 : i32
    %c0_i32_0 = arith.constant 0 : i32
    %c0_i32_1 = arith.constant 0 : i32
    return %c0_i32, %c0_i32_0 : i32, i32
  }
  func.func @transform_3(%arg0: i32) -> i32 {
    %c0_i32 = arith.constant 0 : i32
    %c0_i32_0 = arith.constant 0 : i32
    return %c0_i32 : i32
  }
  func.func @transform_4(%arg0: i32) -> (i32, i32, i32, i32) {
    %c0_i32 = arith.constant 0 : i32
    %c0_i32_0 = arith.constant 0 : i32
    %c0_i32_1 = arith.constant 0 : i32
    %c0_i32_2 = arith.constant 0 : i32
    return %arg0, %c0_i32, %c0_i32_0, %c0_i32_1 : i32, i32, i32, i32
  }
}

</mosaic_0001>

<bundles_post_ra>
// kernel: tpu_custom_call.1
= control target key start
LH: loop header
LB: loop body
LE: loop exit
PB: predicated region body
PF: predicated region fallthrough
CT: control target
= control target key end

     0   :  { %s16315_s0 = inlined_call_operand.hbm [shape: f32[2,16,16,32], index: 0, kind: input, shape index: {}]   ;;  %s16316_s1 = inlined_call_operand.hbm [shape: f32[32,40], index: 1, kind: input, shape index: {}]   ;;  %s16317_s2 = inlined_call_operand.vmem [shape: f32[1,40], index: 2, kind: input, shape index: {}]   ;;  %s16318_s3 = inlined_call_operand.<no memory space> [shape: f32[1], index: 3, kind: input, shape index: {}]   ;;  %s16319_s4 = inlined_call_operand.hbm [shape: f32[2,16,16,32], index: 4, kind: output, shape index: {}]  }
   0x1   :  { %9 = sst [smem:[#allocation2]] %s16318_s3 }
   0x2   :  { %10 = vsyncpa [#allocation4], 0 }
   0x3   :  { %12 = vsyncpa [#allocation4 + $0x1], 0 }
   0x4   :  { %13 = vsyncpa [#allocation7], 0 }
   0x5   :  { %14 = vsyncpa [#allocation5], 0 }
   0x6   :  { %16 = vsyncpa [#allocation5 + $0x1], 0  ;;  %s12743_s17 = smov 0   ;;  %s12745_s18 = smov 0  }
   0x7   :  { %s12747_s19 = smov 0   ;;  %s12749_s20 = smov 0  }
   0x8 LB: > { %s12764_s3 = sadd.s32 4294967295, %s12700_s20   ;;  %s10912_s21 = sadd.s32 4294967294, %s12700_s20   ;;  %s12700_s20 = sphi %s12749_s20, %s17022_s20   ;;  %s12696_s19 = sphi %s12747_s19, %s17021_s19   ;;  %s12692_s18 = sphi %s12745_s18, %s17020_s18   ;;  %s12688_s17 = sphi %s12743_s17, %s17019_s17  }
   0x9   : > { %p42_p0 = scmp.ne.s32.totalorder %s12692_s18, %s12688_s17  ;;  %p16320_p1 = scmp.eq.s32.totalorder %s12764_s3, 0 }
   0xa   : > { %p135_p3 = scmp.eq.s32.totalorder %s10912_s21, 1  ;;  %p10913_p5 = scmp.ge.s32.totalorder %s12700_s20, 1 }
   0xb   : > { %p12773_p4 = por %p16320_p1, %p42_p0  ;;  %p142_p7 = scmp.lt.s32.totalorder %s12700_s20, 3 }
   0xc   : > { %p12778_p6 = por %p135_p3, %p42_p0  ;;  %s12702_s25 = smov [#allocation6]  }
   0xd   : > { %s16530_s22 = scalar_select %p12773_p4, 1, 0 }
   0xe   : > { %s16531_s23 = scalar_select %p12778_p6, 1, 0 }
   0xf   : > { %p12783_p8 = pnand %p10913_p5, %p142_p7  ;;  %s154_s26 = sshll.u32 %s12702_s25, 4  ;;  %s12787_s26 = int_to_ptr.vmem [resolvable:$true] %s154_s26 }
  0x10   : > { %s12799_s28 = sadd.s32 1, %s12700_s20   ;;  %s29_s29 = sadd.s32 1, %s12696_s19 }
  0x11   : > { %s16532_s24 = scalar_select %p12783_p8, 1, 0 }
  0x12   : > { %p12287_p9 = pneg %p12783_p8  ;;  %s26_s30 = ssub.s32 %s12700_s20, %s12799_s28 }
  0x13   : > { %s12572_s7 = scalar_lea.hbm %s16316_s1, 512 }
  0x14   : > { %p12794_p11 = pnand %p12287_p9, %p16320_p1  ;;  %p12573_p12 = scmp.ne.s32.totalorder %s16316_s1, %s12572_s7 }
  0x15   : > { %p12579_p5 = scmp.lt.u32.totalorder %s12572_s7, %s16316_s1 }
  0x16   : > { %p12574_p13 = pneg %p12794_p11 }
  0x18   : > { %p12575_p0 = pnand %p12574_p13, %p12573_p12 }
  0x1a   : > { %p12576_p3 = pneg %p12575_p0 }
  0x1c   : > { %p12581_p7 = pnand %p12579_p5, %p12576_p3 }
  0x1e   : > { %12584 = shalt.err (!%p12581_p7)
}
  0x1f   : > { %s12585_s12 = scalar_lea.vmem %s12787_s26, 512  ;;  %p12593_p2 = scmp.lt.s32.totalorder %s12787_s26, %s12787_s26 }
  0x20   : > { %p12586_p9 = scmp.ne.s32.totalorder %s12787_s26, %s12585_s12  ;;  %p12594_p6 = scmp.lt.s32.totalorder %s12585_s12, %s12585_s12 }
  0x22   : > { %p12588_p10 = pnand %p12586_p9, %p12574_p13  ;;  %p12595_p4 = por %p12594_p6, %p12593_p2 }
  0x24   : > { %p12589_p1 = pneg %p12588_p10 }
  0x26   : > { %p12596_p8 = pnand %p12595_p4, %p12589_p1 }
  0x28   : > { %12599 = shalt.err (!%p12596_p8)
}
  0x29   : > { %s12703_s13 = smov 128   ;;  %s12704_s14 = smov 8  }
  0x2a   : > { %12290 = dma.hbm_to_vmem [thread:$0]  (!%p12794_p11), %s16316_s1, 512, %s12787_s26, [#allocation7], %s12703_s13, %s12703_s13, %s12704_s14  }
  0x2b   : > { %p27_p1 = scmp.eq.s32.totalorder %s26_s30, 0  ;;  %p36_p2 = scmp.ne.s32.totalorder %s12696_s19, %s12692_s18 }
  0x2c   : > { %p37_p4 = scmp.eq.s32.totalorder %s12700_s20, 0  ;;  %p12300_p6 = scmp.lt.s32.totalorder %s12700_s20, 2 }
  0x2d   : > { %s12833_s21 = scalar_select %p27_p1, %s12696_s19, %s29_s29  }
  0x2e   : > { %p38_p8 = por %p37_p4, %p36_p2  ;;  %p16534_p10 = scmp.eq.s32.totalorder %s12764_s3, 1 }
  0x2f   : > { %s174_s27 = sand.u32 1, %s12696_s19   ;;  %s11153_s5 = sshll.u32 %s12700_s20, 12 }
  0x30   : > { %p12837_p12 = por %p16534_p10, %p36_p2  ;;  %s10916_s6 = sshll.u32 %s174_s27, 8 }
  0x31   : > { %s12846_s9 = scalar_lea.hbm %s16315_s0, %s11153_s5  ;;  %s178_s26 = scalar_lea.vmem [#allocation3], %s10916_s6 }
  0x32   : > { %s185_s29 = sshll.u32 %s178_s26, 4  ;;  %p12848_p11 = pnand %p12300_p6, %p38_p8  ;;  %s12852_s29 = int_to_ptr.vmem [resolvable:$true] %s185_s29 }
  0x33   : > { %s12854_s10 = scalar_lea.sflag [#allocation4], %s174_s27  ;;  %s12600_s11 = scalar_lea.hbm %s12846_s9, 4096 }
  0x34   : > { %p12601_p13 = scmp.ne.s32.totalorder %s12846_s9, %s12600_s11  ;;  %p12602_p0 = pneg %p12848_p11 }
  0x35   : > { %s12605_s16 = scalar_lea.hbm %s16315_s0, 8192  ;;  %p12606_p7 = scmp.lt.u32.totalorder %s12846_s9, %s16315_s0 }
  0x36   : > { %p12603_p3 = pnand %p12602_p0, %p12601_p13  ;;  %p12607_p9 = scmp.lt.u32.totalorder %s12605_s16, %s12600_s11 }
  0x37   : > { %p12609_p2 = scmp.lt.u32.totalorder %s12600_s11, %s12846_s9 }
  0x38   : > { %p12604_p5 = pneg %p12603_p3  ;;  %p12608_p1 = por %p12607_p9, %p12606_p7 }
  0x3a   : > { %p12610_p4 = por %p12609_p2, %p12608_p1 }
  0x3c   : > { %p12611_p6 = pnand %p12610_p4, %p12604_p5 }
  0x3e   : > { %12614 = shalt.err (!%p12611_p6)
}
  0x3f   : > { %s12615_s27 = scalar_lea.vmem %s12852_s29, 4096  ;;  %s12705_s7 = smov [#allocation3]  }
  0x40   : > { %p12616_p8 = scmp.ne.s32.totalorder %s12852_s29, %s12615_s27  ;;  %s12620_s8 = sshll.u32 %s12705_s7, 4  ;;  %s12621_s8 = int_to_ptr.vmem [resolvable:$false] %s12620_s8 }
  0x41   : > { %s12622_s26 = scalar_lea.vmem %s12621_s8, 8192  ;;  %p12623_p3 = scmp.lt.s32.totalorder %s12852_s29, %s12621_s8 }
  0x42   : > { %p12618_p10 = pnand %p12616_p8, %p12602_p0  ;;  %p12624_p7 = scmp.lt.s32.totalorder %s12622_s26, %s12615_s27 }
  0x44   : > { %p12619_p13 = pneg %p12618_p10  ;;  %p12625_p9 = por %p12624_p7, %p12623_p3 }
  0x46   : > { %p12626_p1 = pnand %p12625_p9, %p12619_p13 }
  0x48   : > { %12629 = shalt.err (!%p12626_p1)
}
  0x49   : > { %12294 = dma.hbm_to_vmem [thread:$0]  (!%p12848_p11), %s12846_s9, 4096, %s12852_s29, %s12854_s10, %s12703_s13, %s12703_s13, %s12704_s14  }
  0x4a   : > { %p16537_p0 = scmp.ne.s32.totalorder %s16532_s24, 0 }
  0x4c   : > { %197 = sbr.rel (%p16537_p0) target bundleno = 2436 (0x984), region = 36 }
  0x53   : > { %s12888_s11 = sand.u32 1, %s12692_s18   ;;  %p16538_p5 = scmp.ne.s32.totalorder %s16530_s22, 0 }
  0x54   : > { %s10920_s12 = sshll.u32 %s12888_s11, 8  ;;  %s200_s15 = scalar_lea.sflag [#allocation4], %s12888_s11 }
  0x55   : > { %s12894_s30 = scalar_lea.vmem [#allocation3], %s10920_s12 }
  0x56   : > { %12675 = dma.done.wait (%p16538_p5), %s200_s15, 4096  }
  0x57   : > { %12677 = vsyncadd (%p16538_p5), %s200_s15, 4294963200  ;;  %p16539_p11 = scmp.eq.s32.totalorder %s12764_s3, 0 }
  0x59   : > { %12679 = dma.done.wait (%p16539_p11), [#allocation7], 512   ;;  %p16540_p2 = pmov %p16539_p11 }
  0x5a   : > { %vm276_vm0 = vcmask 261120   ;;  %v265_v0 = vld [vmem:[#allocation6] sm:$0xff]  ;;  %v266_v1 = vld [vmem:[#allocation6 + $0x8] sm:$0xff]  ;;  %v267_v2 = vld [vmem:[#allocation6 + $0x10] sm:$0xff]  ;;  %vm2454_vm1 = vcmask 31744   ;;  %s12706_s13 = smov 124  }
  0x5b   : > { %12681 = vsyncadd (%p16540_p2), [#allocation7], 4294966784  ;;  %v11951_v3 = vpack.c.bf16 %v266_v1, %v265_v0  ;;  %v268_v4 = vld [vmem:[#allocation6 + $0x18] sm:$0xff]  ;;  %v232_v5 = vld [vmem:[%s12894_s30] sm:$0xff]  ;;  %s12707_s14 = smov 120   ;;  %vm5184_vm3 = vcmask 130048  }
  0x5c   : > { %v11955_v6 = vpack.c.bf16 %v268_v4, %v267_v2  ;;  %11455 = vmatprep.mubr.msk.f32.mxu0 %vm276_vm0, %v232_v5  ;;  %v233_v7 = vld [vmem:[%s12894_s30 + $0x8] sm:$0xff]  ;;  %v234_v8 = vld [vmem:[%s12894_s30 + $0x10] sm:$0xff]  ;;  %v235_v9 = vld [vmem:[%s12894_s30 + $0x18] sm:$0xff]  ;;  %vm5418_vm6 = vcmask 130112   ;;  %vm5555_vm7 = vcmask 1041409   ;;  %vm5557_vm8 = vcmask 1042434  }
  0x5d   : > { %11952 = vmatprep.subr.bf16.mxu0 %v11951_v3  ;;  %v236_v10 = vld [vmem:[%s12894_s30 + $0x20] sm:$0xff]  ;;  %v237_v11 = vld [vmem:[%s12894_s30 + $0x28] sm:$0xff]  ;;  %v238_v12 = vld [vmem:[%s12894_s30 + $0x30] sm:$0xff]  ;;  %vm5559_vm9 = vcmask 1043459   ;;  %vm5561_vm10 = vcmask 1044484   ;;  %vm5563_vm11 = vcmask 1045509  }
  0x5e   : > { %11954 = vmatpush3.bf16.msra.mxu0 %v11951_v3  ;;  %v239_v13 = vld [vmem:[%s12894_s30 + $0x38] sm:$0xff]  ;;  %v240_v14 = vld [vmem:[%s12894_s30 + $0x40] sm:$0xff]  ;;  %v241_v15 = vld [vmem:[%s12894_s30 + $0x48] sm:$0xff]  ;;  %vm5565_vm12 = vcmask 1046534   ;;  %vm5567_vm13 = vcmask 1047559   ;;  %s264_s9 = sld [smem:[#allocation2]] }
  0x5f   : > { %11956 = vmatprep.subr.bf16.mxu0 %v11955_v6  ;;  %v242_v16 = vld [vmem:[%s12894_s30 + $0x50] sm:$0xff]  ;;  %v243_v17 = vld [vmem:[%s12894_s30 + $0x58] sm:$0xff]  ;;  %v244_v18 = vld [vmem:[%s12894_s30 + $0x60] sm:$0xff]  ;;  %s16136_s29 = scalar_lea.vmem [#allocation8], %s10920_s12  ;;  %s11154_s10 = sshll.u32 %s12764_s3, 12 }
  0x60   : > { %v245_v19 = vld [vmem:[%s12894_s30 + $0x68] sm:$0xff]  ;;  %v246_v20 = vld [vmem:[%s12894_s30 + $0x70] sm:$0xff]  ;;  %v247_v21 = vld [vmem:[%s12894_s30 + $0x78] sm:$0xff]  ;;  %s10829_s16 = sshll.u32 %s16136_s29, 4  ;;  %s16266_s27 = scalar_lea.hbm %s16319_s4, %s11154_s10  ;;  %s16268_s16 = int_to_ptr.vmem [resolvable:$true] %s10829_s16 }
  0x61   : > { %v248_v22 = vld [vmem:[%s12894_s30 + $0x80] sm:$0xff]  ;;  %v249_v23 = vld [vmem:[%s12894_s30 + $0x88] sm:$0xff]  ;;  %v250_v24 = vld [vmem:[%s12894_s30 + $0x90] sm:$0xff]  ;;  %s10816_s3 = scalar_lea.sflag [#allocation5], %s12888_s11  ;;  %s12630_s7 = scalar_lea.vmem %s16268_s16, 4096 }
  0x62   : > { %11958 = vmatpush3.bf16.msra.mxu0 %v11955_v6  ;;  %v251_v25 = vld [vmem:[%s12894_s30 + $0x98] sm:$0xff]  ;;  %v252_v26 = vld [vmem:[%s12894_s30 + $0xa0] sm:$0xff]  ;;  %v253_v27 = vld [vmem:[%s12894_s30 + $0xa8] sm:$0xff]  ;;  %p12631_p4 = scmp.ne.s32.totalorder %s16268_s16, %s12630_s7  ;;  %s12712_s8 = smov [#allocation8]  }
  0x63   : > { %v254_v28 = vld [vmem:[%s12894_s30 + $0xb0] sm:$0xff]  ;;  %v255_v29 = vld [vmem:[%s12894_s30 + $0xb8] sm:$0xff]  ;;  %v256_v30 = vld [vmem:[%s12894_s30 + $0xc0] sm:$0xff]  ;;  %s12634_s26 = sshll.u32 %s12712_s8, 4  ;;  %s12635_s26 = int_to_ptr.vmem [resolvable:$false] %s12634_s26 }
  0x64   : > { %v257_v31 = vld [vmem:[%s12894_s30 + $0xc8] sm:$0xff]  ;;  %v258_v32 = vld [vmem:[%s12894_s30 + $0xd0] sm:$0xff]  ;;  %v259_v33 = vld [vmem:[%s12894_s30 + $0xd8] sm:$0xff]  ;;  %p12632_p6 = pnand %p12631_p4, %p12837_p12  ;;  %s12636_s12 = scalar_lea.vmem %s12635_s26, 8192 }
  0x65   : > { %11456 = vmatmul.mubr.msk.f32.vlgmr.msra.gmra.mrb[0].mxu0 %vm276_vm0, %v233_v7  ;;  %v260_v34 = vld [vmem:[%s12894_s30 + $0xe0] sm:$0xff]  ;;  %v261_v35 = vld [vmem:[%s12894_s30 + $0xe8] sm:$0xff]  ;;  %v262_v36 = vld [vmem:[%s12894_s30 + $0xf0] sm:$0xff]  ;;  %p12637_p10 = scmp.lt.s32.totalorder %s16268_s16, %s12635_s26  ;;  %p12638_p13 = scmp.lt.s32.totalorder %s12636_s12, %s12630_s7 }
  0x66   : > { %11458 = vmatprep.mubr.msk.f32.mxu0 %vm276_vm0, %v234_v8  ;;  %v263_v37 = vld [vmem:[%s12894_s30 + $0xf8] sm:$0xff]  ;;  %v12971_v38 = vld [vmem:[%s16317_s2] ss:$0 sm:$0xff]  ;;  %vm13199_vm2 = vmpackc.low %vm2454_vm1, %vm2454_vm1  ;;  %p12633_p8 = pneg %p12632_p6 }
  0x67   : > { %p12639_p3 = por %p12638_p13, %p12637_p10 }
  0x69   : > { %11459 = vmatmul.mubr.msk.f32.gmra.mrb[2].mxu0 %vm276_vm0, %v235_v9  ;;  %p12640_p7 = pnand %p12639_p3, %p12633_p8 }
  0x6a   : > { %11461 = vmatprep.mubr.msk.f32.mxu0 %vm276_vm0, %v236_v10 }
  0x6d   : > { %11462 = vmatmul.mubr.msk.f32.gmra.mrb[4].mxu0 %vm276_vm0, %v237_v11 }
  0x6e   : > { %11464 = vmatprep.mubr.msk.f32.mxu0 %vm276_vm0, %v238_v12 }
  0x71   : > { %11465 = vmatmul.mubr.msk.f32.gmra.mrb[6].mxu0 %vm276_vm0, %v239_v13 }
  0x72   : > { %11467 = vmatprep.mubr.msk.f32.mxu0 %vm276_vm0, %v240_v14 }
  0x75   : > { %11468 = vmatmul.mubr.msk.f32.gmra.mrb[8].mxu0 %vm276_vm0, %v241_v15 }
  0x76   : > { %11470 = vmatprep.mubr.msk.f32.mxu0 %vm276_vm0, %v242_v16 }
  0x79   : > { %11471 = vmatmul.mubr.msk.f32.gmra.mrb[10].mxu0 %vm276_vm0, %v243_v17 }
  0x7a   : > { %11473 = vmatprep.mubr.msk.f32.mxu0 %vm276_vm0, %v244_v18 }
  0x7d   : > { %11474 = vmatmul.mubr.msk.f32.gmra.mrb[12].mxu0 %vm276_vm0, %v245_v19 }
  0x7e   : > { %11476 = vmatprep.mubr.msk.f32.mxu0 %vm276_vm0, %v246_v20 }
  0x81   : > { %11477 = vmatmul.mubr.msk.f32.gmra.mrb[14].mxu0 %vm276_vm0, %v247_v21 }
  0x82   : > { %11479 = vmatprep.mubr.msk.f32.mxu0 %vm276_vm0, %v248_v22 }
  0x85   : > { %11480 = vmatmul.mubr.msk.f32.gmra.mrb[16].mxu0 %vm276_vm0, %v249_v23 }
  0x86   : > { %11482 = vmatprep.mubr.msk.f32.mxu0 %vm276_vm0, %v250_v24 }
  0x89   : > { %11483 = vmatmul.mubr.msk.f32.gmra.mrb[18].mxu0 %vm276_vm0, %v251_v25 }
  0x8a   : > { %11485 = vmatprep.mubr.msk.f32.mxu0 %vm276_vm0, %v252_v26 }
  0x8d   : > { %11486 = vmatmul.mubr.msk.f32.gmra.mrb[20].mxu0 %vm276_vm0, %v253_v27 }
  0x8e   : > { %11488 = vmatprep.mubr.msk.f32.mxu0 %vm276_vm0, %v254_v28 }
  0x91   : > { %11489 = vmatmul.mubr.msk.f32.gmra.mrb[22].mxu0 %vm276_vm0, %v255_v29 }
  0x92   : > { %11491 = vmatprep.mubr.msk.f32.mxu0 %vm276_vm0, %v256_v30 }
  0x95   : > { %11492 = vmatmul.mubr.msk.f32.gmra.mrb[24].mxu0 %vm276_vm0, %v257_v31 }
  0x96   : > { %11494 = vmatprep.mubr.msk.f32.mxu0 %vm276_vm0, %v258_v32 }
  0x99   : > { %11495 = vmatmul.mubr.msk.f32.gmra.mrb[26].mxu0 %vm276_vm0, %v259_v33 }
  0x9a   : > { %11497 = vmatprep.mubr.msk.f32.mxu0 %vm276_vm0, %v260_v34 }
  0x9d   : > { %11498 = vmatmul.mubr.msk.f32.gmra.mrb[28].mxu0 %vm276_vm0, %v261_v35 }
  0x9e   : > { %11500 = vmatprep.mubr.msk.f32.mxu0 %vm276_vm0, %v262_v36 }
  0xa1   : > { %11501 = vmatmul.mubr.msk.f32.gmra.mrb[30].mxu0 %vm276_vm0, %v263_v37 }
 0x138   : > { %v11457_v39 = vpop.f32.mrb[0].mxu0 }
 0x139   : > { %v439_v40 = vpop.f32.mrb[1].mxu0  ;;  %v12981_v44 = vadd.f32 %v11457_v39, %v12971_v38 }
 0x13a   : > { %v12974_v41 = vadd.f32 %v12971_v38, %v439_v40 }
 0x13c   : > { %v11460_v42 = vpop.f32.mrb[2].mxu0  ;;  %1174 = vrot.lane.b32.xlu0 %v12974_v41, %s12706_s13  ;;  %11507 = vmatprep.mubr.msk.f32.mxu1 %vm2454_vm1, %v12974_v41 }
 0x13d   : > { %v449_v43 = vpop.f32.mrb[3].mxu0  ;;  %v12987_v46 = vadd.f32 %v11460_v42, %v12971_v38 }
 0x13e   : > { %v12984_v45 = vadd.f32 %v12971_v38, %v449_v43 }
 0x13f   : > { %16541 = vst [vmem:[#allocation12_spill] sm:$0xff] %v12987_v46 }
 0x140   : > { %v11463_v47 = vpop.f32.mrb[4].mxu0  ;;  %1178 = vrot.lane.b32.xlu1 %v12984_v45, %s12706_s13  ;;  %1176 = vrot.lane.b32.xlu0 %v12981_v44, %s12706_s13 }
 0x141   : > { %v459_v48 = vpop.f32.mrb[5].mxu0  ;;  %v13001_v52 = vadd.f32 %v11463_v47, %v12971_v38 }
 0x142   : > { %v12994_v49 = vadd.f32 %v12971_v38, %v459_v48 }
 0x144   : > { %v11466_v50 = vpop.f32.mrb[6].mxu0  ;;  %1180 = vrot.lane.b32.xlu1 %v12987_v46, %s12706_s13  ;;  %1182 = vrot.lane.b32.xlu0 %v12994_v49, %s12706_s13 }
 0x145   : > { %v469_v51 = vpop.f32.mrb[7].mxu0  ;;  %v13011_v56 = vadd.f32 %v11466_v50, %v12971_v38 }
 0x146   : > { %v13004_v53 = vadd.f32 %v12971_v38, %v469_v51 }
 0x147   : > { %16542 = vst [vmem:[#allocation13_spill] sm:$0xff] %v13011_v56 }
 0x148   : > { %v11469_v54 = vpop.f32.mrb[8].mxu0  ;;  %1184 = vrot.lane.b32.xlu1 %v13001_v52, %s12706_s13  ;;  %1186 = vrot.lane.b32.xlu0 %v13004_v53, %s12706_s13 }
 0x149   : > { %v479_v55 = vpop.f32.mrb[9].mxu0  ;;  %v13017_v58 = vadd.f32 %v11469_v54, %v12971_v38 }
 0x14a   : > { %v13014_v57 = vadd.f32 %v12971_v38, %v479_v55 }
 0x14c   : > { %v11472_v59 = vpop.f32.mrb[10].mxu0  ;;  %1188 = vrot.lane.b32.xlu1 %v13011_v56, %s12706_s13  ;;  %1190 = vrot.lane.b32.xlu0 %v13014_v57, %s12706_s13 }
 0x14d   : > { %v489_v60 = vpop.f32.mrb[11].mxu0  ;;  %v13027_v62 = vadd.f32 %v11472_v59, %v12971_v38 }
 0x14e   : > { %v13024_v61 = vadd.f32 %v12971_v38, %v489_v60 }
 0x150   : > { %v11475_v63 = vpop.f32.mrb[12].mxu0  ;;  %1192 = vrot.lane.b32.xlu1 %v13017_v58, %s12706_s13  ;;  %1194 = vrot.lane.b32.xlu0 %v13024_v61, %s12706_s13 }
 0x151   : > { %v499_v0 = vpop.f32.mrb[13].mxu0  ;;  %v13037_v2 = vadd.f32 %v11475_v63, %v12971_v38 }
 0x152   : > { %v13034_v1 = vadd.f32 %v12971_v38, %v499_v0 }
 0x154   : > { %v11478_v3 = vpop.f32.mrb[14].mxu0  ;;  %1196 = vrot.lane.b32.xlu1 %v13027_v62, %s12706_s13  ;;  %1198 = vrot.lane.b32.xlu0 %v13034_v1, %s12706_s13 }
 0x155   : > { %v509_v4 = vpop.f32.mrb[15].mxu0  ;;  %v13051_v8 = vadd.f32 %v11478_v3, %v12971_v38 }
 0x156   : > { %v13044_v5 = vadd.f32 %v12971_v38, %v509_v4 }
 0x158   : > { %v11481_v6 = vpop.f32.mrb[16].mxu0  ;;  %1200 = vrot.lane.b32.xlu1 %v13037_v2, %s12706_s13  ;;  %1202 = vrot.lane.b32.xlu0 %v13044_v5, %s12706_s13 }
 0x159   : > { %v519_v7 = vpop.f32.mrb[17].mxu0  ;;  %v13057_v10 = vadd.f32 %v11481_v6, %v12971_v38 }
 0x15a   : > { %v13054_v9 = vadd.f32 %v12971_v38, %v519_v7 }
 0x15b   : > { %16543 = vst [vmem:[#allocation14_spill] sm:$0xff] %v13057_v10 }
 0x15c   : > { %v11484_v11 = vpop.f32.mrb[18].mxu0  ;;  %1204 = vrot.lane.b32.xlu1 %v13051_v8, %s12706_s13  ;;  %1206 = vrot.lane.b32.xlu0 %v13054_v9, %s12706_s13 }
 0x15d   : > { %v529_v12 = vpop.f32.mrb[19].mxu0  ;;  %11563 = vmatprep.mubr.msk.f32.mxu0 %vm2454_vm1, %v13054_v9  ;;  %v13069_v14 = vadd.f32 %v11484_v11, %v12971_v38  ;;  %v12708_v11 = vmov 1983009808  }
 0x15e   : > { %v13066_v13 = vadd.f32 %v12971_v38, %v529_v12  ;;  %v601_v12 = vunpack.c.l.s4 %v12708_v11  ;;  %v598_v11 = vcombine.low %v12974_v41, %v12994_v49 }
 0x15f   : > { %16544 = vst [vmem:[#allocation15_spill] sm:$0xff] %v13069_v14 }
 0x160   : > { %v11487_v15 = vpop.f32.mrb[20].mxu0  ;;  %1208 = vrot.lane.b32.xlu1 %v13057_v10, %s12706_s13  ;;  %1210 = vrot.lane.b32.xlu0 %v13066_v13, %s12706_s13 }
 0x161   : > { %v539_v16 = vpop.f32.mrb[21].mxu0  ;;  %v13079_v18 = vadd.f32 %v11487_v15, %v12971_v38  ;;  %v16323_v15 = vlaneseq }
 0x162   : > { %v13076_v17 = vadd.f32 %v12971_v38, %v539_v16 }
 0x164   : > { %v11490_v19 = vpop.f32.mrb[22].mxu0  ;;  %1212 = vrot.lane.b32.xlu1 %v13069_v14, %s12706_s13  ;;  %1214 = vrot.lane.b32.xlu0 %v13076_v17, %s12706_s13 }
 0x165   : > { %v549_v20 = vpop.f32.mrb[23].mxu0  ;;  %v13093_v24 = vadd.f32 %v11490_v19, %v12971_v38 }
 0x166   : > { %v13086_v21 = vadd.f32 %v12971_v38, %v549_v20 }
 0x167   : > { %16546 = vst [vmem:[#allocation17_spill] sm:$0xff] %v13093_v24 }
 0x168   : > { %16545 = vst [vmem:[#allocation16_spill] sm:$0xff] %v13086_v21  ;;  %v11493_v22 = vpop.f32.mrb[24].mxu0  ;;  %1216 = vrot.lane.b32.xlu1 %v13079_v18, %s12706_s13  ;;  %1218 = vrot.lane.b32.xlu0 %v13086_v21, %s12706_s13 }
 0x169   : > { %v559_v23 = vpop.f32.mrb[25].mxu0  ;;  %v13099_v26 = vadd.f32 %v11493_v22, %v12971_v38  ;;  %v602_v22 = vunpack.c.0.s8 %v601_v12  ;;  %v615_v12 = vcombine.high %v12984_v45, %v13004_v53 }
 0x16a   : > { %v13096_v25 = vadd.f32 %v12971_v38, %v559_v23  ;;  %v13270_v23 = vshrl.u32 %v16323_v15, 7 }
 0x16c   : > { %v11496_v27 = vpop.f32.mrb[26].mxu0  ;;  %1220 = vrot.lane.b32.xlu1 %v13093_v24, %s12706_s13  ;;  %1222 = vrot.lane.b32.xlu0 %v13096_v25, %s12706_s13  ;;  %16558 = vst [vmem:[#allocation27_spill] sm:$0xff] %v13270_v23 }
 0x16d   : > { %v569_v28 = vpop.f32.mrb[27].mxu0  ;;  %v13109_v30 = vadd.f32 %v11496_v27, %v12971_v38 }
 0x16e   : > { %v13106_v29 = vadd.f32 %v12971_v38, %v569_v28 }
 0x16f   : > { %16547 = vst [vmem:[#allocation18_spill] sm:$0xff] %v13109_v30 }
 0x170   : > { %v11499_v31 = vpop.f32.mrb[28].mxu0  ;;  %1224 = vrot.lane.b32.xlu1 %v13099_v26, %s12706_s13  ;;  %1226 = vrot.lane.b32.xlu0 %v13106_v29, %s12706_s13 }
 0x171   : > { %v579_v32 = vpop.f32.mrb[29].mxu0  ;;  %v13119_v34 = vadd.f32 %v11499_v31, %v12971_v38  ;;  %v12709_v31 = vmov 1934713408  }
 0x172   : > { %v13116_v33 = vadd.f32 %v12971_v38, %v579_v32  ;;  %v665_v32 = vunpack.c.l.s4 %v12709_v31 }
 0x174   : > { %v11502_v35 = vpop.f32.mrb[30].mxu0  ;;  %1228 = vrot.lane.b32.xlu1 %v13109_v30, %s12706_s13  ;;  %1230 = vrot.lane.b32.xlu0 %v13116_v33, %s12706_s13  ;;  %v666_v15 = vunpack.c.0.s8 %v665_v32  ;;  %v918_v32 = vcombine.low %v13027_v62, %v13051_v8 }
 0x175   : > { %v13126_v36 = vadd.f32 %v11502_v35, %v12971_v38  ;;  %v589_v37 = vpop.f32.mrb[31].mxu0  ;;  %v870_v35 = vcombine.low %v12981_v44, %v13001_v52 }
 0x176   : > { %v13129_v39 = vadd.f32 %v12971_v38, %v589_v37  ;;  %v886_v37 = vcombine.low %v12987_v46, %v13011_v56 }
 0x177   : > { %16548 = vst [vmem:[#allocation19_spill] sm:$0xff] %v13126_v36 }
 0x178   : > { %1234 = vrot.lane.b32.xlu1 %v13129_v39, %s12706_s13  ;;  %1232 = vrot.lane.b32.xlu0 %v13119_v34, %s12706_s13 }
 0x17c   : > { %1236 = vrot.lane.b32.xlu1 %v13126_v36, %s12706_s13  ;;  %1814 = vrot.lane.b32.xlu0 %v12974_v41, %s12707_s14 }
 0x180   : > { %1816 = vrot.lane.b32.xlu1 %v12981_v44, %s12707_s14  ;;  %1818 = vrot.lane.b32.xlu0 %v12984_v45, %s12707_s14 }
 0x184   : > { %1820 = vrot.lane.b32.xlu1 %v12987_v46, %s12707_s14  ;;  %1822 = vrot.lane.b32.xlu0 %v12994_v49, %s12707_s14 }
 0x188   : > { %1824 = vrot.lane.b32.xlu1 %v13001_v52, %s12707_s14  ;;  %1826 = vrot.lane.b32.xlu0 %v13004_v53, %s12707_s14 }
 0x18c   : > { %1828 = vrot.lane.b32.xlu1 %v13011_v56, %s12707_s14  ;;  %1830 = vrot.lane.b32.xlu0 %v13014_v57, %s12707_s14 }
 0x190   : > { %1832 = vrot.lane.b32.xlu1 %v13017_v58, %s12707_s14  ;;  %1834 = vrot.lane.b32.xlu0 %v13024_v61, %s12707_s14 }
 0x194   : > { %1836 = vrot.lane.b32.xlu1 %v13027_v62, %s12707_s14  ;;  %1838 = vrot.lane.b32.xlu0 %v13034_v1, %s12707_s14 }
 0x198   : > { %1840 = vrot.lane.b32.xlu1 %v13037_v2, %s12707_s14  ;;  %1842 = vrot.lane.b32.xlu0 %v13044_v5, %s12707_s14 }
 0x19c   : > { %1844 = vrot.lane.b32.xlu1 %v13051_v8, %s12707_s14  ;;  %1846 = vrot.lane.b32.xlu0 %v13054_v9, %s12707_s14 }
 0x1a0   : > { %1848 = vrot.lane.b32.xlu1 %v13057_v10, %s12707_s14  ;;  %1850 = vrot.lane.b32.xlu0 %v13066_v13, %s12707_s14 }
 0x1a4   : > { %1852 = vrot.lane.b32.xlu1 %v13069_v14, %s12707_s14  ;;  %1854 = vrot.lane.b32.xlu0 %v13076_v17, %s12707_s14 }
 0x1a8   : > { %1856 = vrot.lane.b32.xlu1 %v13079_v18, %s12707_s14  ;;  %1858 = vrot.lane.b32.xlu0 %v13086_v21, %s12707_s14 }
 0x1ac   : > { %1860 = vrot.lane.b32.xlu1 %v13093_v24, %s12707_s14  ;;  %1862 = vrot.lane.b32.xlu0 %v13096_v25, %s12707_s14 }
 0x1ae   : > { %v13187_v38 = vpop.permute.xlu0 %1174 }
 0x1b0   : > { %1864 = vrot.lane.b32.xlu1 %v13099_v26, %s12707_s14  ;;  %1866 = vrot.lane.b32.xlu0 %v13106_v29, %s12707_s14 }
 0x1b2   : > { %v13193_v40 = vpop.permute.xlu1 %1178  ;;  %v13195_v42 = vpop.permute.xlu0 %1176 }
 0x1b3   : > { %16549 = vst [vmem:[#allocation20_spill] sm:$0xff] %v13195_v42  ;;  %v11959_v47 = vpack.c.bf16 %v13195_v42, %v13187_v38 }
 0x1b4   : > { %1868 = vrot.lane.b32.xlu1 %v13109_v30, %s12707_s14  ;;  %1870 = vrot.lane.b32.xlu0 %v13116_v33, %s12707_s14  ;;  %v599_v30 = vcombine.high %v12974_v41, %v12994_v49 }
 0x1b5   : > { %11961 = vmatprep.subr.msk.bf16.mxu1 %vm13199_vm2, %v11959_v47 }
 0x1b6   : > { %v13211_v48 = vpop.permute.xlu1 %1180  ;;  %11964 = vmatpush3.bf16.xpose.msk.msra.mxu1 %vm13199_vm2, %v11959_v47  ;;  %v13215_v50 = vpop.permute.xlu0 %1182  ;;  %v13289_v47 = vsub.s32 %v602_v22, %v13270_v23  ;;  %v871_v22 = vcombine.high %v12981_v44, %v13001_v52 }
 0x1b7   : > { %16552 = vst [vmem:[#allocation21_spill] sm:$0xff] %v13211_v48  ;;  %v11965_v51 = vpack.c.bf16 %v13211_v48, %v13193_v40 }
 0x1b8   : > { %1872 = vrot.lane.b32.xlu1 %v13119_v34, %s12707_s14  ;;  %1874 = vrot.lane.b32.xlu0 %v13129_v39, %s12707_s14  ;;  %16560 = vst [vmem:[#allocation29_spill] sm:$0xff] %v13289_v47  ;;  %v13313_v42 = vrot.slane %v886_v37, %v13289_v47  ;;  %v647_v37 = vcombine.high %v13024_v61, %v13044_v5 }
 0x1b9   : > { %11967 = vmatprep.subr.msk.bf16.mxu1 %vm13199_vm2, %v11965_v51 }
 0x1ba   : > { %v13225_v54 = vpop.permute.xlu1 %1184  ;;  %v13227_v55 = vpop.permute.xlu0 %1186  ;;  %16563 = vst [vmem:[#allocation32_spill] sm:$0xff] %v13313_v42 }
 0x1bb   : > { %16553 = vst [vmem:[#allocation22_spill] sm:$0xff] %v13225_v54  ;;  %v11971_v59 = vpack.c.bf16 %v13225_v54, %v13215_v50  ;;  %v629_v54 = vrot.slane %v615_v12, %v13289_v47 }
 0x1bc   : > { %1876 = vrot.lane.b32.xlu1 %v13126_v36, %s12707_s14  ;;  %v13310_v36 = vrot.slane %v870_v35, %v13289_v47  ;;  %v646_v35 = vcombine.low %v13024_v61, %v13044_v5 }
 0x1bd   : > { %11508 = vmatmul.mubr.msk.f32.vlgmr.msra.gmra.mrb[0].mxu1 %vm2454_vm1, %v12981_v44 }
 0x1be   : > { %v13235_v60 = vpop.permute.xlu1 %1188  ;;  %v13237_v63 = vpop.permute.xlu0 %1190  ;;  %11970 = vmatpush3.bf16.xpose.msk.msra.mxu1 %vm13199_vm2, %v11965_v51  ;;  %11514 = vmatprep.mubr.msk.f32.mxu1 %vm2454_vm1, %v12984_v45  ;;  %v614_v51 = vcombine.low %v12984_v45, %v13004_v53  ;;  %16562 = vst [vmem:[#allocation31_spill] sm:$0xff] %v13310_v36  ;;  %v902_v45 = vcombine.low %v13017_v58, %v13037_v2 }
 0x1bf   : > { %16554 = vst [vmem:[#allocation23_spill] sm:$0xff] %v13235_v60  ;;  %11973 = vmatprep.subr.msk.bf16.mxu1 %vm13199_vm2, %v11971_v59  ;;  %v11977_v4 = vpack.c.bf16 %v13235_v60, %v13227_v55 }
 0x1c2   : > { %v13245_v0 = vpop.permute.xlu1 %1192  ;;  %v13247_v3 = vpop.permute.xlu0 %1194 }
 0x1c3   : > { %16555 = vst [vmem:[#allocation24_spill] sm:$0xff] %v13245_v0  ;;  %v11983_v20 = vpack.c.bf16 %v13245_v0, %v13237_v63  ;;  %v13351_v0 = vrot.slane %v871_v22, %v13289_v47  ;;  %v654_v22 = vrot.slane %v646_v35, %v13289_v47 }
 0x1c5   : > { %11515 = vmatmul.mubr.msk.f32.vlgmr.msra.gmra.mrb[2].mxu1 %vm2454_vm1, %v12987_v46  ;;  %16565 = vst [vmem:[#allocation34_spill] sm:$0xff] %v13351_v0  ;;  %v903_v46 = vcombine.high %v13017_v58, %v13037_v2 }
 0x1c6   : > { %v13253_v6 = vpop.permute.xlu1 %1196  ;;  %v13255_v7 = vpop.permute.xlu0 %1198  ;;  %11976 = vmatpush3.bf16.xpose.msk.msra.mxu1 %vm13199_vm2, %v11971_v59  ;;  %11521 = vmatprep.mubr.msk.f32.mxu1 %vm2454_vm1, %v12994_v49  ;;  %v622_v49 = vrot.slane %v614_v51, %v13289_v47  ;;  %v606_v51 = vrot.slane %v598_v11, %v13289_v47  ;;  %v13360_v11 = vrot.slane %v902_v45, %v13289_v47 }
 0x1c7   : > { %16556 = vst [vmem:[#allocation25_spill] sm:$0xff] %v13253_v6  ;;  %11979 = vmatprep.subr.msk.bf16.mxu1 %vm13199_vm2, %v11977_v4  ;;  %v13375_v45 = vrot.slane %v647_v37, %v13289_v47 }
 0x1c8   : > { %v662_v60 = vcombine.low %v606_v51, %v622_v49  ;;  %16567 = vst [vmem:[#allocation36_spill] sm:$0xff] %v13360_v11 }
 0x1ca   : > { %v13263_v16 = vpop.permute.xlu1 %1200  ;;  %v13265_v19 = vpop.permute.xlu0 %1202 }
 0x1cb   : > { %16557 = vst [vmem:[#allocation26_spill] sm:$0xff] %v13263_v16 }
 0x1cd   : > { %11522 = vmatmul.mubr.msk.f32.vlgmr.msra.gmra.mrb[4].mxu1 %vm2454_vm1, %v13001_v52  ;;  %v630_v52 = vcombine.low %v13014_v57, %v13034_v1 }
 0x1ce   : > { %v13274_v27 = vpop.permute.xlu1 %1204  ;;  %v13276_v28 = vpop.permute.xlu0 %1206  ;;  %11982 = vmatpush3.bf16.xpose.msk.msra.mxu1 %vm13199_vm2, %v11977_v4  ;;  %11528 = vmatprep.mubr.msk.f32.mxu1 %vm2454_vm1, %v13004_v53  ;;  %v11989_v53 = vpack.c.bf16 %v13253_v6, %v13247_v3 }
 0x1cf   : > { %16559 = vst [vmem:[#allocation28_spill] sm:$0xff] %v13274_v27  ;;  %11985 = vmatprep.subr.msk.bf16.mxu1 %vm13199_vm2, %v11983_v20  ;;  %v638_v12 = vrot.slane %v630_v52, %v13289_v47 }
 0x1d1   : > { %v694_v37 = vcombine.low %v638_v12, %v654_v22 }
 0x1d2   : > { %v13293_v59 = vpop.permute.xlu1 %1208  ;;  %v13295_v4 = vpop.permute.xlu0 %1210 }
 0x1d3   : > { %16561 = vst [vmem:[#allocation30_spill] sm:$0xff] %v13293_v59  ;;  %v12007_v31 = vpack.c.bf16 %v13293_v59, %v13276_v28  ;;  %v13347_v59 = vsub.s32 %v666_v15, %v13270_v23  ;;  %v934_v15 = vcombine.low %v13310_v36, %v13313_v42  ;;  %v663_v23 = vcombine.high %v606_v51, %v622_v49 }
 0x1d4   : > { %v695_v51 = vcombine.high %v638_v12, %v654_v22  ;;  %v13427_v22 = vrot.slane %v903_v46, %v13289_v47 }
 0x1d5   : > { %11529 = vmatmul.mubr.msk.f32.vlgmr.msra.gmra.mrb[6].mxu1 %vm2454_vm1, %v13011_v56  ;;  %12009 = vmatprep.subr.msk.bf16.mxu0 %vm13199_vm2, %v12007_v31  ;;  %16564 = vst [vmem:[#allocation33_spill] sm:$0xff] %v13347_v59  ;;  %v13394_v35 = vrot.slane %v662_v60, %v13347_v59  ;;  %v1286_v60 = vcombine.low %v13193_v40, %v13227_v55 }
 0x1d6   : > { %v13321_v44 = vpop.permute.xlu1 %1212  ;;  %v13323_v41 = vpop.permute.xlu0 %1214  ;;  %11988 = vmatpush3.bf16.xpose.msk.msra.mxu1 %vm13199_vm2, %v11983_v20  ;;  %12012 = vmatpush3.bf16.xpose.msk.msra.mxu0 %vm13199_vm2, %v12007_v31  ;;  %v631_v20 = vcombine.high %v13014_v57, %v13034_v1  ;;  %v613_v31 = vrot.slane %v599_v30, %v13289_v47  ;;  %16573 = vst [vmem:[#allocation42_spill] sm:$0xff] %v13427_v22 }
 0x1d7   : > { %11535 = vmatprep.mubr.msk.f32.mxu1 %vm2454_vm1, %v13014_v57  ;;  %11991 = vmatprep.subr.msk.bf16.mxu1 %vm13199_vm2, %v11989_v53  ;;  %v13369_v57 = vrot.slane %v918_v32, %v13289_v47  ;;  %16569 = vst [vmem:[#allocation38_spill] sm:$0xff] %v13394_v35  ;;  %v13450_v22 = vrot.slane %v695_v51, %v13347_v59 }
 0x1d8   : > { %v13372_v0 = vrot.slane %v631_v20, %v13289_v47  ;;  %v678_v56 = vcombine.low %v613_v31, %v629_v54  ;;  %v679_v49 = vcombine.high %v613_v31, %v629_v54  ;;  %v13397_v20 = vrot.slane %v934_v15, %v13347_v59 }
 0x1d9   : > { %16568 = vst [vmem:[#allocation37_spill] sm:$0xff] %v13369_v57  ;;  %v11995_v54 = vpack.c.bf16 %v13263_v16, %v13255_v7  ;;  %v13414_v31 = vrot.slane %v663_v23, %v13347_v59  ;;  %v1270_v23 = vcombine.low %v13187_v38, %v13215_v50  ;;  %16577 = vst [vmem:[#allocation46_spill] sm:$0xff] %v13450_v22 }
 0x1da   : > { %v13355_v6 = vpop.permute.xlu1 %1216  ;;  %v13357_v48 = vpop.permute.xlu0 %1218  ;;  %16570 = vst [vmem:[#allocation39_spill] sm:$0xff] %v13397_v20  ;;  %v710_v15 = vcombine.low %v13372_v0, %v13375_v45  ;;  %v13424_v12 = vrot.slane %v679_v49, %v13347_v59  ;;  %v13447_v49 = vrot.slane %v694_v37, %v13347_v59  ;;  %v734_v20 = vcombine.low %v13054_v9, %v13076_v17 }
 0x1db   : > { %16566 = vst [vmem:[#allocation35_spill] sm:$0xff] %v13355_v6  ;;  %v12019_v30 = vpack.c.bf16 %v13355_v6, %v13323_v41  ;;  %v919_v6 = vcombine.high %v13027_v62, %v13051_v8  ;;  %16571 = vst [vmem:[#allocation40_spill] sm:$0xff] %v13414_v31  ;;  %v750_v37 = vcombine.low %v13066_v13, %v13086_v21 }
 0x1dc   : > { %16572 = vst [vmem:[#allocation41_spill] sm:$0xff] %v13424_v12  ;;  %16576 = vst [vmem:[#allocation45_spill] sm:$0xff] %v13447_v49  ;;  %v13463_v46 = vrot.slane %v710_v15, %v13347_v59  ;;  %v766_v51 = vcombine.low %v13096_v25, %v13116_v33  ;;  %v13478_v15 = vrot.slane %v1270_v23, %v13289_v47 }
 0x1dd   : > { %11536 = vmatmul.mubr.msk.f32.vlgmr.msra.gmra.mrb[8].mxu1 %vm2454_vm1, %v13017_v58  ;;  %12021 = vmatprep.subr.msk.bf16.mxu0 %vm13199_vm2, %v12019_v30  ;;  %v1302_v58 = vcombine.low %v13237_v63, %v13255_v7 }
 0x1de   : > { %11564 = vmatmul.mubr.msk.f32.vlgmr.msra.gmra.mrb[32].mxu0 %vm2454_vm1, %v13057_v10  ;;  %v13387_v52 = vpop.permute.xlu1 %1220  ;;  %v13389_v32 = vpop.permute.xlu0 %1222  ;;  %11994 = vmatpush3.bf16.xpose.msk.msra.mxu1 %vm13199_vm2, %v11989_v53  ;;  %v966_v53 = vcombine.low %v13360_v11, %v13369_v57  ;;  %v1422_v57 = vcombine.low %v13295_v4, %v13357_v48 }
 0x1df   : > { %12024 = vmatpush3.bf16.xpose.msk.msra.mxu0 %vm13199_vm2, %v12019_v30  ;;  %11577 = vmatprep.mubr.msk.f32.mxu0 %vm2454_vm1, %v13076_v17  ;;  %v13421_v30 = vrot.slane %v678_v56, %v13347_v59  ;;  %v711_v56 = vcombine.high %v13372_v0, %v13375_v45  ;;  %v13458_v0 = vrot.slane %v1286_v60, %v13289_v47 }
 0x1e0   : > { %11542 = vmatprep.mubr.msk.f32.mxu1 %vm2454_vm1, %v13024_v61  ;;  %11997 = vmatprep.subr.msk.bf16.mxu1 %vm13199_vm2, %v11995_v54  ;;  %v13430_v61 = vrot.slane %v919_v6, %v13289_v47  ;;  %v1318_v6 = vcombine.low %v13247_v3, %v13265_v19  ;;  %v782_v60 = vcombine.low %v13106_v29, %v13129_v39 }
 0x1e1   : > { %v13481_v11 = vrot.slane %v1302_v58, %v13289_v47  ;;  %v1334_v23 = vcombine.low %v13478_v15, %v13458_v0  ;;  %v1430_v14 = vrot.slane %v1422_v57, %v13289_v47  ;;  %v1271_v57 = vcombine.high %v13187_v38, %v13215_v50 }
 0x1e2   : > { %16574 = vst [vmem:[#allocation43_spill] sm:$0xff] %v13430_v61  ;;  %v13436_v42 = vpop.permute.xlu1 %1224  ;;  %v13438_v36 = vpop.permute.xlu0 %1226  ;;  %v13453_v61 = vrot.slane %v966_v53, %v13347_v59  ;;  %v1406_v53 = vcombine.low %v13276_v28, %v13323_v41  ;;  %v1303_v38 = vcombine.high %v13237_v63, %v13255_v7  ;;  %v1319_v50 = vcombine.high %v13247_v3, %v13265_v19 }
 0x1e3   : > { %16575 = vst [vmem:[#allocation44_spill] sm:$0xff] %v13436_v42  ;;  %v12031_v45 = vpack.c.bf16 %v13436_v42, %v13389_v32  ;;  %v12001_v42 = vpack.c.bf16 %v13274_v27, %v13265_v19  ;;  %v13506_v27 = vrot.slane %v711_v56, %v13347_v59  ;;  %v13523_v56 = vrot.slane %v766_v51, %v13289_v47 }
 0x1e4   : > { %16578 = vst [vmem:[#allocation47_spill] sm:$0xff] %v13453_v61  ;;  %v1414_v12 = vrot.slane %v1406_v53, %v13289_v47  ;;  %v1287_v51 = vcombine.high %v13193_v40, %v13227_v55  ;;  %v1407_v19 = vcombine.high %v13276_v28, %v13323_v41 }
 0x1e5   : > { %11543 = vmatmul.mubr.msk.f32.vlgmr.msra.gmra.mrb[10].mxu1 %vm2454_vm1, %v13027_v62  ;;  %12033 = vmatprep.subr.msk.bf16.mxu0 %vm13199_vm2, %v12031_v45  ;;  %v1326_v62 = vrot.slane %v1318_v6, %v13289_v47  ;;  %16580 = vst [vmem:[#allocation49_spill] sm:$0xff] %v13506_v27  ;;  %v13544_v27 = vrot.slane %v1334_v23, %v13347_v59 }
 0x1e6   : > { %11578 = vmatmul.mubr.msk.f32.vlgmr.msra.gmra.mrb[34].mxu0 %vm2454_vm1, %v13079_v18  ;;  %v13487_v61 = vpop.permute.xlu1 %1228  ;;  %v1231_v16 = vpop.permute.xlu0 %1230  ;;  %12000 = vmatpush3.bf16.xpose.msk.msra.mxu1 %vm13199_vm2, %v11995_v54  ;;  %v13520_v54 = vrot.slane %v750_v37, %v13289_v47  ;;  %v1471_v63 = vcombine.high %v1414_v12, %v1430_v14 }
 0x1e7   : > { %16579 = vst [vmem:[#allocation48_spill] sm:$0xff] %v13487_v61  ;;  %12036 = vmatpush3.bf16.xpose.msk.msra.mxu0 %vm13199_vm2, %v12031_v45  ;;  %11591 = vmatprep.mubr.msk.f32.mxu0 %vm2454_vm1, %v13096_v25  ;;  %v1438_v58 = vcombine.low %v13389_v32, %v1231_v16  ;;  %v735_v45 = vcombine.high %v13054_v9, %v13076_v17 }
 0x1e8   : > { %11549 = vmatprep.mubr.msk.f32.mxu1 %vm2454_vm1, %v13034_v1  ;;  %v13511_v61 = vrot.slane %v734_v20, %v13289_v47  ;;  %12003 = vmatprep.subr.msk.bf16.mxu1 %vm13199_vm2, %v12001_v42  ;;  %v751_v1 = vcombine.high %v13066_v13, %v13086_v21  ;;  %v13526_v9 = vrot.slane %v782_v60, %v13289_v47 }
 0x1e9   : > { %v1366_v53 = vcombine.low %v13481_v11, %v1326_v62  ;;  %v1446_v6 = vrot.slane %v1438_v58, %v13289_v47  ;;  %v1335_v60 = vcombine.high %v13478_v15, %v13458_v0  ;;  %v1470_v58 = vcombine.low %v1414_v12, %v1430_v14 }
 0x1ea   : > { %v13528_v17 = vpop.permute.xlu1 %1234  ;;  %v13530_v20 = vpop.permute.xlu0 %1232  ;;  %v1367_v10 = vcombine.high %v13481_v11, %v1326_v62  ;;  %v1439_v40 = vcombine.high %v13389_v32, %v1231_v16  ;;  %v1423_v11 = vcombine.high %v13295_v4, %v13357_v48  ;;  %v13609_v15 = vrot.slane %v1471_v63, %v13347_v59 }
 0x1eb   : > { %v1454_v37 = vcombine.low %v13438_v36, %v13528_v17  ;;  %v12043_v21 = vpack.c.bf16 %v13530_v20, %v1231_v16  ;;  %v1455_v55 = vcombine.high %v13438_v36, %v13528_v17  ;;  %v13562_v3 = vrot.slane %v1366_v53, %v13347_v59 }
 0x1ec   : > { %v12013_v16 = vpack.c.bf16 %v13321_v44, %v13295_v4  ;;  %v13586_v28 = vrot.slane %v1470_v58, %v13347_v59  ;;  %v13592_v4 = vrot.slane %v1439_v40, %v13289_v47  ;;  %v13606_v12 = vrot.slane %v1367_v10, %v13347_v59  ;;  %16583 = vst [vmem:[#allocation52_spill] sm:$0xff] %v13609_v15 }
 0x1ed   : > { %v1462_v24 = vrot.slane %v1454_v37, %v13289_v47  ;;  %12045 = vmatprep.subr.msk.bf16.mxu0 %vm13199_vm2, %v12043_v21  ;;  %11550 = vmatmul.mubr.msk.f32.vlgmr.msra.gmra.mrb[12].mxu1 %vm2454_vm1, %v13037_v2  ;;  %v13575_v2 = vrot.slane %v1303_v38, %v13289_v47  ;;  %v13595_v41 = vrot.slane %v1455_v55, %v13289_v47 }
 0x1ee   : > { %11592 = vmatmul.mubr.msk.f32.vlgmr.msra.gmra.mrb[36].mxu0 %vm2454_vm1, %v13099_v26  ;;  %12006 = vmatpush3.bf16.xpose.msk.msra.mxu1 %vm13199_vm2, %v12001_v42  ;;  %v1398_v42 = vcombine.low %v13544_v27, %v13562_v3  ;;  %16582 = vst [vmem:[#allocation51_spill] sm:$0xff] %v13606_v12  ;;  %v13612_v62 = vrot.slane %v735_v45, %v13289_v47 }
 0x1ef   : > { %v1502_v7 = vcombine.low %v1446_v6, %v1462_v24  ;;  %v1503_v0 = vcombine.high %v1446_v6, %v1462_v24  ;;  %12048 = vmatpush3.bf16.xpose.msk.msra.mxu0 %vm13199_vm2, %v12043_v21  ;;  %11605 = vmatprep.mubr.msk.f32.mxu0 %vm2454_vm1, %v13116_v33  ;;  %v13589_v21 = vrot.slane %v1319_v50, %v13289_v47 }
 0x1f0   : > { %11556 = vmatprep.mubr.msk.f32.mxu1 %vm2454_vm1, %v13044_v5  ;;  %12015 = vmatprep.subr.msk.bf16.mxu1 %vm13199_vm2, %v12013_v16  ;;  %v13615_v5 = vrot.slane %v1407_v19, %v13289_v47  ;;  %v13618_v23 = vrot.slane %v1423_v11, %v13289_v47  ;;  %v13623_v53 = vrot.slane %v1287_v51, %v13289_v47 }
 0x1f1   : > { %v13578_v14 = vrot.slane %v1502_v7, %v13347_v59  ;;  %v13581_v24 = vrot.slane %v1503_v0, %v13347_v59  ;;  %v13626_v37 = vrot.slane %v1335_v60, %v13347_v59  ;;  %v13631_v38 = vrot.slane %v751_v1, %v13289_v47 }
 0x1f2   : > { %v1518_v50 = vcombine.low %v13592_v4, %v13595_v41  ;;  %v798_v58 = vcombine.low %v13511_v61, %v13520_v54  ;;  %v830_v51 = vcombine.low %v13523_v56, %v13526_v9  ;;  %v13640_v40 = vrot.slane %v1271_v57, %v13289_v47 }
 0x1f3   : > { %16581 = vst [vmem:[#allocation50_spill] sm:$0xff] %v13581_v24  ;;  %v1534_v32 = vcombine.low %v13586_v28, %v13578_v14  ;;  %16584 = vst [vmem:[#allocation53_spill] sm:$0xff] %v13626_v37  ;;  %v1536_v45 = vcombine.low %v13609_v15, %v13581_v24  ;;  %v1382_v60 = vcombine.low %v13575_v2, %v13589_v21  ;;  %v16607_v15 = vld [vmem:[#allocation16_spill] sm:$0xff] }
 0x1f4   : > { %v1400_v1 = vcombine.low %v13626_v37, %v13606_v12  ;;  %v767_v55 = vcombine.high %v13096_v25, %v13116_v33  ;;  %v1486_v63 = vcombine.low %v13615_v5, %v13618_v23  ;;  %v12025_v57 = vpack.c.bf16 %v13387_v52, %v13357_v48  ;;  %v16600_v37 = vld [vmem:[#allocation28_spill] sm:$0xff]  ;;  %v16605_v12 = vld [vmem:[#allocation35_spill] sm:$0xff] }
 0x1f5   : > { %v12055_v10 = vpack.c.bf16 %v1534_v32, %v1398_v42  ;;  %11557 = vmatmul.mubr.msk.f32.vlgmr.msra.gmra.mrb[14].mxu1 %vm2454_vm1, %v13051_v8  ;;  %v16585_v7 = vcombine.low %v13394_v35, %v13447_v49  ;;  %v783_v0 = vcombine.high %v13106_v29, %v13129_v39  ;;  %v1350_v25 = vcombine.low %v13640_v40, %v13623_v53  ;;  %v16590_v42 = vld [vmem:[#allocation15_spill] sm:$0xff]  ;;  %v16599_v35 = vld [vmem:[#allocation21_spill] sm:$0xff] }
 0x1f6   : > { %11606 = vmatmul.mubr.msk.f32.vlgmr.msra.gmra.mrb[38].mxu0 %vm2454_vm1, %v13119_v34  ;;  %12018 = vmatpush3.bf16.xpose.msk.msra.mxu1 %vm13199_vm2, %v12013_v16  ;;  %v12067_v33 = vpack.c.bf16 %v1536_v45, %v1400_v1  ;;  %v13671_v8 = vrot.slane %v1518_v50, %v13347_v59  ;;  %v13678_v48 = vrot.slane %v830_v51, %v13347_v59  ;;  %v16588_v16 = vld [vmem:[#allocation14_spill] sm:$0xff]  ;;  %v13686_v45 = vpop.permute.xlu1 %1236  ;;  %v16610_v50 = vld [vmem:[#allocation20_spill] sm:$0xff] }
 0x1f7   : > { %12057 = vmatprep.subr.msk.bf16.mxu0 %vm13199_vm2, %v12055_v10  ;;  %11619 = vmatprep.mubr.msk.f32.mxu0 %vm2454_vm1, %v16585_v7  ;;  %v13696_v7 = vrot.slane %v798_v58, %v13347_v59  ;;  %v13699_v19 = vrot.slane %v1486_v63, %v13347_v59  ;;  %v799_v32 = vcombine.high %v13511_v61, %v13520_v54  ;;  %v16597_v61 = vld [vmem:[#allocation48_spill] sm:$0xff] }
 0x1f8   : > { %11570 = vmatprep.mubr.msk.f32.mxu1 %vm2454_vm1, %v13066_v13  ;;  %16586 = vst [vmem:[#allocation54_spill] sm:$0xff] %v13671_v8  ;;  %12060 = vmatpush3.bf16.xpose.msk.msra.mxu0 %vm13199_vm2, %v12055_v10  ;;  %16587 = vst [vmem:[#allocation55_spill] sm:$0xff] %v13678_v48  ;;  %v16589_v13 = vld [vmem:[#allocation17_spill] sm:$0xff]  ;;  %v13691_v10 = vrot.slane %v1382_v60, %v13347_v59  ;;  %v13706_v6 = vrot.slane %v767_v55, %v13289_v47 }
 0x1f9   : > { %12027 = vmatprep.subr.msk.bf16.mxu1 %vm13199_vm2, %v12025_v57  ;;  %12069 = vmatprep.subr.msk.bf16.mxu0 %vm13199_vm2, %v12067_v33  ;;  %16594 = vst [vmem:[#allocation17_spill] sm:$0xff] %v13696_v7  ;;  %16595 = vst [vmem:[#allocation15_spill] sm:$0xff] %v13699_v19  ;;  %v13709_v60 = vrot.slane %v783_v0, %v13289_v47  ;;  %v13712_v1 = vrot.slane %v1350_v25, %v13347_v59  ;;  %v16598_v0 = vld [vmem:[#allocation23_spill] sm:$0xff] }
 0x1fa   : > { %16591 = vst [vmem:[#allocation14_spill] sm:$0xff] %v13691_v10  ;;  %v831_v58 = vcombine.high %v13523_v56, %v13526_v9  ;;  %v1519_v63 = vcombine.high %v13592_v4, %v13595_v41  ;;  %v1726_v54 = vcombine.low %v16597_v61, %v13686_v45  ;;  %v862_v11 = vcombine.low %v13696_v7, %v13678_v48  ;;  %v16601_v56 = vld [vmem:[#allocation25_spill] sm:$0xff] }
 0x1fb   : > { %16596 = vst [vmem:[#allocation56_spill] sm:$0xff] %v13712_v1  ;;  %v1538_v55 = vcombine.low %v13699_v19, %v13671_v8  ;;  %v1558_v49 = vcombine.low %v16599_v35, %v16598_v0  ;;  %v1383_v25 = vcombine.high %v13575_v2, %v13589_v21  ;;  %v1590_v9 = vcombine.low %v16601_v56, %v16600_v37  ;;  %v16602_v19 = vld [vmem:[#allocation44_spill] sm:$0xff]  ;;  %v16603_v21 = vld [vmem:[#allocation26_spill] sm:$0xff] }
 0x1fc   : > { %v1402_v4 = vcombine.low %v13712_v1, %v13691_v10  ;;  %v1487_v41 = vcombine.high %v13615_v5, %v13618_v23  ;;  %v1694_v7 = vcombine.low %v13321_v44, %v13387_v52  ;;  %v12037_v48 = vpack.c.bf16 %v16597_v61, %v13438_v36  ;;  %v16604_v1 = vld [vmem:[#allocation24_spill] sm:$0xff]  ;;  %v16606_v5 = vld [vmem:[#allocation30_spill] sm:$0xff] }
 0x1fd   : > { %v1710_v8 = vcombine.low %v16602_v19, %v13530_v20  ;;  %11571 = vmatmul.mubr.msk.f32.vlgmr.msra.gmra.mrb[16].mxu1 %vm2454_vm1, %v16590_v42  ;;  %v1351_v2 = vcombine.high %v13640_v40, %v13623_v53  ;;  %v1574_v10 = vcombine.low %v16604_v1, %v16603_v21  ;;  %v1678_v23 = vcombine.low %v16606_v5, %v16605_v12  ;;  %v16609_v40 = vld [vmem:[#allocation22_spill] sm:$0xff] }
 0x1fe   : > { %12030 = vmatpush3.bf16.xpose.msk.msra.mxu1 %vm13199_vm2, %v12025_v57  ;;  %11584 = vmatprep.mubr.msk.f32.mxu1 %vm2454_vm1, %v16607_v15  ;;  %v13753_v36 = vrot.slane %v1519_v63, %v13347_v59  ;;  %v13756_v24 = vrot.slane %v1726_v54, %v13289_v47  ;;  %v12079_v53 = vpack.c.bf16 %v1538_v55, %v1402_v4 }
 0x1ff   : > { %11620 = vmatmul.mubr.msk.f32.vlgmr.msra.gmra.mrb[40].mxu0 %vm2454_vm1, %v862_v11  ;;  %12039 = vmatprep.subr.msk.bf16.mxu1 %vm13199_vm2, %v12037_v48  ;;  %v1542_v51 = vcombine.low %v16610_v50, %v16609_v40  ;;  %v13764_v57 = vrot.slane %v1590_v9, %v13289_v47  ;;  %v16611_v15 = vcombine.low %v13414_v31, %v13450_v22 }
 0x200   : > { %16608 = vst [vmem:[#allocation48_spill] sm:$0xff] %v13753_v36  ;;  %12072 = vmatpush3.bf16.xpose.msk.msra.mxu0 %vm13199_vm2, %v12067_v33  ;;  %v13773_v11 = vrot.slane %v831_v58, %v13347_v59  ;;  %v13776_v63 = vrot.slane %v1694_v7, %v13289_v47  ;;  %v13779_v54 = vrot.slane %v1710_v8, %v13289_v47 }
 0x201   : > { %11633 = vmatprep.mubr.msk.f32.mxu0 %vm2454_vm1, %v16611_v15  ;;  %12081 = vmatprep.subr.msk.bf16.mxu0 %vm13199_vm2, %v12079_v53  ;;  %v13784_v55 = vrot.slane %v1383_v25, %v13347_v59  ;;  %v13787_v33 = vrot.slane %v1487_v41, %v13347_v59  ;;  %v13790_v9 = vrot.slane %v1558_v49, %v13289_v47  ;;  %v16618_v15 = vld [vmem:[#allocation18_spill] sm:$0xff] }
 0x202   : > { %16612 = vst [vmem:[#allocation23_spill] sm:$0xff] %v13773_v11  ;;  %v13793_v58 = vrot.slane %v799_v32, %v13347_v59  ;;  %v13796_v7 = vrot.slane %v1351_v2, %v13347_v59  ;;  %v846_v8 = vcombine.low %v13706_v6, %v13709_v60  ;;  %v13801_v4 = vrot.slane %v1574_v10, %v13289_v47  ;;  %v16617_v2 = vld [vmem:[#allocation19_spill] sm:$0xff] }
 0x203   : > { %16613 = vst [vmem:[#allocation21_spill] sm:$0xff] %v13784_v55  ;;  %16614 = vst [vmem:[#allocation28_spill] sm:$0xff] %v13787_v33  ;;  %v13804_v25 = vrot.slane %v1678_v23, %v13289_v47  ;;  %v1774_v41 = vcombine.low %v13779_v54, %v13756_v24  ;;  %v1540_v49 = vcombine.low %v13787_v33, %v13753_v36 }
 0x204   : > { %16615 = vst [vmem:[#allocation25_spill] sm:$0xff] %v13793_v58  ;;  %16616 = vst [vmem:[#allocation44_spill] sm:$0xff] %v13796_v7  ;;  %v1038_v32 = vcombine.low %v13099_v26, %v13119_v34  ;;  %v1054_v31 = vcombine.low %v16618_v15, %v16617_v2  ;;  %v13815_v22 = vrot.slane %v1542_v51, %v13289_v47 }
 0x205   : > { %v864_v10 = vcombine.low %v13793_v58, %v13773_v11  ;;  %v1638_v23 = vcombine.low %v13801_v4, %v13764_v57  ;;  %v1742_v50 = vcombine.low %v13804_v25, %v13776_v63  ;;  %v12049_v33 = vpack.c.bf16 %v13686_v45, %v13528_v17  ;;  %11585 = vmatmul.mubr.msk.f32.vlgmr.msra.gmra.mrb[18].mxu1 %vm2454_vm1, %v16589_v13 }
 0x206   : > { %v1404_v36 = vcombine.low %v13796_v7, %v13784_v55  ;;  %v1606_v51 = vcombine.low %v13815_v22, %v13790_v9  ;;  %12042 = vmatpush3.bf16.xpose.msk.msra.mxu1 %vm13199_vm2, %v12037_v48  ;;  %11598 = vmatprep.mubr.msk.f32.mxu1 %vm2454_vm1, %v13106_v29  ;;  %v13836_v58 = vrot.slane %v846_v8, %v13347_v59 }
 0x207   : > { %v847_v17 = vcombine.high %v13706_v6, %v13709_v60  ;;  %v16619_v11 = vcombine.low %v16588_v16, %v13079_v18  ;;  %11634 = vmatmul.mubr.msk.f32.vlgmr.msra.gmra.mrb[42].mxu0 %vm2454_vm1, %v864_v10  ;;  %12051 = vmatprep.subr.msk.bf16.mxu1 %vm13199_vm2, %v12049_v33  ;;  %v13850_v29 = vrot.slane %v1774_v41, %v13347_v59 }
 0x208   : > { %v12091_v55 = vpack.c.bf16 %v1540_v49, %v1404_v36  ;;  %v16620_v48 = vcombine.low %v16590_v42, %v16589_v13  ;;  %12084 = vmatpush3.bf16.xpose.msk.msra.mxu0 %vm13199_vm2, %v12079_v53  ;;  %v16621_v60 = vcombine.low %v13421_v30, %v13463_v46  ;;  %v16622_v36 = vcombine.low %v13612_v62, %v13631_v38 }
 0x209   : > { %v13844_v7 = vrot.slane %v16619_v11, %v13289_v47  ;;  %v815_v8 = vcombine.high %v13612_v62, %v13631_v38  ;;  %v13873_v41 = vrot.slane %v1038_v32, %v13289_v47  ;;  %v1535_v53 = vcombine.high %v13586_v28, %v13578_v14 }
 0x20a   : > { %v13856_v6 = vrot.slane %v16620_v48, %v13289_v47  ;;  %11647 = vmatprep.mubr.msk.f32.mxu0 %vm2454_vm1, %v16621_v60  ;;  %v13868_v11 = vrot.slane %v16622_v36, %v13347_v59  ;;  %12093 = vmatprep.subr.msk.bf16.mxu0 %vm13199_vm2, %v12091_v55  ;;  %v13880_v49 = vrot.slane %v1638_v23, %v13347_v59 }
 0x20b   : > { %v13883_v10 = vrot.slane %v1742_v50, %v13347_v59  ;;  %v13886_v48 = vrot.slane %v1054_v31, %v13289_v47  ;;  %v13891_v38 = vrot.slane %v1606_v51, %v13347_v59  ;;  %v13894_v32 = vrot.slane %v847_v17, %v13347_v59 }
 0x20c   : > { %v866_v62 = vcombine.low %v13868_v11, %v13836_v58  ;;  %v1727_v14 = vcombine.high %v16597_v61, %v13686_v45  ;;  %v1775_v28 = vcombine.high %v13779_v54, %v13756_v24  ;;  %v1399_v50 = vcombine.high %v13544_v27, %v13562_v3 }
 0x20d   : > { %v1806_v31 = vcombine.low %v13883_v10, %v13850_v29  ;;  %v1559_v23 = vcombine.high %v16599_v35, %v16598_v0  ;;  %v1591_v51 = vcombine.high %v16601_v56, %v16600_v37  ;;  %v1639_v17 = vcombine.high %v13801_v4, %v13764_v57  ;;  %11599 = vmatmul.mubr.msk.f32.vlgmr.msra.gmra.mrb[20].mxu1 %vm2454_vm1, %v16618_v15 }
 0x20e   : > { %v1695_v45 = vcombine.high %v13321_v44, %v13387_v52  ;;  %v1743_v24 = vcombine.high %v13804_v25, %v13776_v63  ;;  %v1711_v27 = vcombine.high %v16602_v19, %v13530_v20  ;;  %v12061_v3 = vpack.c.bf16 %v1535_v53, %v1399_v50  ;;  %12054 = vmatpush3.bf16.xpose.msk.msra.mxu1 %vm13199_vm2, %v12049_v33  ;;  %v16629_v63 = vld [vmem:[#allocation52_spill] sm:$0xff]  ;;  %v16632_v53 = vld [vmem:[#allocation51_spill] sm:$0xff] }
 0x20f   : > { %v1670_v35 = vcombine.low %v13891_v38, %v13880_v49  ;;  %v1607_v37 = vcombine.high %v13815_v22, %v13790_v9  ;;  %v1575_v61 = vcombine.high %v16604_v1, %v16603_v21  ;;  %v1679_v44 = vcombine.high %v16606_v5, %v16605_v12  ;;  %11612 = vmatprep.mubr.msk.f32.mxu1 %vm2454_vm1, %v13129_v39  ;;  %v16623_v12 = vld [vmem:[#allocation20_spill] sm:$0xff]  ;;  %v16625_v21 = vld [vmem:[#allocation41_spill] sm:$0xff] }
 0x210   : > { %v13931_v52 = vrot.slane %v1727_v14, %v13289_v47  ;;  %12063 = vmatprep.subr.msk.bf16.mxu1 %vm13199_vm2, %v12061_v3  ;;  %11648 = vmatmul.mubr.msk.f32.vlgmr.msra.gmra.mrb[44].mxu0 %vm2454_vm1, %v866_v62  ;;  %v13937_v20 = vrot.slane %v1775_v28, %v13347_v59  ;;  %v1543_v19 = vcombine.high %v16623_v12, %v16609_v40  ;;  %v16626_v5 = vld [vmem:[#allocation49_spill] sm:$0xff]  ;;  %v16628_v40 = vld [vmem:[#allocation50_spill] sm:$0xff] }
 0x211   : > { %v12103_v22 = vpack.c.bf16 %v1806_v31, %v1670_v35  ;;  %v13942_v1 = vrot.slane %v1591_v51, %v13289_v47  ;;  %v13945_v39 = vrot.slane %v1695_v45, %v13289_v47  ;;  %12096 = vmatpush3.bf16.xpose.msk.msra.mxu0 %vm13199_vm2, %v12091_v55  ;;  %v13950_v0 = vrot.slane %v1639_v17, %v13347_v59  ;;  %v16633_v62 = vld [vmem:[#allocation53_spill] sm:$0xff]  ;;  %v16635_v31 = vld [vmem:[#allocation38_spill] sm:$0xff] }
 0x212   : > { %v13953_v56 = vrot.slane %v1711_v27, %v13289_v47  ;;  %v16627_v57 = vcombine.low %v16625_v21, %v16626_v5  ;;  %v1537_v54 = vcombine.high %v16629_v63, %v16628_v40  ;;  %v13964_v33 = vrot.slane %v1743_v24, %v13347_v59 }
 0x213   : > { %16624 = vst [vmem:[#allocation26_spill] sm:$0xff] %v13950_v0  ;;  %12105 = vmatprep.subr.msk.bf16.mxu0 %vm13199_vm2, %v12103_v22  ;;  %v13967_v55 = vrot.slane %v1559_v23, %v13289_v47  ;;  %v13970_v9 = vrot.slane %v1575_v61, %v13289_v47  ;;  %v13973_v4 = vrot.slane %v815_v8, %v13347_v59  ;;  %v16634_v8 = vld [vmem:[#allocation45_spill] sm:$0xff]  ;;  %v16637_v61 = vld [vmem:[#allocation39_spill] sm:$0xff] }
 0x214   : > { %11661 = vmatprep.mubr.msk.f32.mxu0 %vm2454_vm1, %v16627_v57  ;;  %v13976_v25 = vrot.slane %v1607_v37, %v13347_v59  ;;  %v13979_v60 = vrot.slane %v1679_v44, %v13289_v47  ;;  %v1790_v36 = vcombine.low %v13953_v56, %v13931_v52  ;;  %v1401_v14 = vcombine.high %v16633_v62, %v16632_v53  ;;  %v16636_v37 = vld [vmem:[#allocation47_spill] sm:$0xff]  ;;  %v16639_v57 = vld [vmem:[#allocation37_spill] sm:$0xff] }
 0x215   : > { %16630 = vst [vmem:[#allocation24_spill] sm:$0xff] %v13973_v4  ;;  %v1808_v28 = vcombine.low %v13964_v33, %v13937_v20  ;;  %v13988_v50 = vrot.slane %v1543_v19, %v13289_v47  ;;  %v727_v23 = vcombine.high %v16635_v31, %v16634_v8  ;;  %v868_v51 = vcombine.low %v13973_v4, %v13894_v32  ;;  %v16638_v19 = vld [vmem:[#allocation36_spill] sm:$0xff] }
 0x216   : > { %16631 = vst [vmem:[#allocation35_spill] sm:$0xff] %v13976_v25  ;;  %v1102_v17 = vcombine.low %v13873_v41, %v13886_v48  ;;  %v1654_v45 = vcombine.low %v13970_v9, %v13942_v1  ;;  %v1758_v24 = vcombine.low %v13979_v60, %v13945_v39  ;;  %11613 = vmatmul.mubr.msk.f32.vlgmr.msra.gmra.mrb[22].mxu1 %vm2454_vm1, %v16617_v2  ;;  %v16642_v8 = vld [vmem:[#allocation32_spill] sm:$0xff] }
 0x217   : > { %v12073_v27 = vpack.c.bf16 %v1537_v54, %v1401_v14  ;;  %v1672_v35 = vcombine.low %v13976_v25, %v13950_v0  ;;  %12066 = vmatpush3.bf16.xpose.msk.msra.mxu1 %vm13199_vm2, %v12061_v3  ;;  %11626 = vmatprep.mubr.msk.f32.mxu1 %vm2454_vm1, %v727_v23  ;;  %v998_v44 = vcombine.low %v16637_v61, %v16636_v37  ;;  %v16641_v14 = vld [vmem:[#allocation31_spill] sm:$0xff]  ;;  %v16652_v61 = vld [vmem:[#allocation17_spill] sm:$0xff] }
 0x218   : > { %v1070_v12 = vcombine.low %v13844_v7, %v13856_v6  ;;  %v16640_v40 = vcombine.high %v16638_v19, %v16639_v57  ;;  %v1622_v54 = vcombine.low %v13988_v50, %v13967_v55  ;;  %11662 = vmatmul.mubr.msk.f32.vlgmr.msra.gmra.mrb[46].mxu0 %vm2454_vm1, %v868_v51  ;;  %v14023_v53 = vrot.slane %v1790_v36, %v13347_v59  ;;  %v16644_v51 = vld [vmem:[#allocation12_spill] sm:$0xff] }
 0x219   : > { %12075 = vmatprep.subr.msk.bf16.mxu1 %vm13199_vm2, %v12073_v27  ;;  %v12115_v3 = vpack.c.bf16 %v1808_v28, %v1672_v35  ;;  %12108 = vmatpush3.bf16.xpose.msk.msra.mxu0 %vm13199_vm2, %v12103_v22  ;;  %v14029_v62 = vrot.slane %v1102_v17, %v13347_v59  ;;  %v16643_v31 = vcombine.high %v16641_v14, %v16642_v8  ;;  %v16645_v28 = vld [vmem:[#allocation13_spill] sm:$0xff]  ;;  %v16647_v22 = vld [vmem:[#allocation54_spill] sm:$0xff] }
 0x21a   : > { %v14015_v63 = vrot.slane %v16640_v40, %v13347_v59  ;;  %11675 = vmatprep.mubr.msk.f32.mxu0 %vm2454_vm1, %v998_v44  ;;  %v16646_v35 = vcombine.high %v16644_v51, %v16645_v28  ;;  %v16648_v44 = vld [vmem:[#allocation15_spill] sm:$0xff]  ;;  %v14048_v17 = vrot.slane %v1654_v45, %v13347_v59  ;;  %v14051_v57 = vrot.slane %v1758_v24, %v13347_v59  ;;  %v16650_v14 = vld [vmem:[#allocation42_spill] sm:$0xff] }
 0x21b   : > { %v14035_v23 = vrot.slane %v16643_v31, %v13347_v59  ;;  %12117 = vmatprep.subr.msk.bf16.mxu0 %vm13199_vm2, %v12115_v3  ;;  %v1539_v19 = vcombine.high %v16648_v44, %v16647_v22  ;;  %v16649_v40 = vld [vmem:[#allocation43_spill] sm:$0xff]  ;;  %v16653_v28 = vld [vmem:[#allocation46_spill] sm:$0xff]  ;;  %v14060_v25 = vrot.slane %v1070_v12, %v13347_v59  ;;  %v1791_v45 = vcombine.high %v13953_v56, %v13931_v52  ;;  %v16656_v44 = vld [vmem:[#allocation56_spill] sm:$0xff] }
 0x21c   : > { %v14041_v36 = vrot.slane %v16646_v35, %v13289_v47  ;;  %v982_v8 = vcombine.low %v16650_v14, %v16649_v40  ;;  %v16651_v31 = vld [vmem:[#allocation55_spill] sm:$0xff]  ;;  %v16654_v35 = vld [vmem:[#allocation40_spill] sm:$0xff]  ;;  %v16655_v24 = vld [vmem:[#allocation14_spill] sm:$0xff]  ;;  %v14069_v4 = vrot.slane %v1622_v54, %v13347_v59  ;;  %v1055_v12 = vcombine.high %v16618_v15, %v16617_v2 }
 0x21d   : > { %v863_v51 = vcombine.high %v16652_v61, %v16651_v31  ;;  %v729_v37 = vcombine.high %v16654_v35, %v16653_v28  ;;  %v1000_v22 = vcombine.low %v14035_v23, %v14015_v63  ;;  %v1403_v0 = vcombine.high %v16656_v44, %v16655_v24 }
 0x21e   : > { %v1810_v61 = vcombine.low %v14051_v57, %v14023_v53  ;;  %v1039_v31 = vcombine.high %v13099_v26, %v13119_v34  ;;  %v1134_v28 = vcombine.low %v14060_v25, %v14029_v62  ;;  %v1103_v52 = vcombine.high %v13873_v41, %v13886_v48 }
 0x21f   : > { %v1655_v56 = vcombine.high %v13970_v9, %v13942_v1  ;;  %v1759_v54 = vcombine.high %v13979_v60, %v13945_v39  ;;  %11627 = vmatmul.mubr.msk.f32.vlgmr.msra.gmra.mrb[24].mxu1 %vm2454_vm1, %v863_v51  ;;  %v12085_v35 = vpack.c.bf16 %v1539_v19, %v1403_v0  ;;  %v1674_v26 = vcombine.low %v14069_v4, %v14048_v17  ;;  %v16658_v1 = vld [vmem:[#allocation48_spill] sm:$0xff]  ;;  %v16661_v19 = vld [vmem:[#allocation25_spill] sm:$0xff] }
 0x220   : > { %v1007_v34 = vcombine.high %v16588_v16, %v13079_v18  ;;  %v1023_v2 = vcombine.high %v16590_v42, %v16589_v13  ;;  %12078 = vmatpush3.bf16.xpose.msk.msra.mxu1 %vm13199_vm2, %v12073_v27  ;;  %11640 = vmatprep.mubr.msk.f32.mxu1 %vm2454_vm1, %v729_v37  ;;  %v1071_v15 = vcombine.high %v13844_v7, %v13856_v6  ;;  %v16657_v6 = vld [vmem:[#allocation34_spill] sm:$0xff]  ;;  %v16659_v39 = vld [vmem:[#allocation28_spill] sm:$0xff] }
 0x221   : > { %v1623_v41 = vcombine.high %v13988_v50, %v13967_v55  ;;  %12087 = vmatprep.subr.msk.bf16.mxu1 %vm13199_vm2, %v12085_v35  ;;  %11676 = vmatmul.mubr.msk.f32.vlgmr.msra.gmra.mrb[48].mxu0 %vm2454_vm1, %v1134_v28  ;;  %v12127_v18 = vpack.c.bf16 %v1810_v61, %v1674_v26  ;;  %v14103_v16 = vrot.slane %v1791_v45, %v13347_v59  ;;  %v16663_v45 = vld [vmem:[#allocation44_spill] sm:$0xff] }
 0x222   : > { %v14106_v13 = vrot.slane %v1039_v31, %v13289_v47  ;;  %v14109_v42 = vrot.slane %v1055_v12, %v13289_v47  ;;  %12120 = vmatpush3.bf16.xpose.msk.msra.mxu0 %vm13199_vm2, %v12115_v3  ;;  %v14114_v7 = vrot.slane %v1103_v52, %v13347_v59  ;;  %v950_v48 = vcombine.low %v16657_v6, %v14041_v36  ;;  %v16660_v3 = vld [vmem:[#allocation23_spill] sm:$0xff] }
 0x223   : > { %11689 = vmatprep.mubr.msk.f32.mxu0 %vm2454_vm1, %v1000_v22  ;;  %12129 = vmatprep.subr.msk.bf16.mxu0 %vm13199_vm2, %v12127_v18  ;;  %v1541_v0 = vcombine.high %v16659_v39, %v16658_v1  ;;  %v14124_v55 = vrot.slane %v1655_v56, %v13347_v59  ;;  %v14127_v9 = vrot.slane %v1759_v54, %v13347_v59  ;;  %v16662_v22 = vld [vmem:[#allocation21_spill] sm:$0xff]  ;;  %v16668_v1 = vld [vmem:[#allocation24_spill] sm:$0xff] }
 0x224   : > { %v1021_v60 = vrot.slane %v1007_v34, %v13289_v47  ;;  %v1037_v50 = vrot.slane %v1023_v2, %v13289_v47  ;;  %v14132_v27 = vrot.slane %v1071_v15, %v13347_v59  ;;  %v14135_v37 = vrot.slane %v982_v8, %v13347_v59  ;;  %v14168_v34 = vpop.permute.xlu1 %1816 }
 0x225   : > { %v865_v51 = vcombine.high %v16661_v19, %v16660_v3  ;;  %v1405_v24 = vcombine.high %v16663_v45, %v16662_v22  ;;  %v14142_v44 = vrot.slane %v1623_v41, %v13347_v59  ;;  %v1812_v61 = vcombine.low %v14127_v9, %v14103_v16  ;;  %16664 = vst [vmem:[#allocation30_spill] sm:$0xff] %v14168_v34  ;;  %v16670_v3 = vld [vmem:[#allocation35_spill] sm:$0xff] }
 0x226   : > { %v731_v31 = vcombine.high %v13421_v30, %v13463_v46  ;;  %v14149_v12 = vrot.slane %v950_v48, %v13347_v59  ;;  %v1136_v28 = vcombine.low %v14132_v27, %v14114_v7  ;;  %v1118_v56 = vcombine.low %v14106_v13, %v14109_v42  ;;  %v16673_v22 = vld [vmem:[#allocation39_spill] sm:$0xff] }
 0x227   : > { %11641 = vmatmul.mubr.msk.f32.vlgmr.msra.gmra.mrb[26].mxu1 %vm2454_vm1, %v865_v51  ;;  %v12097_v8 = vpack.c.bf16 %v1541_v0, %v1405_v24  ;;  %v1676_v52 = vcombine.low %v14142_v44, %v14124_v55  ;;  %v1086_v54 = vcombine.low %v1021_v60, %v1037_v50  ;;  %v983_v26 = vcombine.high %v16650_v14, %v16649_v40  ;;  %v14182_v40 = vpop.permute.xlu0 %1814  ;;  %v16669_v0 = vld [vmem:[#allocation26_spill] sm:$0xff]  ;;  %v16672_v51 = vld [vmem:[#allocation47_spill] sm:$0xff] }
 0x228   : > { %12090 = vmatpush3.bf16.xpose.msk.msra.mxu1 %vm13199_vm2, %v12085_v35  ;;  %11654 = vmatprep.mubr.msk.f32.mxu1 %vm2454_vm1, %v731_v31  ;;  %v1002_v30 = vcombine.low %v14149_v12, %v14135_v37  ;;  %v1807_v35 = vcombine.high %v13883_v10, %v13850_v29  ;;  %v14178_v2 = vrot.slane %v1118_v56, %v13347_v59 }
 0x229   : > { %12099 = vmatprep.subr.msk.bf16.mxu1 %vm13199_vm2, %v12097_v8  ;;  %11690 = vmatmul.mubr.msk.f32.vlgmr.msra.gmra.mrb[50].mxu0 %vm2454_vm1, %v1136_v28  ;;  %v12139_v46 = vpack.c.bf16 %v1812_v61, %v1676_v52  ;;  %v951_v15 = vcombine.high %v16657_v6, %v14041_v36  ;;  %16665 = vst [vmem:[#allocation16_spill] sm:$0xff] %v14182_v40 }
 0x22a   : > { %12132 = vmatpush3.bf16.xpose.msk.msra.mxu0 %vm13199_vm2, %v12127_v18  ;;  %11703 = vmatprep.mubr.msk.f32.mxu0 %vm2454_vm1, %v1002_v30  ;;  %v867_v14 = vcombine.high %v13868_v11, %v13836_v58  ;;  %v1671_v41 = vcombine.high %v13891_v38, %v13880_v49  ;;  %v1094_v18 = vrot.slane %v1086_v54, %v13347_v59  ;;  %v14197_v11 = vpop.permute.xlu1 %1820 }
 0x22b   : > { %12141 = vmatprep.subr.msk.bf16.mxu0 %vm13199_vm2, %v12139_v46  ;;  %v997_v48 = vrot.slane %v983_v26, %v13347_v59  ;;  %v733_v29 = vcombine.high %v16625_v21, %v16626_v5  ;;  %v965_v6 = vrot.slane %v951_v15, %v13347_v59  ;;  %v1119_v58 = vcombine.high %v14106_v13, %v14109_v42  ;;  %v14207_v5 = vpop.permute.xlu0 %1818 }
 0x22c   : > { %v12109_v10 = vpack.c.bf16 %v1807_v35, %v1671_v41  ;;  %v1138_v36 = vcombine.low %v1094_v18, %v14178_v2  ;;  %16666 = vst [vmem:[#allocation22_spill] sm:$0xff] %v14197_v11  ;;  %v12151_v38 = vpack.c.bf16 %v14168_v34, %v14182_v40  ;;  %v1087_v21 = vcombine.high %v1021_v60, %v1037_v50 }
 0x22d   : > { %v1004_v49 = vcombine.low %v965_v6, %v997_v48  ;;  %16667 = vst [vmem:[#allocation19_spill] sm:$0xff] %v14207_v5  ;;  %v1809_v13 = vcombine.high %v13964_v33, %v13937_v20  ;;  %v1133_v42 = vrot.slane %v1119_v58, %v13347_v59  ;;  %v869_v39 = vcombine.high %v16668_v1, %v13894_v32 }
 0x22e   : > { %v1673_v19 = vcombine.high %v16670_v3, %v16669_v0  ;;  %v1101_v60 = vrot.slane %v1087_v21, %v13347_v59  ;;  %v14220_v50 = vpop.permute.xlu1 %1824  ;;  %v999_v45 = vcombine.high %v16673_v22, %v16672_v51  ;;  %v1811_v33 = vcombine.high %v14051_v57, %v14023_v53 }
 0x22f   : > { %11655 = vmatmul.mubr.msk.f32.vlgmr.msra.gmra.mrb[28].mxu1 %vm2454_vm1, %v867_v14  ;;  %16671 = vst [vmem:[#allocation18_spill] sm:$0xff] %v14220_v50  ;;  %v14225_v20 = vpop.permute.xlu0 %1822  ;;  %v1135_v31 = vcombine.high %v14060_v25, %v14029_v62  ;;  %v1001_v28 = vcombine.high %v14035_v23, %v14015_v63  ;;  %v1813_v25 = vcombine.high %v14127_v9, %v14103_v16 }
 0x230   : > { %12102 = vmatpush3.bf16.xpose.msk.msra.mxu1 %vm13199_vm2, %v12097_v8  ;;  %11668 = vmatprep.mubr.msk.f32.mxu1 %vm2454_vm1, %v733_v29  ;;  %v12121_v24 = vpack.c.bf16 %v1809_v13, %v1673_v19  ;;  %v1140_v61 = vcombine.low %v1101_v60, %v1133_v42  ;;  %16674 = vst [vmem:[#allocation20_spill] sm:$0xff] %v14225_v20 }
 0x231   : > { %12111 = vmatprep.subr.msk.bf16.mxu1 %vm13199_vm2, %v12109_v10  ;;  %11704 = vmatmul.mubr.msk.f32.vlgmr.msra.gmra.mrb[52].mxu0 %vm2454_vm1, %v1138_v36  ;;  %v14235_v32 = vpack.c.bf16 %v14220_v50, %v14225_v20  ;;  %v1675_v8 = vcombine.high %v14069_v4, %v14048_v17  ;;  %v1137_v4 = vcombine.high %v14132_v27, %v14114_v7 }
 0x232   : > { %12144 = vmatpush3.bf16.xpose.msk.msra.mxu0 %vm13199_vm2, %v12139_v46  ;;  %11717 = vmatprep.mubr.msk.f32.mxu0 %vm2454_vm1, %v1004_v49  ;;  %v1677_v63 = vcombine.high %v14142_v44, %v14124_v55  ;;  %v1003_v53 = vcombine.high %v14149_v12, %v14135_v37  ;;  %v1139_v23 = vcombine.high %v1094_v18, %v14178_v2  ;;  %v14273_v16 = vpop.permute.xlu1 %1828 }
 0x233   : > { %12152 = vmatprep.subr.bf16.mxu0 %v12151_v38  ;;  %16675 = vst [vmem:[#allocation41_spill] sm:$0xff] %v14235_v32  ;;  %v12133_v52 = vpack.c.bf16 %v1811_v33, %v1675_v8  ;;  %v1005_v17 = vcombine.high %v965_v6, %v997_v48  ;;  %v12155_v57 = vpack.c.bf16 %v14197_v11, %v14207_v5  ;;  %16676 = vst [vmem:[#allocation49_spill] sm:$0xff] %v14273_v16  ;;  %v14275_v55 = vpop.permute.xlu0 %1826 }
 0x234   : > { %v12145_v62 = vpack.c.bf16 %v1813_v25, %v1677_v63  ;;  %v1141_v7 = vcombine.high %v1101_v60, %v1133_v42  ;;  %16677 = vst [vmem:[#allocation50_spill] sm:$0xff] %v14275_v55  ;;  %v14280_v9 = vpack.c.bf16 %v14273_v16, %v14275_v55 }
 0x236   : > { %16678 = vst [vmem:[#allocation52_spill] sm:$0xff] %v14280_v9 }
 0x237   : > { %11669 = vmatmul.mubr.msk.f32.vlgmr.msra.gmra.mrb[30].mxu1 %vm2454_vm1, %v869_v39 }
 0x238   : > { %12114 = vmatpush3.bf16.xpose.msk.msra.mxu1 %vm13199_vm2, %v12109_v10  ;;  %11682 = vmatprep.mubr.msk.f32.mxu1 %vm2454_vm1, %v999_v45 }
 0x239   : > { %12123 = vmatprep.subr.msk.bf16.mxu1 %vm13199_vm2, %v12121_v24  ;;  %11718 = vmatmul.mubr.msk.f32.vlgmr.msra.gmra.mrb[54].mxu0 %vm2454_vm1, %v1140_v61 }
 0x23a   : > { %12154 = vmatpush3.bf16.msra.mxu0 %v12151_v38 }
 0x23b   : > { %12160 = vmatprep.subr.bf16.mxu0 %v14235_v32 }
 0x23f   : > { %11683 = vmatmul.mubr.msk.f32.vlgmr.msra.gmra.mrb[32].mxu1 %vm2454_vm1, %v1135_v31 }
 0x240   : > { %12126 = vmatpush3.bf16.xpose.msk.msra.mxu1 %vm13199_vm2, %v12121_v24  ;;  %11696 = vmatprep.mubr.msk.f32.mxu1 %vm2454_vm1, %v1001_v28 }
 0x241   : > { %12135 = vmatprep.subr.msk.bf16.mxu1 %vm13199_vm2, %v12133_v52 }
 0x247   : > { %11697 = vmatmul.mubr.msk.f32.vlgmr.msra.gmra.mrb[34].mxu1 %vm2454_vm1, %v1137_v4 }
 0x248   : > { %12138 = vmatpush3.bf16.xpose.msk.msra.mxu1 %vm13199_vm2, %v12133_v52  ;;  %11710 = vmatprep.mubr.msk.f32.mxu1 %vm2454_vm1, %v1003_v53 }
 0x249   : > { %12147 = vmatprep.subr.msk.bf16.mxu1 %vm13199_vm2, %v12145_v62 }
 0x24f   : > { %11711 = vmatmul.mubr.msk.f32.vlgmr.msra.gmra.mrb[36].mxu1 %vm2454_vm1, %v1139_v23  ;;  %v16700_v23 = vld [vmem:[#allocation27_spill] sm:$0xff] }
 0x250   : > { %12150 = vmatpush3.bf16.xpose.msk.msra.mxu1 %vm13199_vm2, %v12145_v62  ;;  %11724 = vmatprep.mubr.msk.f32.mxu1 %vm2454_vm1, %v1005_v17  ;;  %v3785_v17 = vadd.s32 8, %v16700_v23 }
 0x251   : > { %12156 = vmatprep.subr.bf16.mxu1 %v12155_v57 }
 0x257   : > { %11725 = vmatmul.mubr.msk.f32.vlgmr.msra.gmra.mrb[38].mxu1 %vm2454_vm1, %v1141_v7 }
 0x258   : > { %12158 = vmatpush3.bf16.msra.mxu1 %v12155_v57  ;;  %v16701_v57 = vlaneseq }
 0x259   : > { %12164 = vmatprep.subr.bf16.mxu1 %v14280_v9 }
 0x25a   : > { %v14381_v7 = vand.u32 127, %v16701_v57 }
 0x25c   : > { %vm3789_vm4 = vcmp.eq.s32.totalorder %v3785_v17, %v14381_v7  ;;  %vm3788_vm5 = vcmp.eq.s32.totalorder %v16700_v23, %v14381_v7 }
 0x290   : > { %v14283_v43 = vpop.f32.mrb[0].mxu1 }
 0x291   : > { %v14285_v27 = vpop.f32.mrb[1].mxu1  ;;  %v5188_v37 = vsel %vm5184_vm3, %v14283_v43, -inf }
 0x292   : > { %5189 = vmax.xlane.f32.xlu1 %v5188_v37  ;;  %v5185_v44 = vsel %vm5184_vm3, %v14285_v27, -inf }
 0x293   : > { %5186 = vmax.xlane.f32.xlu0 %v5185_v44 }
 0x298   : > { %v14291_v12 = vpop.f32.mrb[2].mxu1 }
 0x299   : > { %16679 = vst [vmem:[#allocation51_spill] sm:$0xff] %v14291_v12  ;;  %v14293_v56 = vpop.f32.mrb[3].mxu1  ;;  %v5194_v30 = vsel %vm5184_vm3, %v14291_v12, -inf }
 0x29a   : > { %5195 = vmax.xlane.f32.xlu0 %v5194_v30  ;;  %v5191_v46 = vsel %vm5184_vm3, %v14293_v56, -inf }
 0x29e   : > { %5192 = vmax.xlane.f32.xlu0 %v5191_v46 }
 0x2a0   : > { %v14299_v54 = vpop.f32.mrb[4].mxu1 }
 0x2a1   : > { %16680 = vst [vmem:[#allocation53_spill] sm:$0xff] %v14299_v54  ;;  %v14301_v26 = vpop.f32.mrb[5].mxu1  ;;  %v5200_v35 = vsel %vm5184_vm3, %v14299_v54, -inf }
 0x2a2   : > { %16681 = vst [vmem:[#allocation45_spill] sm:$0xff] %v14301_v26  ;;  %5201 = vmax.xlane.f32.xlu0 %v5200_v35  ;;  %v5197_v2 = vsel %vm5184_vm3, %v14301_v26, -inf }
 0x2a3   : > { %5198 = vmax.xlane.f32.xlu1 %v5197_v2 }
 0x2a8   : > { %v14307_v15 = vpop.f32.mrb[6].mxu1 }
 0x2a9   : > { %16682 = vst [vmem:[#allocation38_spill] sm:$0xff] %v14307_v15  ;;  %v14309_v14 = vpop.f32.mrb[7].mxu1  ;;  %v5206_v41 = vsel %vm5184_vm3, %v14307_v15, -inf }
 0x2aa   : > { %16683 = vst [vmem:[#allocation36_spill] sm:$0xff] %v14309_v14  ;;  %5207 = vmax.xlane.f32.xlu0 %v5206_v41  ;;  %v5203_v18 = vsel %vm5184_vm3, %v14309_v14, -inf  ;;  %v12710_v41 = vmov 0.0  }
 0x2ab   : > { %5204 = vmax.xlane.f32.xlu1 %v5203_v18  ;;  %v14394_v18 = vsel %vm3789_vm4, -1e+30, %v12710_v41 }
 0x2b0   : > { %v14315_v48 = vpop.f32.mrb[8].mxu1 }
 0x2b1   : > { %16684 = vst [vmem:[#allocation37_spill] sm:$0xff] %v14315_v48  ;;  %v14317_v29 = vpop.f32.mrb[32].mxu0  ;;  %v14319_v10 = vpop.f32.mrb[9].mxu1  ;;  %v5212_v36 = vsel %vm5184_vm3, %v14315_v48, -inf }
 0x2b2   : > { %16685 = vst [vmem:[#allocation31_spill] sm:$0xff] %v14317_v29  ;;  %16686 = vst [vmem:[#allocation32_spill] sm:$0xff] %v14319_v10  ;;  %v14323_v6 = vpop.f32.mrb[33].mxu0  ;;  %5213 = vmax.xlane.f32.xlu0 %v5212_v36  ;;  %v5209_v58 = vsel %vm5184_vm3, %v14319_v10, -inf  ;;  %v5236_v49 = vsel %vm5184_vm3, %v14317_v29, -inf }
 0x2b3   : > { %16687 = vst [vmem:[#allocation12_spill] sm:$0xff] %v14323_v6  ;;  %5210 = vmax.xlane.f32.xlu1 %v5209_v58  ;;  %v5233_v38 = vsel %vm5184_vm3, %v14323_v6, -inf  ;;  %v14396_v36 = vsel %vm3788_vm5, -1e+30, %v12710_v41 }
 0x2b6   : > { %5237 = vmax.xlane.f32.xlu0 %v5236_v49 }
 0x2b7   : > { %5234 = vmax.xlane.f32.xlu1 %v5233_v38 }
 0x2b8   : > { %v14331_v21 = vpop.f32.mrb[10].mxu1 }
 0x2b9   : > { %16688 = vst [vmem:[#allocation13_spill] sm:$0xff] %v14331_v21  ;;  %v14333_v13 = vpop.f32.mrb[34].mxu0  ;;  %v14335_v42 = vpop.f32.mrb[11].mxu1  ;;  %v5218_v1 = vsel %vm5184_vm3, %v14331_v21, -inf  ;;  %v5413_v21 = vadd.s32 4294967288, %v14381_v7 }
 0x2ba   : > { %16689 = vst [vmem:[#allocation54_spill] sm:$0xff] %v14333_v13  ;;  %16690 = vst [vmem:[#allocation15_spill] sm:$0xff] %v14335_v42  ;;  %v14339_v39 = vpop.f32.mrb[35].mxu0  ;;  %5219 = vmax.xlane.f32.xlu0 %v5218_v1  ;;  %v5215_v0 = vsel %vm5184_vm3, %v14335_v42, -inf  ;;  %v5248_v3 = vsel %vm5184_vm3, %v14333_v13, -inf }
 0x2bb   : > { %16691 = vst [vmem:[#allocation43_spill] sm:$0xff] %v14339_v39  ;;  %5216 = vmax.xlane.f32.xlu1 %v5215_v0  ;;  %v5245_v19 = vsel %vm5184_vm3, %v14339_v39, -inf  ;;  %v14704_v48 = vsub.s32 %v5413_v21, %v16700_v23 }
 0x2be   : > { %5249 = vmax.xlane.f32.xlu0 %v5248_v3 }
 0x2bf   : > { %5246 = vmax.xlane.f32.xlu1 %v5245_v19 }
 0x2c0   : > { %v14349_v51 = vpop.f32.mrb[12].mxu1 }
 0x2c1   : > { %v14347_v60 = vpop.f32.mrb[36].mxu0  ;;  %16693 = vst [vmem:[#allocation55_spill] sm:$0xff] %v14349_v51  ;;  %v14353_v45 = vpop.f32.mrb[13].mxu1  ;;  %v5224_v24 = vsel %vm5184_vm3, %v14349_v51, -inf }
 0x2c2   : > { %16692 = vst [vmem:[#allocation42_spill] sm:$0xff] %v14347_v60  ;;  %v14351_v22 = vpop.f32.mrb[37].mxu0  ;;  %16695 = vst [vmem:[#allocation46_spill] sm:$0xff] %v14353_v45  ;;  %5225 = vmax.xlane.f32.xlu0 %v5224_v24  ;;  %v5221_v61 = vsel %vm5184_vm3, %v14353_v45, -inf  ;;  %v5260_v33 = vsel %vm5184_vm3, %v14347_v60, -inf }
 0x2c3   : > { %16694 = vst [vmem:[#allocation17_spill] sm:$0xff] %v14351_v22  ;;  %5222 = vmax.xlane.f32.xlu1 %v5221_v61  ;;  %v5257_v31 = vsel %vm5184_vm3, %v14351_v22, -inf }
 0x2c6   : > { %5261 = vmax.xlane.f32.xlu0 %v5260_v33  ;;  %v14414_v33 = vpop.permute.xlu0 %1830 }
 0x2c7   : > { %5258 = vmax.xlane.f32.xlu1 %v5257_v31  ;;  %16708 = vst [vmem:[#allocation24_spill] sm:$0xff] %v14414_v33 }
 0x2c8   : > { %v14365_v28 = vpop.f32.mrb[14].mxu1 }
 0x2c9   : > { %v14363_v8 = vpop.f32.mrb[38].mxu0  ;;  %16697 = vst [vmem:[#allocation14_spill] sm:$0xff] %v14365_v28  ;;  %v14369_v25 = vpop.f32.mrb[15].mxu1  ;;  %v5230_v4 = vsel %vm5184_vm3, %v14365_v28, -inf }
 0x2ca   : > { %16696 = vst [vmem:[#allocation40_spill] sm:$0xff] %v14363_v8  ;;  %v14367_v52 = vpop.f32.mrb[39].mxu0  ;;  %16699 = vst [vmem:[#allocation34_spill] sm:$0xff] %v14369_v25  ;;  %5231 = vmax.xlane.f32.xlu0 %v5230_v4  ;;  %v5227_v63 = vsel %vm5184_vm3, %v14369_v25, -inf  ;;  %v5272_v53 = vsel %vm5184_vm3, %v14363_v8, -inf }
 0x2cb   : > { %16698 = vst [vmem:[#allocation56_spill] sm:$0xff] %v14367_v52  ;;  %5228 = vmax.xlane.f32.xlu1 %v5227_v63  ;;  %v5269_v62 = vsel %vm5184_vm3, %v14367_v52, -inf }
 0x2ce   : > { %5273 = vmax.xlane.f32.xlu0 %v5272_v53 }
 0x2cf   : > { %5270 = vmax.xlane.f32.xlu1 %v5269_v62 }
 0x2d0   : > { %v14383_v37 = vpop.f32.mrb[16].mxu1 }
 0x2d1   : > { %16702 = vst [vmem:[#allocation48_spill] sm:$0xff] %v14383_v37  ;;  %v14385_v44 = vpop.f32.mrb[17].mxu1  ;;  %v5242_v30 = vsel %vm5184_vm3, %v14383_v37, -inf }
 0x2d2   : > { %16703 = vst [vmem:[#allocation28_spill] sm:$0xff] %v14385_v44  ;;  %5243 = vmax.xlane.f32.xlu0 %v5242_v30  ;;  %v11621_v46 = vpop.f32.mrb[40].mxu0  ;;  %v5239_v35 = vsel %vm5184_vm3, %v14385_v44, -inf }
 0x2d3   : > { %5240 = vmax.xlane.f32.xlu1 %v5239_v35  ;;  %v3870_v2 = vpop.f32.mrb[41].mxu0  ;;  %v14401_v49 = vadd.f32 %v11621_v46, %v14394_v18  ;;  %v14432_v35 = vpop.permute.xlu0 %1834 }
 0x2d4   : > { %v14408_v0 = vadd.f32 %v3870_v2, %v14396_v36  ;;  %16713 = vst [vmem:[#allocation27_spill] sm:$0xff] %v14432_v35 }
 0x2d5   : > { %16705 = vst [vmem:[#allocation25_spill] sm:$0xff] %v14401_v49  ;;  %v5284_v61 = vsel %vm5184_vm3, %v14401_v49, -inf }
 0x2d6   : > { %16707 = vst [vmem:[#allocation44_spill] sm:$0xff] %v14408_v0  ;;  %v5281_v31 = vsel %vm5184_vm3, %v14408_v0, -inf }
 0x2d8   : > { %v14398_v58 = vpop.f32.mrb[18].mxu1 }
 0x2d9   : > { %16704 = vst [vmem:[#allocation23_spill] sm:$0xff] %v14398_v58  ;;  %v14403_v38 = vpop.f32.mrb[19].mxu1  ;;  %v5254_v1 = vsel %vm5184_vm3, %v14398_v58, -inf }
 0x2da   : > { %16706 = vst [vmem:[#allocation21_spill] sm:$0xff] %v14403_v38  ;;  %5255 = vmax.xlane.f32.xlu0 %v5254_v1  ;;  %v11635_v3 = vpop.f32.mrb[42].mxu0  ;;  %v5251_v19 = vsel %vm5184_vm3, %v14403_v38, -inf }
 0x2db   : > { %5252 = vmax.xlane.f32.xlu1 %v5251_v19  ;;  %v4044_v24 = vpop.f32.mrb[43].mxu0  ;;  %v14421_v63 = vadd.f32 %v11635_v3, %v14394_v18 }
 0x2dc   : > { %v14428_v17 = vadd.f32 %v4044_v24, %v14396_v36 }
 0x2dd   : > { %16710 = vst [vmem:[#allocation35_spill] sm:$0xff] %v14421_v63  ;;  %v5296_v2 = vsel %vm5184_vm3, %v14421_v63, -inf }
 0x2de   : > { %5285 = vmax.xlane.f32.xlu0 %v5284_v61  ;;  %16712 = vst [vmem:[#allocation39_spill] sm:$0xff] %v14428_v17  ;;  %v5293_v41 = vsel %vm5184_vm3, %v14428_v17, -inf  ;;  %v14447_v61 = vpop.permute.xlu0 %1838 }
 0x2df   : > { %5282 = vmax.xlane.f32.xlu1 %v5281_v31  ;;  %16717 = vst [vmem:[#allocation60_spill] sm:$0xff] %v14447_v61  ;;  %v14701_v61 = vsub.s32 %v14381_v7, %v16700_v23 }
 0x2e0   : > { %v14418_v4 = vpop.f32.mrb[20].mxu1 }
 0x2e1   : > { %16709 = vst [vmem:[#allocation26_spill] sm:$0xff] %v14418_v4  ;;  %v14423_v53 = vpop.f32.mrb[21].mxu1  ;;  %v5266_v62 = vsel %vm5184_vm3, %v14418_v4, -inf }
 0x2e2   : > { %16711 = vst [vmem:[#allocation47_spill] sm:$0xff] %v14423_v53  ;;  %5267 = vmax.xlane.f32.xlu0 %v5266_v62  ;;  %v5263_v30 = vsel %vm5184_vm3, %v14423_v53, -inf }
 0x2e3   : > { %v11649_v57 = vpop.f32.mrb[44].mxu0  ;;  %5264 = vmax.xlane.f32.xlu1 %v5263_v30 }
 0x2e4   : > { %v4218_v46 = vpop.f32.mrb[45].mxu0  ;;  %v14441_v3 = vadd.f32 %v11649_v57, %v14394_v18 }
 0x2e5   : > { %v14450_v31 = vadd.f32 %v4218_v46, %v14396_v36 }
 0x2e6   : > { %5297 = vmax.xlane.f32.xlu0 %v5296_v2  ;;  %16715 = vst [vmem:[#allocation58_spill] sm:$0xff] %v14441_v3  ;;  %v14454_v2 = vpop.permute.xlu1 %1832  ;;  %v5308_v34 = vsel %vm5184_vm3, %v14441_v3, -inf }
 0x2e7   : > { %5294 = vmax.xlane.f32.xlu1 %v5293_v41  ;;  %16718 = vst [vmem:[#allocation61_spill] sm:$0xff] %v14450_v31  ;;  %16719 = vst [vmem:[#allocation62_spill] sm:$0xff] %v14454_v2  ;;  %v5305_v46 = vsel %vm5184_vm3, %v14450_v31, -inf }
 0x2e9   : > { %v14438_v1 = vpop.f32.mrb[22].mxu1 }
 0x2ea   : > { %16714 = vst [vmem:[#allocation57_spill] sm:$0xff] %v14438_v1  ;;  %v14443_v19 = vpop.f32.mrb[23].mxu1  ;;  %v5278_v24 = vsel %vm5184_vm3, %v14438_v1, -inf  ;;  %v14468_v16 = vpop.permute.xlu1 %1836 }
 0x2eb   : > { %16716 = vst [vmem:[#allocation59_spill] sm:$0xff] %v14443_v19  ;;  %5279 = vmax.xlane.f32.xlu0 %v5278_v24  ;;  %v11663_v62 = vpop.f32.mrb[46].mxu0  ;;  %v5275_v30 = vsel %vm5184_vm3, %v14443_v19, -inf  ;;  %v14466_v24 = vpop.permute.xlu0 %1842  ;;  %16723 = vst [vmem:[#allocation66_spill] sm:$0xff] %v14468_v16 }
 0x2ec   : > { %v4392_v41 = vpop.f32.mrb[47].mxu0  ;;  %5276 = vmax.xlane.f32.xlu1 %v5275_v30  ;;  %v14457_v57 = vadd.f32 %v11663_v62, %v14394_v18  ;;  %16722 = vst [vmem:[#allocation65_spill] sm:$0xff] %v14466_v24 }
 0x2ed   : > { %v14462_v50 = vadd.f32 %v4392_v41, %v14396_v36 }
 0x2ee   : > { %16720 = vst [vmem:[#allocation63_spill] sm:$0xff] %v14457_v57  ;;  %v5320_v3 = vsel %vm5184_vm3, %v14457_v57, -inf }
 0x2ef   : > { %16721 = vst [vmem:[#allocation64_spill] sm:$0xff] %v14462_v50  ;;  %5309 = vmax.xlane.f32.xlu0 %v5308_v34  ;;  %v14485_v17 = vpop.permute.xlu0 %1846 }
 0x2f0   : > { %5306 = vmax.xlane.f32.xlu1 %v5305_v46  ;;  %v5317_v46 = vsel %vm5184_vm3, %v14462_v50, -inf  ;;  %16727 = vst [vmem:[#allocation70_spill] sm:$0xff] %v14485_v17 }
 0x2f2   : > { %v11628_v11 = vpop.f32.mrb[24].mxu1 }
 0x2f3   : > { %v14471_v30 = vadd.f32 %v11628_v11, %v14394_v18  ;;  %v3957_v62 = vpop.f32.mrb[25].mxu1  ;;  %5321 = vmax.xlane.f32.xlu0 %v5320_v3  ;;  %v14504_v0 = vpop.permute.xlu0 %1850 }
 0x2f4   : > { %v14476_v41 = vadd.f32 %v3957_v62, %v14396_v36  ;;  %v11677_v34 = vpop.f32.mrb[48].mxu0  ;;  %5318 = vmax.xlane.f32.xlu1 %v5317_v46  ;;  %v14492_v62 = vpop.permute.xlu1 %1840  ;;  %16732 = vst [vmem:[#allocation75_spill] sm:$0xff] %v14504_v0 }
 0x2f5   : > { %16724 = vst [vmem:[#allocation67_spill] sm:$0xff] %v14471_v30  ;;  %v4566_v31 = vpop.f32.mrb[49].mxu0  ;;  %v14481_v63 = vadd.f32 %v11677_v34, %v14394_v18  ;;  %v5290_v11 = vsel %vm5184_vm3, %v14471_v30, -inf  ;;  %16729 = vst [vmem:[#allocation72_spill] sm:$0xff] %v14492_v62 }
 0x2f6   : > { %16725 = vst [vmem:[#allocation68_spill] sm:$0xff] %v14476_v41  ;;  %v14488_v57 = vadd.f32 %v4566_v31, %v14396_v36  ;;  %v5287_v3 = vsel %vm5184_vm3, %v14476_v41, -inf }
 0x2f7   : > { %16726 = vst [vmem:[#allocation69_spill] sm:$0xff] %v14481_v63  ;;  %5291 = vmax.xlane.f32.xlu0 %v5290_v11  ;;  %v5332_v30 = vsel %vm5184_vm3, %v14481_v63, -inf  ;;  %v14523_v8 = vpop.permute.xlu0 %1854 }
 0x2f8   : > { %16728 = vst [vmem:[#allocation71_spill] sm:$0xff] %v14488_v57  ;;  %5288 = vmax.xlane.f32.xlu1 %v5287_v3  ;;  %v5329_v11 = vsel %vm5184_vm3, %v14488_v57, -inf  ;;  %v14506_v3 = vpop.permute.xlu1 %1844  ;;  %16737 = vst [vmem:[#allocation80_spill] sm:$0xff] %v14523_v8 }
 0x2f9   : > { %16733 = vst [vmem:[#allocation76_spill] sm:$0xff] %v14506_v3 }
 0x2fa   : > { %v11642_v50 = vpop.f32.mrb[26].mxu1 }
 0x2fb   : > { %v14495_v46 = vadd.f32 %v11642_v50, %v14394_v18  ;;  %v4131_v34 = vpop.f32.mrb[27].mxu1  ;;  %5333 = vmax.xlane.f32.xlu0 %v5332_v30 }
 0x2fc   : > { %v14500_v49 = vadd.f32 %v4131_v34, %v14396_v36  ;;  %v11691_v31 = vpop.f32.mrb[50].mxu0  ;;  %5330 = vmax.xlane.f32.xlu1 %v5329_v11 }
 0x2fd   : > { %16730 = vst [vmem:[#allocation73_spill] sm:$0xff] %v14495_v46  ;;  %v4740_v41 = vpop.f32.mrb[51].mxu0  ;;  %v14509_v50 = vadd.f32 %v11691_v31, %v14394_v18  ;;  %v5302_v63 = vsel %vm5184_vm3, %v14495_v46, -inf }
 0x2fe   : > { %16731 = vst [vmem:[#allocation74_spill] sm:$0xff] %v14500_v49  ;;  %v14514_v34 = vadd.f32 %v4740_v41, %v14396_v36  ;;  %v5299_v30 = vsel %vm5184_vm3, %v14500_v49, -inf  ;;  %v14530_v49 = vpop.permute.xlu1 %1848 }
 0x2ff   : > { %16734 = vst [vmem:[#allocation77_spill] sm:$0xff] %v14509_v50  ;;  %5303 = vmax.xlane.f32.xlu0 %v5302_v63  ;;  %v5344_v31 = vsel %vm5184_vm3, %v14509_v50, -inf  ;;  %16739 = vst [vmem:[#allocation82_spill] sm:$0xff] %v14530_v49 }
 0x300   : > { %16735 = vst [vmem:[#allocation78_spill] sm:$0xff] %v14514_v34  ;;  %5300 = vmax.xlane.f32.xlu1 %v5299_v30  ;;  %v5341_v63 = vsel %vm5184_vm3, %v14514_v34, -inf }
 0x302   : > { %v11656_v57 = vpop.f32.mrb[28].mxu1  ;;  %v14544_v4 = vpop.permute.xlu1 %1852 }
 0x303   : > { %v14519_v11 = vadd.f32 %v11656_v57, %v14394_v18  ;;  %v4305_v1 = vpop.f32.mrb[29].mxu1  ;;  %5345 = vmax.xlane.f32.xlu0 %v5344_v31  ;;  %v14542_v31 = vpop.permute.xlu0 %1858  ;;  %16743 = vst [vmem:[#allocation86_spill] sm:$0xff] %v14544_v4 }
 0x304   : > { %v14526_v46 = vadd.f32 %v4305_v1, %v14396_v36  ;;  %v11705_v41 = vpop.f32.mrb[52].mxu0  ;;  %5342 = vmax.xlane.f32.xlu1 %v5341_v63  ;;  %16742 = vst [vmem:[#allocation85_spill] sm:$0xff] %v14542_v31 }
 0x305   : > { %16736 = vst [vmem:[#allocation79_spill] sm:$0xff] %v14519_v11  ;;  %v4914_v30 = vpop.f32.mrb[53].mxu0  ;;  %v14533_v57 = vadd.f32 %v11705_v41, %v14394_v18  ;;  %v5314_v50 = vsel %vm5184_vm3, %v14519_v11, -inf }
 0x306   : > { %16738 = vst [vmem:[#allocation81_spill] sm:$0xff] %v14526_v46  ;;  %v14538_v19 = vadd.f32 %v4914_v30, %v14396_v36  ;;  %v5311_v1 = vsel %vm5184_vm3, %v14526_v46, -inf }
 0x307   : > { %16740 = vst [vmem:[#allocation83_spill] sm:$0xff] %v14533_v57  ;;  %5315 = vmax.xlane.f32.xlu0 %v5314_v50  ;;  %v5356_v11 = vsel %vm5184_vm3, %v14533_v57, -inf  ;;  %v14561_v60 = vpop.permute.xlu0 %1862 }
 0x308   : > { %16741 = vst [vmem:[#allocation84_spill] sm:$0xff] %v14538_v19  ;;  %5312 = vmax.xlane.f32.xlu1 %v5311_v1  ;;  %v5353_v1 = vsel %vm5184_vm3, %v14538_v19, -inf  ;;  %16747 = vst [vmem:[#allocation90_spill] sm:$0xff] %v14561_v60 }
 0x30a   : > { %v11670_v34 = vpop.f32.mrb[30].mxu1 }
 0x30b   : > { %v14547_v63 = vadd.f32 %v11670_v34, %v14394_v18  ;;  %v4479_v41 = vpop.f32.mrb[31].mxu1  ;;  %5357 = vmax.xlane.f32.xlu0 %v5356_v11 }
 0x30c   : > { %v14552_v30 = vadd.f32 %v4479_v41, %v14396_v36  ;;  %v11719_v50 = vpop.f32.mrb[54].mxu0  ;;  %5354 = vmax.xlane.f32.xlu1 %v5353_v1  ;;  %v14568_v41 = vpop.permute.xlu1 %1856 }
 0x30d   : > { %16744 = vst [vmem:[#allocation87_spill] sm:$0xff] %v14547_v63  ;;  %v5088_v46 = vpop.f32.mrb[55].mxu0  ;;  %v14557_v52 = vadd.f32 %v11719_v50, %v14394_v18  ;;  %v5326_v34 = vsel %vm5184_vm3, %v14547_v63, -inf  ;;  %16749 = vst [vmem:[#allocation92_spill] sm:$0xff] %v14568_v41 }
 0x30e   : > { %16745 = vst [vmem:[#allocation88_spill] sm:$0xff] %v14552_v30  ;;  %v14564_v57 = vadd.f32 %v5088_v46, %v14396_v36  ;;  %v5323_v11 = vsel %vm5184_vm3, %v14552_v30, -inf }
 0x30f   : > { %16746 = vst [vmem:[#allocation89_spill] sm:$0xff] %v14557_v52  ;;  %5327 = vmax.xlane.f32.xlu0 %v5326_v34  ;;  %v5368_v63 = vsel %vm5184_vm3, %v14557_v52, -inf  ;;  %v14580_v34 = vpop.permute.xlu0 %1866 }
 0x310   : > { %16748 = vst [vmem:[#allocation91_spill] sm:$0xff] %v14564_v57  ;;  %5324 = vmax.xlane.f32.xlu1 %v5323_v11  ;;  %v5365_v46 = vsel %vm5184_vm3, %v14564_v57, -inf  ;;  %16752 = vst [vmem:[#allocation95_spill] sm:$0xff] %v14580_v34  ;;  %v14582_v30 = vpop.permute.xlu1 %1860 }
 0x311   : > { %16753 = vst [vmem:[#allocation96_spill] sm:$0xff] %v14582_v30 }
 0x312   : > { %v11684_v19 = vpop.f32.mrb[32].mxu1 }
 0x313   : > { %v14571_v1 = vadd.f32 %v11684_v19, %v14394_v18  ;;  %v4653_v50 = vpop.f32.mrb[33].mxu1  ;;  %5369 = vmax.xlane.f32.xlu0 %v5368_v63  ;;  %v14591_v58 = vpop.permute.xlu0 %1870 }
 0x314   : > { %v14576_v53 = vadd.f32 %v4653_v50, %v14396_v36  ;;  %5366 = vmax.xlane.f32.xlu1 %v5365_v46  ;;  %16755 = vst [vmem:[#allocation98_spill] sm:$0xff] %v14591_v58  ;;  %v14596_v57 = vpop.permute.xlu1 %1864 }
 0x315   : > { %16750 = vst [vmem:[#allocation93_spill] sm:$0xff] %v14571_v1  ;;  %v5338_v19 = vsel %vm5184_vm3, %v14571_v1, -inf  ;;  %16757 = vst [vmem:[#allocation100_spill] sm:$0xff] %v14596_v57 }
 0x316   : > { %16751 = vst [vmem:[#allocation94_spill] sm:$0xff] %v14576_v53  ;;  %v5335_v11 = vsel %vm5184_vm3, %v14576_v53, -inf }
 0x317   : > { %5339 = vmax.xlane.f32.xlu0 %v5338_v19 }
 0x318   : > { %5336 = vmax.xlane.f32.xlu1 %v5335_v11  ;;  %v14602_v11 = vpop.permute.xlu0 %1874  ;;  %v14604_v53 = vpop.permute.xlu1 %1868 }
 0x319   : > { %16758 = vst [vmem:[#allocation101_spill] sm:$0xff] %v14602_v11  ;;  %16759 = vst [vmem:[#allocation102_spill] sm:$0xff] %v14604_v53 }
 0x31a   : > { %v11698_v52 = vpop.f32.mrb[34].mxu1 }
 0x31b   : > { %v14589_v50 = vadd.f32 %v11698_v52, %v14394_v18  ;;  %v4827_v63 = vpop.f32.mrb[35].mxu1 }
 0x31c   : > { %v14594_v46 = vadd.f32 %v4827_v63, %v14396_v36 }
 0x31d   : > { %16754 = vst [vmem:[#allocation97_spill] sm:$0xff] %v14589_v50  ;;  %v5350_v1 = vsel %vm5184_vm3, %v14589_v50, -inf }
 0x31e   : > { %16756 = vst [vmem:[#allocation99_spill] sm:$0xff] %v14594_v46  ;;  %5351 = vmax.xlane.f32.xlu0 %v5350_v1  ;;  %v5347_v19 = vsel %vm5184_vm3, %v14594_v46, -inf  ;;  %v14618_v46 = vpop.permute.xlu1 %1872 }
 0x31f   : > { %5348 = vmax.xlane.f32.xlu1 %v5347_v19  ;;  %16762 = vst [vmem:[#allocation105_spill] sm:$0xff] %v14618_v46 }
 0x320   : > { %v14614_v1 = vpop.xlane.xlu0 %5186 }
 0x322   : > { %v11712_v52 = vpop.f32.mrb[36].mxu1 }
 0x323   : > { %v14607_v22 = vadd.f32 %v11712_v52, %v14394_v18  ;;  %v5001_v63 = vpop.f32.mrb[37].mxu1 }
 0x324   : > { %v14610_v59 = vadd.f32 %v5001_v63, %v14396_v36 }
 0x325   : > { %16760 = vst [vmem:[#allocation103_spill] sm:$0xff] %v14607_v22  ;;  %v5362_v50 = vsel %vm5184_vm3, %v14607_v22, -inf }
 0x326   : > { %16761 = vst [vmem:[#allocation104_spill] sm:$0xff] %v14610_v59  ;;  %5363 = vmax.xlane.f32.xlu0 %v5362_v50  ;;  %v5359_v19 = vsel %vm5184_vm3, %v14610_v59, -inf }
 0x327   : > { %5360 = vmax.xlane.f32.xlu1 %v5359_v19  ;;  %v14620_v53 = vpop.xlane.xlu0 %5195  ;;  %v14632_v19 = vpop.permute.xlu1 %1876 }
 0x328   : > { %16765 = vst [vmem:[#allocation108_spill] sm:$0xff] %v14632_v19 }
 0x32a   : > { %v11726_v52 = vpop.f32.mrb[38].mxu1 }
 0x32b   : > { %v14623_v57 = vadd.f32 %v11726_v52, %v14394_v18  ;;  %v5175_v63 = vpop.f32.mrb[39].mxu1  ;;  %v14634_v59 = vpop.xlane.xlu0 %5192 }
 0x32c   : > { %v14626_v13 = vadd.f32 %v5175_v63, %v14396_v36  ;;  %v14636_v46 = vpop.xlane.xlu1 %5189 }
 0x32d   : > { %16763 = vst [vmem:[#allocation106_spill] sm:$0xff] %v14623_v57  ;;  %v5374_v22 = vsel %vm5184_vm3, %v14623_v57, -inf }
 0x32e   : > { %16764 = vst [vmem:[#allocation107_spill] sm:$0xff] %v14626_v13  ;;  %5375 = vmax.xlane.f32.xlu0 %v5374_v22  ;;  %v5371_v50 = vsel %vm5184_vm3, %v14626_v13, -inf }
 0x32f   : > { %5372 = vmax.xlane.f32.xlu1 %v5371_v50  ;;  %v14638_v18 = vpop.xlane.xlu0 %5201 }
 0x330   : > { %v14640_v52 = vpop.xlane.xlu1 %5198 }
 0x337   : > { %v14642_v36 = vpop.xlane.xlu0 %5207 }
 0x338   : > { %v14644_v63 = vpop.xlane.xlu1 %5204 }
 0x33f   : > { %v14646_v57 = vpop.xlane.xlu0 %5213 }
 0x340   : > { %v14648_v22 = vpop.xlane.xlu1 %5210 }
 0x343   : > { %v14650_v13 = vpop.xlane.xlu0 %5237 }
 0x344   : > { %v14652_v19 = vpop.xlane.xlu1 %5234 }
 0x347   : > { %v14654_v50 = vpop.xlane.xlu0 %5219 }
 0x348   : > { %v14656_v38 = vpop.xlane.xlu1 %5216 }
 0x34b   : > { %v14658_v60 = vpop.xlane.xlu0 %5249 }
 0x34c   : > { %v14660_v58 = vpop.xlane.xlu1 %5246 }
 0x34f   : > { %v14662_v30 = vpop.xlane.xlu0 %5225 }
 0x350   : > { %v14664_v34 = vpop.xlane.xlu1 %5222 }
 0x353   : > { %v14666_v11 = vpop.xlane.xlu0 %5261 }
 0x354   : > { %v14668_v37 = vpop.xlane.xlu1 %5258 }
 0x357   : > { %v14670_v39 = vpop.xlane.xlu0 %5231 }
 0x358   : > { %v14672_v47 = vpop.xlane.xlu1 %5228 }
 0x35b   : > { %v14674_v29 = vpop.xlane.xlu0 %5273 }
 0x35c   : > { %v14676_v31 = vpop.xlane.xlu1 %5270 }
 0x35f   : > { %v14678_v40 = vpop.xlane.xlu0 %5243 }
 0x360   : > { %v14680_v20 = vpop.xlane.xlu1 %5240 }
 0x367   : > { %v14682_v44 = vpop.xlane.xlu0 %5255 }
 0x368   : > { %v14684_v41 = vpop.xlane.xlu1 %5252 }
 0x36b   : > { %v5286_v8 = vpop.xlane.xlu0 %5285 }
 0x36c   : > { %v5283_v5 = vpop.xlane.xlu1 %5282  ;;  %v5417_v35 = vrot.slane %v5286_v8, %v14704_v48 }
 0x36d   : > { %v5412_v14 = vrot.slane %v5283_v5, %v14701_v61 }
 0x36f   : > { %v14686_v55 = vpop.xlane.xlu0 %5267  ;;  %v5419_v8 = vsel %vm5418_vm6, %v5417_v35, %v5412_v14 }
 0x370   : > { %v14688_v6 = vpop.xlane.xlu1 %5264 }
 0x373   : > { %v5298_v28 = vpop.xlane.xlu0 %5297 }
 0x374   : > { %v5295_v4 = vpop.xlane.xlu1 %5294 }
 0x378   : > { %v14690_v0 = vpop.xlane.xlu0 %5279 }
 0x379   : > { %v14692_v25 = vpop.xlane.xlu1 %5276 }
 0x37c   : > { %v5310_v51 = vpop.xlane.xlu0 %5309 }
 0x37d   : > { %v5307_v49 = vpop.xlane.xlu1 %5306 }
 0x380   : > { %v5322_v17 = vpop.xlane.xlu0 %5321 }
 0x381   : > { %v5319_v45 = vpop.xlane.xlu1 %5318 }
 0x384   : > { %v5292_v3 = vpop.xlane.xlu0 %5291 }
 0x385   : > { %v5289_v24 = vpop.xlane.xlu1 %5288  ;;  %v5427_v9 = vrot.slane %v5292_v3, %v14704_v48  ;;  %v5436_v3 = vrot.slane %v5298_v28, %v14704_v48  ;;  %v5450_v28 = vrot.slane %v5307_v49, %v14701_v61 }
 0x386   : > { %v5423_v16 = vrot.slane %v5289_v24, %v14701_v61  ;;  %v5432_v24 = vrot.slane %v5295_v4, %v14701_v61 }
 0x388   : > { %v14695_v42 = vpop.xlane.xlu0 %5333  ;;  %v5428_v7 = vsel %vm5418_vm6, %v5427_v9, %v5423_v16 }
 0x389   : > { %v14697_v62 = vpop.xlane.xlu1 %5330  ;;  %v5556_v5 = vsel %vm5555_vm7, %v5428_v7, %v5419_v8 }
 0x38c   : > { %v5304_v10 = vpop.xlane.xlu0 %5303 }
 0x38d   : > { %v5301_v15 = vpop.xlane.xlu1 %5300  ;;  %v5445_v21 = vrot.slane %v5304_v10, %v14704_v48  ;;  %v5454_v10 = vrot.slane %v5310_v51, %v14704_v48 }
 0x38e   : > { %v5441_v2 = vrot.slane %v5301_v15, %v14701_v61  ;;  %v5437_v15 = vsel %vm5418_vm6, %v5436_v3, %v5432_v24 }
 0x38f   : > { %v5558_v14 = vsel %vm5557_vm8, %v5437_v15, %v5556_v5 }
 0x390   : > { %v14710_v54 = vpop.xlane.xlu0 %5345  ;;  %v5446_v12 = vsel %vm5418_vm6, %v5445_v21, %v5441_v2  ;;  %v5468_v2 = vrot.slane %v5319_v45, %v14701_v61 }
 0x391   : > { %v14712_v32 = vpop.xlane.xlu1 %5342  ;;  %v5560_v35 = vsel %vm5559_vm9, %v5446_v12, %v5558_v14 }
 0x394   : > { %v5316_v33 = vpop.xlane.xlu0 %5315 }
 0x395   : > { %v5313_v26 = vpop.xlane.xlu1 %5312  ;;  %v5463_v16 = vrot.slane %v5316_v33, %v14704_v48  ;;  %v5455_v33 = vsel %vm5418_vm6, %v5454_v10, %v5450_v28 }
 0x396   : > { %v5459_v9 = vrot.slane %v5313_v26, %v14701_v61  ;;  %v5472_v26 = vrot.slane %v5322_v17, %v14704_v48  ;;  %v5562_v51 = vsel %vm5561_vm10, %v5455_v33, %v5560_v35 }
 0x398   : > { %v5358_v4 = vpop.xlane.xlu0 %5357  ;;  %v5464_v8 = vsel %vm5418_vm6, %v5463_v16, %v5459_v9  ;;  %v5473_v5 = vsel %vm5418_vm6, %v5472_v26, %v5468_v2  ;;  %v5490_v26 = vrot.slane %v14695_v42, %v14704_v48  ;;  %v5486_v2 = vrot.slane %v14697_v62, %v14701_v61 }
 0x399   : > { %v5355_v7 = vpop.xlane.xlu1 %5354  ;;  %v5564_v24 = vsel %vm5563_vm11, %v5464_v8, %v5562_v51 }
 0x39a   : > { %v5566_v17 = vsel %vm5565_vm12, %v5473_v5, %v5564_v24  ;;  %v5504_v24 = vrot.slane %v14712_v32, %v14701_v61 }
 0x39c   : > { %v5328_v21 = vpop.xlane.xlu0 %5327 }
 0x39d   : > { %v5481_v49 = vrot.slane %v5328_v21, %v14704_v48  ;;  %v5325_v3 = vpop.xlane.xlu1 %5324 }
 0x39e   : > { %v5477_v12 = vrot.slane %v5325_v3, %v14701_v61  ;;  %v5508_v3 = vrot.slane %v14710_v54, %v14704_v48  ;;  %v5522_v54 = vrot.slane %v5355_v7, %v14701_v61 }
 0x3a0   : > { %v5482_v16 = vsel %vm5418_vm6, %v5481_v49, %v5477_v12  ;;  %v5370_v9 = vpop.xlane.xlu0 %5369  ;;  %v5491_v12 = vsel %vm5418_vm6, %v5490_v26, %v5486_v2 }
 0x3a1   : > { %v5568_v45 = vsel %vm5567_vm13, %v5482_v16, %v5566_v17  ;;  %v5367_v15 = vpop.xlane.xlu1 %5366 }
 0x3a2   : > { %5578 = vxpose.xlu1.b32.start [1/2] (short) (narrow) %v5568_v45, 16  ;;  %v5540_v26 = vrot.slane %v5367_v15, %v14701_v61  ;;  %v12711_v15 = vmov 0  }
 0x3a3   : > { %12347 = vset.pattern.permute.xlu0 %v12711_v15 }
 0x3a4   : > { %v5340_v10 = vpop.xlane.xlu0 %5339 }
 0x3a5   : > { %v5337_v28 = vpop.xlane.xlu1 %5336  ;;  %v5499_v14 = vrot.slane %v5340_v10, %v14704_v48  ;;  %v5509_v10 = vsel %vm5418_vm6, %v5508_v3, %v5504_v24 }
 0x3a6   : > { %v5495_v35 = vrot.slane %v5337_v28, %v14701_v61  ;;  %v5526_v28 = vrot.slane %v5358_v4, %v14704_v48 }
 0x3a8   : > { %v5500_v21 = vsel %vm5418_vm6, %v5499_v14, %v5495_v35 }
 0x3a9   : > { %v5569_v42 = vsel %vm5555_vm7, %v5500_v21, %v5491_v12 }
 0x3aa   : > { %v5570_v32 = vsel %vm5557_vm8, %v5509_v10, %v5569_v42  ;;  %v14780_v42 = vsub.s32 0, %v16700_v23 }
 0x3ab   : > { %v5352_v8 = vpop.xlane.xlu0 %5351 }
 0x3ac   : > { %v5349_v33 = vpop.xlane.xlu1 %5348  ;;  %v5517_v51 = vrot.slane %v5352_v8, %v14704_v48  ;;  %v5527_v8 = vsel %vm5418_vm6, %v5526_v28, %v5522_v54  ;;  %16767 = vst [vmem:[#allocation110_spill] sm:$0xff] %v14780_v42  ;;  %v14789_v54 = vsub.s32 2, %v16700_v23 }
 0x3ad   : > { %v5513_v49 = vrot.slane %v5349_v33, %v14701_v61  ;;  %v5544_v33 = vrot.slane %v5370_v9, %v14704_v48 }
 0x3ae   : > { %16769 = vst [vmem:[#allocation112_spill] sm:$0xff] %v14789_v54 }
 0x3af   : > { %v5518_v62 = vsel %vm5418_vm6, %v5517_v51, %v5513_v49  ;;  %v5545_v3 = vsel %vm5418_vm6, %v5544_v33, %v5540_v26 }
 0x3b0   : > { %v5571_v14 = vsel %vm5559_vm9, %v5518_v62, %v5570_v32 }
 0x3b1   : > { %v5572_v21 = vsel %vm5561_vm10, %v5527_v8, %v5571_v14 }
 0x3b3   : > { %v5364_v5 = vpop.xlane.xlu0 %5363 }
 0x3b4   : > { %v5361_v16 = vpop.xlane.xlu1 %5360  ;;  %v5535_v17 = vrot.slane %v5364_v5, %v14704_v48  ;;  %v14777_v5 = vsub.s32 4, %v16700_v23 }
 0x3b5   : > { %v5531_v45 = vrot.slane %v5361_v16, %v14701_v61 }
 0x3b6   : > { %16766 = vst [vmem:[#allocation109_spill] sm:$0xff] %v14777_v5 }
 0x3b7   : > { %v5536_v35 = vsel %vm5418_vm6, %v5535_v17, %v5531_v45  ;;  %v14785_v45 = vsub.s32 1, %v16700_v23 }
 0x3b8   : > { %v5573_v7 = vsel %vm5563_vm11, %v5536_v35, %v5572_v21  ;;  %v14794_v35 = vsub.s32 3, %v16700_v23 }
 0x3b9   : > { %v5574_v12 = vsel %vm5565_vm12, %v5545_v3, %v5573_v7  ;;  %16768 = vst [vmem:[#allocation111_spill] sm:$0xff] %v14785_v45 }
 0x3ba   : > { %16770 = vst [vmem:[#allocation113_spill] sm:$0xff] %v14794_v35 }
 0x3bb   : > { %v5376_v2 = vpop.xlane.xlu0 %5375 }
 0x3bc   : > { %v5553_v51 = vrot.slane %v5376_v2, %v14704_v48  ;;  %v5373_v4 = vpop.xlane.xlu1 %5372  ;;  %v14800_v2 = vsub.s32 5, %v16700_v23 }
 0x3bd   : > { %v5549_v49 = vrot.slane %v5373_v4, %v14701_v61 }
 0x3be   : > { %16771 = vst [vmem:[#allocation114_spill] sm:$0xff] %v14800_v2 }
 0x3bf   : > { %v5554_v24 = vsel %vm5418_vm6, %v5553_v51, %v5549_v49  ;;  %v14804_v51 = vsub.s32 6, %v16700_v23  ;;  %v14809_v49 = vsub.s32 7, %v16700_v23 }
 0x3c0   : > { %v5575_v9 = vsel %vm5567_vm13, %v5554_v24, %v5574_v12 }
 0x3c1   : > { %5579 = vxpose.xlu1.b32.end [2/2] (short) (narrow) %v5575_v9, 16  ;;  %16772 = vst [vmem:[#allocation115_spill] sm:$0xff] %v14804_v51  ;;  %16773 = vst [vmem:[#allocation116_spill] sm:$0xff] %v14809_v49 }
 0x3df   : > { %12346 = vset.pattern.permute.xlu1 %v12711_v15 }
 0x43d   : > { %v5594_v16 = vpop.trf.xlu1 }
 0x43e   : > { %v5659_v62 = vrot.slane %v5594_v16, %v14777_v5  ;;  %v5615_v17 = vrot.slane %v5594_v16, %v14780_v42  ;;  %v5626_v14 = vrot.slane %v5594_v16, %v14785_v45  ;;  %v5637_v26 = vrot.slane %v5594_v16, %v14789_v54 }
 0x43f   : > { %v5648_v7 = vrot.slane %v5594_v16, %v14794_v35  ;;  %v5670_v24 = vrot.slane %v5594_v16, %v14800_v2  ;;  %v5681_v12 = vrot.slane %v5594_v16, %v14804_v51  ;;  %v5692_v9 = vrot.slane %v5594_v16, %v14809_v49 }
 0x440   : > { %5665 = vbcast.lane.b32.xlu1 %v5659_v62, 264  ;;  %5617 = vbcast.lane.b32.xlu0 %v5615_v17, 256 }
 0x441   : > { %v5595_v10 = vpop.trf.xlu1 }
 0x442   : > { %v5714_v28 = vrot.slane %v5595_v10, %v14785_v45  ;;  %v5725_v32 = vrot.slane %v5595_v10, %v14789_v54  ;;  %v5736_v8 = vrot.slane %v5595_v10, %v14794_v35  ;;  %v5747_v33 = vrot.slane %v5595_v10, %v14777_v5 }
 0x443   : > { %v5758_v21 = vrot.slane %v5595_v10, %v14800_v2  ;;  %v5769_v4 = vrot.slane %v5595_v10, %v14804_v51  ;;  %v5780_v3 = vrot.slane %v5595_v10, %v14809_v49  ;;  %v5703_v23 = vrot.slane %v5595_v10, %v14780_v42 }
 0x444   : > { %5621 = vbcast.lane.b32.xlu0 %v5615_v17, 264  ;;  %5716 = vbcast.lane.b32.xlu1 %v5714_v28, 256 }
 0x448   : > { %5628 = vbcast.lane.b32.xlu0 %v5626_v14, 256  ;;  %5727 = vbcast.lane.b32.xlu1 %v5725_v32, 256 }
 0x44c   : > { %5632 = vbcast.lane.b32.xlu0 %v5626_v14, 264  ;;  %5738 = vbcast.lane.b32.xlu1 %v5736_v8, 256 }
 0x450   : > { %5639 = vbcast.lane.b32.xlu0 %v5637_v26, 256  ;;  %5749 = vbcast.lane.b32.xlu1 %v5747_v33, 256 }
 0x454   : > { %5643 = vbcast.lane.b32.xlu0 %v5637_v26, 264  ;;  %5760 = vbcast.lane.b32.xlu1 %v5758_v21, 256 }
 0x458   : > { %5650 = vbcast.lane.b32.xlu0 %v5648_v7, 256  ;;  %5771 = vbcast.lane.b32.xlu1 %v5769_v4, 256 }
 0x45c   : > { %5654 = vbcast.lane.b32.xlu0 %v5648_v7, 264  ;;  %5782 = vbcast.lane.b32.xlu1 %v5780_v3, 256 }
 0x460   : > { %5661 = vbcast.lane.b32.xlu0 %v5659_v62, 256 }
 0x464   : > { %5672 = vbcast.lane.b32.xlu0 %v5670_v24, 256 }
 0x468   : > { %5676 = vbcast.lane.b32.xlu0 %v5670_v24, 264 }
 0x46c   : > { %5683 = vbcast.lane.b32.xlu0 %v5681_v12, 256 }
 0x470   : > { %5687 = vbcast.lane.b32.xlu0 %v5681_v12, 264 }
 0x474   : > { %5694 = vbcast.lane.b32.xlu0 %v5692_v9, 256 }
 0x478   : > { %5698 = vbcast.lane.b32.xlu0 %v5692_v9, 264 }
 0x47c   : > { %5705 = vbcast.lane.b32.xlu0 %v5703_v23, 256 }
 0x480   : > { %5709 = vbcast.lane.b32.xlu0 %v5703_v23, 264 }
 0x484   : > { %5720 = vbcast.lane.b32.xlu0 %v5714_v28, 264 }
 0x488   : > { %5731 = vbcast.lane.b32.xlu0 %v5725_v32, 264 }
 0x48c   : > { %5742 = vbcast.lane.b32.xlu0 %v5736_v8, 264 }
 0x490   : > { %5753 = vbcast.lane.b32.xlu0 %v5747_v33, 264 }
 0x494   : > { %5764 = vbcast.lane.b32.xlu0 %v5758_v21, 264 }
 0x498   : > { %5775 = vbcast.lane.b32.xlu0 %v5769_v4, 264 }
 0x49c   : > { %5786 = vbcast.lane.b32.xlu0 %v5780_v3, 264 }
 0x4b2   : > { %v5618_v15 = vpop.permute.xlu0 %5617  ;;  %v5666_v7 = vpop.permute.xlu1 %5665 }
 0x4b3   : > { %v5820_v62 = vmax.f32 %v14614_v1, %v5618_v15 }
 0x4b5   : > { %5885 = vperm.xlu1 %12346, %v5820_v62  }
 0x4b6   : > { %v5622_v17 = vpop.permute.xlu0 %5621 }
 0x4b7   : > { %v5821_v16 = vmax.f32 %v14636_v46, %v5622_v17 }
 0x4b9   : > { %5888 = vperm.xlu0 %12347, %v5821_v16  }
 0x4ba   : > { %v5629_v14 = vpop.permute.xlu0 %5628 }
 0x4bb   : > { %v5822_v10 = vmax.f32 %v14634_v59, %v5629_v14 }
 0x4bd   : > { %5891 = vperm.xlu1 %12346, %v5822_v10  }
 0x4be   : > { %v5633_v26 = vpop.permute.xlu0 %5632 }
 0x4bf   : > { %v5823_v28 = vmax.f32 %v14620_v53, %v5633_v26  ;;  %v5829_v53 = vmax.f32 %v14646_v57, %v5666_v7  ;;  %v5717_v57 = vpop.permute.xlu1 %5716 }
 0x4c0   : > { %v5838_v26 = vmax.f32 %v14680_v20, %v5717_v57 }
 0x4c1   : > { %5894 = vperm.xlu1 %12346, %v5823_v28  }
 0x4c2   : > { %v5640_v32 = vpop.permute.xlu0 %5639 }
 0x4c3   : > { %v5824_v8 = vmax.f32 %v14640_v52, %v5640_v32  ;;  %v5728_v17 = vpop.permute.xlu1 %5727 }
 0x4c4   : > { %v5840_v32 = vmax.f32 %v14660_v58, %v5728_v17  ;;  %v16776_v17 = vld [vmem:[#allocation24_spill] sm:$0xff] }
 0x4c5   : > { %5897 = vperm.xlu0 %12347, %v5824_v8  }
 0x4c6   : > { %v5644_v33 = vpop.permute.xlu0 %5643 }
 0x4c7   : > { %v5825_v1 = vmax.f32 %v14638_v18, %v5644_v33  ;;  %v5739_v10 = vpop.permute.xlu1 %5738 }
 0x4c9   : > { %5900 = vperm.xlu1 %12346, %v5825_v1  }
 0x4ca   : > { %v5651_v21 = vpop.permute.xlu0 %5650 }
 0x4cb   : > { %v5826_v46 = vmax.f32 %v14644_v63, %v5651_v21  ;;  %v5750_v28 = vpop.permute.xlu1 %5749 }
 0x4cd   : > { %5903 = vperm.xlu0 %12347, %v5826_v46  }
 0x4ce   : > { %v5655_v4 = vpop.permute.xlu0 %5654 }
 0x4cf   : > { %v5827_v59 = vmax.f32 %v14642_v36, %v5655_v4  ;;  %v5761_v1 = vpop.permute.xlu1 %5760 }
 0x4d1   : > { %5906 = vperm.xlu1 %12346, %v5827_v59  }
 0x4d2   : > { %v5662_v3 = vpop.permute.xlu0 %5661 }
 0x4d3   : > { %v5828_v24 = vmax.f32 %v14648_v22, %v5662_v3  ;;  %v5772_v58 = vpop.permute.xlu1 %5771 }
 0x4d5   : > { %5909 = vperm.xlu0 %12347, %v5828_v24   ;;  %5912 = vperm.xlu1 %12346, %v5829_v53  }
 0x4d6   : > { %v5673_v52 = vpop.permute.xlu0 %5672 }
 0x4d7   : > { %v5830_v18 = vmax.f32 %v14656_v38, %v5673_v52  ;;  %v5783_v7 = vpop.permute.xlu1 %5782 }
 0x4d9   : > { %5915 = vperm.xlu0 %12347, %v5830_v18  }
 0x4da   : > { %v5677_v12 = vpop.permute.xlu0 %5676 }
 0x4db   : > { %v5831_v63 = vmax.f32 %v14654_v50, %v5677_v12 }
 0x4dd   : > { %5918 = vperm.xlu1 %12346, %v5831_v63  }
 0x4de   : > { %v5684_v9 = vpop.permute.xlu0 %5683 }
 0x4df   : > { %v5832_v36 = vmax.f32 %v14664_v34, %v5684_v9 }
 0x4e1   : > { %5921 = vperm.xlu0 %12347, %v5832_v36  }
 0x4e2   : > { %v5688_v23 = vpop.permute.xlu0 %5687 }
 0x4e3   : > { %v5833_v15 = vmax.f32 %v14662_v30, %v5688_v23 }
 0x4e5   : > { %5924 = vperm.xlu1 %12346, %v5833_v15  }
 0x4e6   : > { %v5695_v22 = vpop.permute.xlu0 %5694 }
 0x4e7   : > { %v5834_v62 = vmax.f32 %v14672_v47, %v5695_v22 }
 0x4e9   : > { %5927 = vperm.xlu0 %12347, %v5834_v62  }
 0x4ea   : > { %v5699_v38 = vpop.permute.xlu0 %5698 }
 0x4eb   : > { %v5835_v16 = vmax.f32 %v14670_v39, %v5699_v38  ;;  %v16777_v38 = vld [vmem:[#allocation62_spill] sm:$0xff] }
 0x4ed   : > { %5930 = vperm.xlu1 %12346, %v5835_v16   ;;  %v12167_v16 = vpack.c.bf16 %v16777_v38, %v16776_v17  ;;  %v16818_v38 = vld [vmem:[#allocation90_spill] sm:$0xff] }
 0x4ee   : > { %v5706_v50 = vpop.permute.xlu0 %5705 }
 0x4ef   : > { %v5836_v14 = vmax.f32 %v14652_v19, %v5706_v50  ;;  %v5842_v19 = vmax.f32 %v14684_v41, %v5739_v10  ;;  %v16778_v50 = vld [vmem:[#allocation41_spill] sm:$0xff] }
 0x4f1   : > { %5933 = vperm.xlu0 %12347, %v5836_v14   ;;  %v16779_v14 = vld [vmem:[#allocation53_spill] sm:$0xff] }
 0x4f2   : > { %v5710_v34 = vpop.permute.xlu0 %5709 }
 0x4f3   : > { %v5837_v30 = vmax.f32 %v14650_v13, %v5710_v34  ;;  %v5844_v13 = vmax.f32 %v14668_v37, %v5750_v28  ;;  %v16780_v28 = vld [vmem:[#allocation36_spill] sm:$0xff] }
 0x4f5   : > { %5936 = vperm.xlu1 %12346, %v5837_v30   ;;  %5939 = vperm.xlu0 %12347, %v5838_v26  }
 0x4f6   : > { %v5721_v47 = vpop.permute.xlu0 %5720 }
 0x4f7   : > { %v5839_v8 = vmax.f32 %v14678_v40, %v5721_v47  ;;  %v5846_v40 = vmax.f32 %v14688_v6, %v5761_v1 }
 0x4f9   : > { %5942 = vperm.xlu1 %12346, %v5839_v8   ;;  %5945 = vperm.xlu0 %12347, %v5840_v32  }
 0x4fa   : > { %v5732_v39 = vpop.permute.xlu0 %5731 }
 0x4fb   : > { %v5841_v33 = vmax.f32 %v14658_v60, %v5732_v39  ;;  %v5848_v60 = vmax.f32 %v14676_v31, %v5772_v58 }
 0x4fd   : > { %5948 = vperm.xlu1 %12346, %v5841_v33   ;;  %5951 = vperm.xlu0 %12347, %v5842_v19   ;;  %v16781_v19 = vld [vmem:[#allocation27_spill] sm:$0xff]  ;;  %v16782_v33 = vld [vmem:[#allocation66_spill] sm:$0xff] }
 0x4fe   : > { %v5743_v20 = vpop.permute.xlu0 %5742  ;;  %v12171_v1 = vpack.c.bf16 %v16782_v33, %v16781_v19  ;;  %v16820_v33 = vld [vmem:[#allocation54_spill] sm:$0xff] }
 0x4ff   : > { %v5843_v21 = vmax.f32 %v14682_v44, %v5743_v20  ;;  %v5850_v44 = vmax.f32 %v14692_v25, %v5783_v7  ;;  %v16783_v20 = vld [vmem:[#allocation52_spill] sm:$0xff]  ;;  %v16786_v7 = vld [vmem:[#allocation37_spill] sm:$0xff] }
 0x501   : > { %5954 = vperm.xlu1 %12346, %v5843_v21   ;;  %5957 = vperm.xlu0 %12347, %v5844_v13   ;;  %v16784_v13 = vld [vmem:[#allocation38_spill] sm:$0xff] }
 0x502   : > { %v5754_v46 = vpop.permute.xlu0 %5753 }
 0x503   : > { %v5845_v4 = vmax.f32 %v14666_v11, %v5754_v46 }
 0x505   : > { %5960 = vperm.xlu1 %12346, %v5845_v4   ;;  %5963 = vperm.xlu0 %12347, %v5846_v40  }
 0x506   : > { %v5765_v41 = vpop.permute.xlu0 %5764 }
 0x507   : > { %v5847_v59 = vmax.f32 %v14686_v55, %v5765_v41 }
 0x509   : > { %5966 = vperm.xlu1 %12346, %v5847_v59   ;;  %5969 = vperm.xlu0 %12347, %v5848_v60   ;;  %v16785_v60 = vld [vmem:[#allocation32_spill] sm:$0xff] }
 0x50a   : > { %v5776_v37 = vpop.permute.xlu0 %5775 }
 0x50b   : > { %v5849_v3 = vmax.f32 %v14674_v29, %v5776_v37 }
 0x50d   : > { %5972 = vperm.xlu1 %12346, %v5849_v3   ;;  %5975 = vperm.xlu0 %12347, %v5850_v44  }
 0x50e   : > { %v5787_v6 = vpop.permute.xlu0 %5786 }
 0x50f   : > { %v5851_v11 = vmax.f32 %v14690_v0, %v5787_v6 }
 0x511   : > { %5978 = vperm.xlu1 %12346, %v5851_v11  }
 0x534   : > { %v14848_v53 = vpop.permute.xlu1 %5885 }
 0x535   : > { %v6204_v31 = vsub.f32 %v14285_v27, %v14848_v53  ;;  %v16774_v27 = vld [vmem:[#allocation51_spill] sm:$0xff] }
 0x537   : > { %v6236_v55 = vmul.f32 1.442695, %v6204_v31  ;;  %v16787_v31 = vld [vmem:[#allocation60_spill] sm:$0xff] }
 0x538   : > { %v14852_v24 = vpop.permute.xlu0 %5888 }
 0x539   : > { %12348 = vpow2.f32 %v6236_v55  ;;  %v6205_v25 = vsub.f32 %v14283_v43, %v14852_v24  ;;  %v16775_v43 = vld [vmem:[#allocation45_spill] sm:$0xff]  ;;  %v16788_v55 = vld [vmem:[#allocation72_spill] sm:$0xff] }
 0x53b   : > { %v6238_v52 = vmul.f32 1.442695, %v6205_v25  ;;  %v12175_v25 = vpack.c.bf16 %v16788_v55, %v16787_v31 }
 0x53c   : > { %v14856_v29 = vpop.permute.xlu1 %5891 }
 0x53d   : > { %12350 = vpow2.f32 %v6238_v52  ;;  %v6206_v0 = vsub.f32 %v14293_v56, %v14856_v29  ;;  %v16789_v52 = vld [vmem:[#allocation15_spill] sm:$0xff] }
 0x53f   : > { %v6240_v18 = vmul.f32 1.442695, %v6206_v0 }
 0x540   : > { %v14860_v12 = vpop.permute.xlu1 %5894 }
 0x541   : > { %12352 = vpow2.f32 %v6240_v18  ;;  %v6207_v63 = vsub.f32 %v16774_v27, %v14860_v12 }
 0x543   : > { %v14864_v9 = vpop.eup %12348  ;;  %v6242_v36 = vmul.f32 1.442695, %v6207_v63 }
 0x544   : > { %v14866_v23 = vpop.permute.xlu0 %5897  ;;  %11731 = vmatprep.mubr.msk.f32.mxu0 %vm5184_vm3, %v14864_v9 }
 0x545   : > { %12354 = vpow2.f32 %v6242_v36  ;;  %v6208_v15 = vsub.f32 %v16775_v43, %v14866_v23  ;;  %v16790_v43 = vld [vmem:[#allocation13_spill] sm:$0xff] }
 0x547   : > { %v12351_v56 = vpop.eup %12350  ;;  %v6244_v57 = vmul.f32 1.442695, %v6208_v15 }
 0x548   : > { %11732 = vmatmul.mubr.msk.f32.vlgmr.msra.gmra.mrb[56].mxu0 %vm5184_vm3, %v12351_v56  ;;  %v14873_v22 = vpop.permute.xlu1 %5900  ;;  %v6575_v62 = vsel %vm5184_vm3, %v12351_v56, 0.0 }
 0x549   : > { %12356 = vpow2.f32 %v6244_v57  ;;  %12162 = vmatpush3.bf16.msra.mxu0 %v16778_v50  ;;  %v6209_v10 = vsub.f32 %v16779_v14, %v14873_v22  ;;  %6576 = vadd.xlane.f32.xlu1 %v6575_v62  ;;  %v5996_v62 = vrot.slane %v14860_v12, %v14704_v48  ;;  %v16791_v50 = vld [vmem:[#allocation65_spill] sm:$0xff]  ;;  %v16792_v14 = vld [vmem:[#allocation76_spill] sm:$0xff] }
 0x54a   : > { %12168 = vmatprep.subr.bf16.mxu0 %v12167_v16 }
 0x54b   : > { %v14881_v34 = vpop.eup %12352  ;;  %v6246_v26 = vmul.f32 1.442695, %v6209_v10  ;;  %v12179_v10 = vpack.c.bf16 %v16792_v14, %v16791_v50 }
 0x54c   : > { %v14883_v30 = vpop.permute.xlu0 %5903  ;;  %11738 = vmatprep.mubr.msk.f32.mxu1 %vm5184_vm3, %v14881_v34 }
 0x54d   : > { %12358 = vpow2.f32 %v6246_v26  ;;  %v6210_v47 = vsub.f32 %v16780_v28, %v14883_v30  ;;  %v16793_v26 = vld [vmem:[#allocation46_spill] sm:$0xff] }
 0x54f   : > { %v14889_v32 = vpop.eup %12354  ;;  %v6248_v8 = vmul.f32 1.442695, %v6210_v47  ;;  %v5992_v47 = vrot.slane %v14856_v29, %v14701_v61 }
 0x550   : > { %11739 = vmatmul.mubr.msk.f32.vlgmr.msra.gmra.mrb[40].mxu1 %vm5184_vm3, %v14889_v32  ;;  %v14893_v39 = vpop.permute.xlu1 %5906 }
 0x551   : > { %12360 = vpow2.f32 %v6248_v8  ;;  %12166 = vmatpush3.bf16.msra.mxu1 %v16783_v20  ;;  %v6211_v21 = vsub.f32 %v16784_v13, %v14893_v39  ;;  %v16794_v8 = vld [vmem:[#allocation70_spill] sm:$0xff]  ;;  %v5997_v29 = vsel %vm5418_vm6, %v5996_v62, %v5992_v47 }
 0x552   : > { %12172 = vmatprep.subr.bf16.mxu1 %v12171_v1  ;;  %v16795_v20 = vld [vmem:[#allocation82_spill] sm:$0xff] }
 0x553   : > { %v12357_v58 = vpop.eup %12356  ;;  %v6250_v46 = vmul.f32 1.442695, %v6211_v21  ;;  %v14936_v13 = vpack.c.bf16 %v16795_v20, %v16794_v8  ;;  %v5983_v21 = vrot.slane %v14848_v53, %v14701_v61 }
 0x554   : > { %v14900_v40 = vpop.permute.xlu0 %5909  ;;  %11745 = vmatprep.mubr.msk.f32.mxu0 %vm5184_vm3, %v12357_v58  ;;  %v14903_v4 = vpop.permute.xlu1 %5912  ;;  %v6584_v41 = vsel %vm5184_vm3, %v12357_v58, 0.0  ;;  %v5987_v58 = vrot.slane %v14852_v24, %v14704_v48 }
 0x555   : > { %12362 = vpow2.f32 %v6250_v46  ;;  %v6212_v59 = vsub.f32 %v16785_v60, %v14900_v40  ;;  %6585 = vadd.xlane.f32.xlu1 %v6584_v41  ;;  %v6213_v37 = vsub.f32 %v16786_v7, %v14903_v4  ;;  %v6005_v46 = vrot.slane %v14873_v22, %v14704_v48 }
 0x556   : > { %v6001_v60 = vrot.slane %v14866_v23, %v14701_v61  ;;  %v6019_v24 = vrot.slane %v14900_v40, %v14701_v61  ;;  %v6023_v22 = vrot.slane %v14903_v4, %v14704_v48  ;;  %v6010_v23 = vrot.slane %v14883_v30, %v14701_v61 }
 0x557   : > { %v14910_v44 = vpop.eup %12358  ;;  %v6252_v3 = vmul.f32 1.442695, %v6212_v59  ;;  %v6254_v6 = vmul.f32 1.442695, %v6213_v37  ;;  %v6014_v59 = vrot.slane %v14893_v39, %v14704_v48  ;;  %v16796_v37 = vld [vmem:[#allocation55_spill] sm:$0xff] }
 0x558   : > { %v14912_v11 = vpop.permute.xlu0 %5915  ;;  %11746 = vmatmul.mubr.msk.f32.vlgmr.msra.gmra.mrb[58].mxu0 %vm5184_vm3, %v14910_v44 }
 0x559   : > { %12364 = vpow2.f32 %v6252_v3  ;;  %v6214_v0 = vsub.f32 %v16789_v52, %v14912_v11  ;;  %12170 = vmatpush3.bf16.msra.mxu0 %v12167_v16  ;;  %v6006_v52 = vsel %vm5418_vm6, %v6005_v46, %v6001_v60 }
 0x55a   : > { %12366 = vpow2.f32 %v6254_v6  ;;  %12176 = vmatprep.subr.bf16.mxu0 %v12175_v25  ;;  %v5988_v6 = vsel %vm5418_vm6, %v5987_v58, %v5983_v21  ;;  %v16799_v58 = vld [vmem:[#allocation86_spill] sm:$0xff] }
 0x55b   : > { %v12361_v18 = vpop.eup %12360  ;;  %v6256_v27 = vmul.f32 1.442695, %v6214_v0  ;;  %v6124_v4 = vsel %vm5555_vm7, %v5997_v29, %v5988_v6  ;;  %v16801_v6 = vld [vmem:[#allocation12_spill] sm:$0xff] }
 0x55c   : > { %11752 = vmatprep.mubr.msk.f32.mxu1 %vm5184_vm3, %v12361_v18  ;;  %v5919_v63 = vpop.permute.xlu1 %5918  ;;  %v6590_v36 = vsel %vm5184_vm3, %v12361_v18, 0.0  ;;  %v6015_v18 = vsel %vm5418_vm6, %v6014_v59, %v6010_v23  ;;  %v16800_v59 = vld [vmem:[#allocation14_spill] sm:$0xff] }
 0x55d   : > { %12368 = vpow2.f32 %v6256_v27  ;;  %v6215_v15 = vsub.f32 %v16790_v43, %v5919_v63  ;;  %6591 = vadd.xlane.f32.xlu1 %v6590_v36  ;;  %v6032_v40 = vrot.slane %v5919_v63, %v14704_v48  ;;  %v6028_v43 = vrot.slane %v14912_v11, %v14701_v61  ;;  %v16797_v63 = vld [vmem:[#allocation34_spill] sm:$0xff]  ;;  %v16798_v11 = vld [vmem:[#allocation75_spill] sm:$0xff] }
 0x55e   : > { %v14985_v46 = vpack.c.bf16 %v16799_v58, %v16798_v11 }
 0x55f   : > { %v14923_v56 = vpop.eup %12362  ;;  %v6258_v57 = vmul.f32 1.442695, %v6215_v15  ;;  %v6033_v47 = vsel %vm5418_vm6, %v6032_v40, %v6028_v43  ;;  %v16805_v43 = vld [vmem:[#allocation92_spill] sm:$0xff] }
 0x560   : > { %v5922_v16 = vpop.permute.xlu0 %5921  ;;  %11753 = vmatmul.mubr.msk.f32.vlgmr.msra.gmra.mrb[42].mxu1 %vm5184_vm3, %v14923_v56 }
 0x561   : > { %12370 = vpow2.f32 %v6258_v57  ;;  %v6216_v28 = vsub.f32 %v16793_v26, %v5922_v16  ;;  %12174 = vmatpush3.bf16.msra.mxu1 %v12171_v1  ;;  %v6125_v57 = vsel %vm5557_vm8, %v6006_v52, %v6124_v4  ;;  %v6037_v62 = vrot.slane %v5922_v16, %v14701_v61  ;;  %v16802_v4 = vld [vmem:[#allocation50_spill] sm:$0xff] }
 0x562   : > { %12180 = vmatprep.subr.bf16.mxu1 %v12179_v10 }
 0x563   : > { %v12365_v12 = vpop.eup %12364  ;;  %v6260_v41 = vmul.f32 1.442695, %v6216_v28  ;;  %v6126_v28 = vsel %vm5559_vm9, %v6015_v18, %v6125_v57  ;;  %v16803_v18 = vld [vmem:[#allocation19_spill] sm:$0xff]  ;;  %v16806_v57 = vld [vmem:[#allocation28_spill] sm:$0xff] }
 0x564   : > { %v14944_v1 = vpop.eup %12366  ;;  %11759 = vmatprep.mubr.msk.f32.mxu0 %vm5184_vm3, %v12365_v12  ;;  %v5925_v53 = vpop.permute.xlu1 %5924  ;;  %v6596_v7 = vsel %vm5184_vm3, %v12365_v12, 0.0 }
 0x565   : > { %12372 = vpow2.f32 %v6260_v41  ;;  %v6217_v3 = vsub.f32 %v16796_v37, %v5925_v53  ;;  %6597 = vadd.xlane.f32.xlu1 %v6596_v7  ;;  %11760 = vmatmul.mubr.msk.f32.vlgmr.msra.gmra.mrb[60].mxu0 %vm5184_vm3, %v14944_v1  ;;  %v6041_v27 = vrot.slane %v5925_v53, %v14704_v48 }
 0x566   : > { %12178 = vmatpush3.bf16.msra.mxu0 %v12175_v25  ;;  %v6024_v25 = vsel %vm5418_vm6, %v6023_v22, %v6019_v24 }
 0x567   : > { %v12369_v39 = vpop.eup %12368  ;;  %v6262_v0 = vmul.f32 1.442695, %v6217_v3  ;;  %12184 = vmatprep.subr.bf16.mxu0 %v14936_v13  ;;  %v6042_v41 = vsel %vm5418_vm6, %v6041_v27, %v6037_v62  ;;  %v6127_v29 = vsel %vm5561_vm10, %v6024_v25, %v6126_v28  ;;  %v1926_v27 = vcombine.low %v16803_v18, %v16802_v4  ;;  %v16804_v25 = vld [vmem:[#allocation80_spill] sm:$0xff] }
 0x568   : > { %v5928_v36 = vpop.permute.xlu0 %5927  ;;  %11766 = vmatprep.mubr.msk.f32.mxu1 %vm5184_vm3, %v12369_v39  ;;  %v6602_v30 = vsel %vm5184_vm3, %v12369_v39, 0.0  ;;  %v6128_v7 = vsel %vm5563_vm11, %v6033_v47, %v6127_v29  ;;  %v16807_v28 = vld [vmem:[#allocation20_spill] sm:$0xff]  ;;  %v16810_v29 = vld [vmem:[#allocation31_spill] sm:$0xff] }
 0x569   : > { %12374 = vpow2.f32 %v6262_v0  ;;  %v6218_v15 = vsub.f32 %v16797_v63, %v5928_v36  ;;  %6603 = vadd.xlane.f32.xlu1 %v6602_v30  ;;  %v6046_v16 = vrot.slane %v5928_v36, %v14701_v61  ;;  %v6129_v3 = vsel %vm5565_vm12, %v6042_v41, %v6128_v7  ;;  %v16808_v47 = vld [vmem:[#allocation16_spill] sm:$0xff]  ;;  %v16811_v7 = vld [vmem:[#allocation29_spill] sm:$0xff] }
 0x56a   : > { %v15015_v63 = vpack.c.bf16 %v16805_v43, %v16804_v25  ;;  %v16817_v43 = vld [vmem:[#allocation98_spill] sm:$0xff] }
 0x56b   : > { %v14977_v26 = vpop.eup %12370  ;;  %v6264_v12 = vmul.f32 1.442695, %v6218_v15  ;;  %v1958_v15 = vcombine.low %v16781_v19, %v16791_v50  ;;  %v2078_v55 = vcombine.low %v16818_v38, %v16817_v43 }
 0x56c   : > { %11767 = vmatmul.mubr.msk.f32.vlgmr.msra.gmra.mrb[44].mxu1 %vm5184_vm3, %v14977_v26  ;;  %v5931_v21 = vpop.permute.xlu1 %5930 }
 0x56d   : > { %12376 = vpow2.f32 %v6264_v12  ;;  %12182 = vmatpush3.bf16.msra.mxu1 %v12179_v10  ;;  %v6050_v60 = vrot.slane %v5931_v21, %v14704_v48  ;;  %v6219_v53 = vsub.f32 %v16800_v59, %v5931_v21  ;;  %v1910_v12 = vcombine.low %v16808_v47, %v16807_v28  ;;  %v16809_v21 = vld [vmem:[#allocation85_spill] sm:$0xff] }
 0x56e   : > { %12188 = vmatprep.subr.bf16.mxu1 %v14985_v46  ;;  %v2062_v41 = vcombine.low %v16798_v11, %v16809_v21  ;;  %v1942_v59 = vcombine.low %v16776_v17, %v16787_v31 }
 0x56f   : > { %v12373_v24 = vpop.eup %12372  ;;  %v6266_v22 = vmul.f32 1.442695, %v6219_v53  ;;  %v6051_v37 = vsel %vm5418_vm6, %v6050_v60, %v6046_v16 }
 0x570   : > { %v14996_v23 = vpop.permute.xlu0 %5933  ;;  %11773 = vmatprep.mubr.msk.f32.mxu0 %vm5184_vm3, %v12373_v24  ;;  %v6608_v10 = vsel %vm5184_vm3, %v12373_v24, 0.0  ;;  %v6130_v39 = vsel %vm5567_vm13, %v6051_v37, %v6129_v3  ;;  %v15032_v24 = vrot.slane %v1926_v27, %v16811_v7  ;;  %v15051_v27 = vrot.slane %v2062_v41, %v16811_v7 }
 0x571   : > { %12378 = vpow2.f32 %v6266_v22  ;;  %v6220_v52 = vsub.f32 %v16801_v6, %v14996_v23  ;;  %6609 = vadd.xlane.f32.xlu1 %v6608_v10  ;;  %6140 = vxpose.xlu0.b32.start [1/2] (short) (narrow) %v6130_v39, 16  ;;  %v15043_v39 = vrot.slane %v1958_v15, %v16811_v7  ;;  %v16812_v6 = vld [vmem:[#allocation43_spill] sm:$0xff]  ;;  %v15058_v15 = vrot.slane %v1942_v59, %v16811_v7  ;;  %v16816_v59 = vld [vmem:[#allocation96_spill] sm:$0xff] }
 0x572   : > { %v15075_v20 = vpack.c.bf16 %v16816_v59, %v16809_v21 }
 0x573   : > { %v15003_v40 = vpop.eup %12374  ;;  %v6268_v0 = vmul.f32 1.442695, %v6220_v52 }
 0x574   : > { %v15007_v36 = vpop.permute.xlu0 %5939  ;;  %11774 = vmatmul.mubr.msk.f32.vlgmr.msra.gmra.mrb[62].mxu0 %vm5184_vm3, %v15003_v40  ;;  %v15011_v30 = vpop.permute.xlu1 %5936 }
 0x575   : > { %12380 = vpow2.f32 %v6268_v0  ;;  %v6222_v62 = vsub.f32 %v16806_v57, %v15007_v36  ;;  %12186 = vmatpush3.bf16.msra.mxu0 %v14936_v13  ;;  %v6221_v16 = vsub.f32 %v16810_v29, %v15011_v30  ;;  %v2046_v13 = vcombine.low %v16794_v8, %v16804_v25  ;;  %v16813_v57 = vld [vmem:[#allocation48_spill] sm:$0xff] }
 0x576   : > { %12192 = vmatprep.subr.bf16.mxu0 %v15015_v63  ;;  %v15048_v0 = vrot.slane %v1910_v12, %v16811_v7  ;;  %v6064_v11 = vrot.slane %v15007_v36, %v14701_v61 }
 0x577   : > { %v12377_v60 = vpop.eup %12376  ;;  %v6272_v53 = vmul.f32 1.442695, %v6222_v62  ;;  %v6270_v22 = vmul.f32 1.442695, %v6221_v16  ;;  %v16814_v16 = vld [vmem:[#allocation101_spill] sm:$0xff] }
 0x578   : > { %v15036_v37 = vpop.permute.xlu0 %5945  ;;  %11780 = vmatprep.mubr.msk.f32.mxu1 %vm5184_vm3, %v12377_v60  ;;  %v15039_v3 = vpop.permute.xlu1 %5942  ;;  %v6614_v10 = vsel %vm5184_vm3, %v12377_v60, 0.0  ;;  %v16815_v60 = vld [vmem:[#allocation95_spill] sm:$0xff]  ;;  %v1974_v12 = vcombine.low %v15048_v0, %v15032_v24 }
 0x579   : > { %12382 = vpow2.f32 %v6272_v53  ;;  %v6224_v52 = vsub.f32 %v16812_v6, %v15036_v37  ;;  %6615 = vadd.xlane.f32.xlu1 %v6614_v10  ;;  %v6223_v62 = vsub.f32 %v16813_v57, %v15039_v3  ;;  %v2094_v53 = vcombine.low %v16815_v60, %v16814_v16 }
 0x57a   : > { %12384 = vpow2.f32 %v6270_v22  ;;  %v15065_v10 = vrot.slane %v2046_v13, %v16811_v7  ;;  %v16819_v13 = vld [vmem:[#allocation21_spill] sm:$0xff] }
 0x57b   : > { %v15055_v29 = vpop.eup %12378  ;;  %v6276_v6 = vmul.f32 1.442695, %v6224_v52  ;;  %v6274_v41 = vmul.f32 1.442695, %v6223_v62  ;;  %v2006_v52 = vcombine.low %v15058_v15, %v15043_v39  ;;  %v15090_v47 = vrot.slane %v2094_v53, %v16811_v7  ;;  %v16822_v53 = vld [vmem:[#allocation17_spill] sm:$0xff] }
 0x57c   : > { %v15067_v22 = vpop.permute.xlu0 %5951  ;;  %11781 = vmatmul.mubr.msk.f32.vlgmr.msra.gmra.mrb[46].mxu1 %vm5184_vm3, %v15055_v29  ;;  %v15071_v57 = vpop.permute.xlu1 %5948  ;;  %v2110_v58 = vcombine.low %v15065_v10, %v15051_v27 }
 0x57d   : > { %12386 = vpow2.f32 %v6276_v6  ;;  %v6226_v62 = vsub.f32 %v16819_v13, %v15067_v22  ;;  %12190 = vmatpush3.bf16.msra.mxu1 %v14985_v46  ;;  %v6225_v59 = vsub.f32 %v16820_v33, %v15071_v57  ;;  %v15102_v33 = vrot.slane %v2078_v55, %v16811_v7 }
 0x57e   : > { %12388 = vpow2.f32 %v6274_v41  ;;  %12196 = vmatprep.subr.bf16.mxu1 %v15075_v20  ;;  %v16821_v41 = vld [vmem:[#allocation33_spill] sm:$0xff] }
 0x57f   : > { %v12381_v14 = vpop.eup %12380  ;;  %v6280_v28 = vmul.f32 1.442695, %v6226_v62  ;;  %v6278_v6 = vmul.f32 1.442695, %v6225_v59  ;;  %v15099_v25 = vrot.slane %v1974_v12, %v16821_v41  ;;  %v15107_v59 = vrot.slane %v2006_v52, %v16821_v41  ;;  %v16823_v62 = vld [vmem:[#allocation23_spill] sm:$0xff] }
 0x580   : > { %v15092_v8 = vpop.permute.xlu0 %5957  ;;  %11787 = vmatprep.mubr.msk.f32.mxu0 %vm5184_vm3, %v12381_v14  ;;  %v15095_v46 = vpop.permute.xlu1 %5954  ;;  %v6620_v13 = vsel %vm5184_vm3, %v12381_v14, 0.0  ;;  %v16824_v14 = vld [vmem:[#allocation100_spill] sm:$0xff]  ;;  %v15116_v12 = vrot.slane %v2110_v58, %v16821_v41 }
 0x581   : > { %12390 = vpow2.f32 %v6280_v28  ;;  %v6228_v17 = vsub.f32 %v16822_v53, %v15092_v8  ;;  %6621 = vadd.xlane.f32.xlu1 %v6620_v13  ;;  %v6227_v31 = vsub.f32 %v16823_v62, %v15095_v46  ;;  %v15113_v18 = vpack.c.bf16 %v16824_v14, %v16818_v38 }
 0x582   : > { %12392 = vpow2.f32 %v6278_v6  ;;  %v2142_v28 = vcombine.low %v15102_v33, %v15090_v47  ;;  %v6068_v13 = vrot.slane %v15039_v3, %v14704_v48  ;;  %v16825_v6 = vld [vmem:[#allocation102_spill] sm:$0xff]  ;;  %v6059_v14 = vrot.slane %v15011_v30, %v14704_v48  ;;  %v16826_v3 = vld [vmem:[#allocation105_spill] sm:$0xff] }
 0x583   : > { %v12383_v55 = vpop.eup %12382  ;;  %v6284_v52 = vmul.f32 1.442695, %v6228_v17  ;;  %v15124_v53 = vpack.c.bf16 %v16825_v6, %v16815_v60  ;;  %v6282_v7 = vmul.f32 1.442695, %v6227_v31  ;;  %v15136_v17 = vpack.c.bf16 %v16826_v3, %v16817_v43  ;;  %v16827_v31 = vld [vmem:[#allocation47_spill] sm:$0xff]  ;;  %v16828_v3 = vld [vmem:[#allocation42_spill] sm:$0xff] }
 0x584   : > { %v15126_v62 = vpop.eup %12384  ;;  %v15130_v58 = vpop.permute.xlu0 %5963  ;;  %11794 = vmatprep.mubr.msk.f32.mxu1 %vm5184_vm3, %v12383_v55  ;;  %v6626_v38 = vsel %vm5184_vm3, %v12383_v55, 0.0  ;;  %v6055_v55 = vrot.slane %v14996_v23, %v14701_v61  ;;  %v16829_v6 = vld [vmem:[#allocation108_spill] sm:$0xff] }
 0x585   : > { %v5961_v4 = vpop.permute.xlu1 %5960  ;;  %12394 = vpow2.f32 %v6284_v52  ;;  %v6230_v30 = vsub.f32 %v16827_v31, %v15130_v58  ;;  %11788 = vmatmul.mubr.msk.f32.vlgmr.msra.gmra.mrb[64].mxu0 %vm5184_vm3, %v15126_v62  ;;  %6627 = vadd.xlane.f32.xlu1 %v6626_v38  ;;  %v15152_v21 = vpack.c.bf16 %v16829_v6, %v16814_v16  ;;  %v6069_v52 = vsel %vm5418_vm6, %v6068_v13, %v6064_v11 }
 0x586   : > { %12396 = vpow2.f32 %v6282_v7  ;;  %12194 = vmatpush3.bf16.msra.mxu0 %v15015_v63  ;;  %v6229_v43 = vsub.f32 %v16828_v3, %v5961_v4  ;;  %v6077_v31 = vrot.slane %v15071_v57, %v14704_v48  ;;  %v15159_v38 = vrot.slane %v2142_v28, %v16821_v41 }
 0x587   : > { %v12387_v36 = vpop.eup %12386  ;;  %v6288_v19 = vmul.f32 1.442695, %v6230_v30  ;;  %12200 = vmatprep.subr.bf16.mxu0 %v15113_v18  ;;  %v6060_v63 = vsel %vm5418_vm6, %v6059_v14, %v6055_v55  ;;  %v6086_v7 = vrot.slane %v15095_v46, %v14704_v48  ;;  %v6073_v13 = vrot.slane %v15036_v37, %v14701_v61  ;;  %v16830_v30 = vld [vmem:[#allocation56_spill] sm:$0xff]  ;;  %v16831_v14 = vld [vmem:[#allocation26_spill] sm:$0xff] }
 0x588   : > { %v15161_v23 = vpop.eup %12388  ;;  %v6286_v3 = vmul.f32 1.442695, %v6229_v43  ;;  %v5970_v6 = vpop.permute.xlu0 %5969  ;;  %11801 = vmatprep.mubr.msk.f32.mxu0 %vm5184_vm3, %v12387_v36  ;;  %v6632_v57 = vsel %vm5184_vm3, %v12387_v36, 0.0  ;;  %v6095_v28 = vrot.slane %v5961_v4, %v14704_v48  ;;  %v6131_v43 = vsel %vm5555_vm7, %v6069_v52, %v6060_v63 }
 0x589   : > { %v5967_v11 = vpop.permute.xlu1 %5966  ;;  %12398 = vpow2.f32 %v6288_v19  ;;  %v6232_v50 = vsub.f32 %v16830_v30, %v5970_v6  ;;  %11795 = vmatmul.mubr.msk.f32.vlgmr.msra.gmra.mrb[48].mxu1 %vm5184_vm3, %v15161_v23  ;;  %6633 = vadd.xlane.f32.xlu1 %v6632_v57  ;;  %v6082_v46 = vrot.slane %v15067_v22, %v14701_v61  ;;  %v6078_v19 = vsel %vm5418_vm6, %v6077_v31, %v6073_v13 }
 0x58a   : > { %12400 = vpow2.f32 %v6286_v3  ;;  %12198 = vmatpush3.bf16.msra.mxu1 %v15075_v20  ;;  %v6231_v55 = vsub.f32 %v16831_v14, %v5967_v11  ;;  %v6091_v4 = vrot.slane %v15092_v8, %v14701_v61  ;;  %v6104_v30 = vrot.slane %v5967_v11, %v14704_v48  ;;  %v16832_v8 = vld [vmem:[#allocation59_spill] sm:$0xff] }
 0x58b   : > { %v12391_v37 = vpop.eup %12390  ;;  %v6292_v36 = vmul.f32 1.442695, %v6232_v50  ;;  %12204 = vmatprep.subr.bf16.mxu1 %v15124_v53  ;;  %v6087_v22 = vsel %vm5418_vm6, %v6086_v7, %v6082_v46  ;;  %v6100_v20 = vrot.slane %v15130_v58, %v14701_v61  ;;  %v6132_v58 = vsel %vm5557_vm8, %v6078_v19, %v6131_v43  ;;  %v16833_v46 = vld [vmem:[#allocation40_spill] sm:$0xff] }
 0x58c   : > { %v15184_v52 = vpop.eup %12392  ;;  %v6290_v63 = vmul.f32 1.442695, %v6231_v55  ;;  %v5976_v3 = vpop.permute.xlu0 %5975  ;;  %11808 = vmatprep.mubr.msk.f32.mxu1 %vm5184_vm3, %v12391_v37  ;;  %v6638_v57 = vsel %vm5184_vm3, %v12391_v37, 0.0  ;;  %v6096_v50 = vsel %vm5418_vm6, %v6095_v28, %v6091_v4  ;;  %v6109_v13 = vrot.slane %v5970_v6, %v14701_v61 }
 0x58d   : > { %v5973_v31 = vpop.permute.xlu1 %5972  ;;  %12402 = vpow2.f32 %v6292_v36  ;;  %v6234_v11 = vsub.f32 %v16832_v8, %v5976_v3  ;;  %11802 = vmatmul.mubr.msk.f32.vlgmr.msra.gmra.mrb[66].mxu0 %vm5184_vm3, %v15184_v52  ;;  %6639 = vadd.xlane.f32.xlu1 %v6638_v57  ;;  %v6133_v28 = vsel %vm5559_vm9, %v6087_v22, %v6132_v58  ;;  %v6105_v37 = vsel %vm5418_vm6, %v6104_v30, %v6100_v20 }
 0x58e   : > { %v6113_v7 = vrot.slane %v5973_v31, %v14704_v48  ;;  %12404 = vpow2.f32 %v6290_v63  ;;  %12202 = vmatpush3.bf16.msra.mxu0 %v15113_v18  ;;  %v6233_v14 = vsub.f32 %v16833_v46, %v5973_v31  ;;  %v2174_v36 = vcombine.low %v15116_v12, %v15159_v38  ;;  %v16834_v63 = vld [vmem:[#allocation57_spill] sm:$0xff] }
 0x58f   : > { %v12395_v55 = vpop.eup %12394  ;;  %v6296_v4 = vmul.f32 1.442695, %v6234_v11  ;;  %12208 = vmatprep.subr.bf16.mxu0 %v15136_v17  ;;  %v6134_v22 = vsel %vm5561_vm10, %v6096_v50, %v6133_v28  ;;  %v6118_v30 = vrot.slane %v5976_v3, %v14701_v61  ;;  %v2007_v8 = vcombine.high %v15058_v15, %v15043_v39 }
 0x590   : > { %v15205_v57 = vpop.eup %12396  ;;  %v6294_v43 = vmul.f32 1.442695, %v6233_v14  ;;  %11815 = vmatprep.mubr.msk.f32.mxu0 %vm5184_vm3, %v12395_v55  ;;  %v6644_v18 = vsel %vm5184_vm3, %v12395_v55, 0.0  ;;  %v6114_v19 = vsel %vm5418_vm6, %v6113_v7, %v6109_v13  ;;  %v2038_v50 = vcombine.low %v15099_v25, %v15107_v59 }
 0x591   : > { %v5979_v6 = vpop.permute.xlu1 %5978  ;;  %12406 = vpow2.f32 %v6296_v4  ;;  %11809 = vmatmul.mubr.msk.f32.vlgmr.msra.gmra.mrb[50].mxu1 %vm5184_vm3, %v15205_v57  ;;  %6645 = vadd.xlane.f32.xlu1 %v6644_v18  ;;  %v6135_v3 = vsel %vm5563_vm11, %v6105_v37, %v6134_v22  ;;  %v2111_v7 = vcombine.high %v15065_v10, %v15051_v27  ;;  %v1975_v15 = vcombine.high %v15048_v0, %v15032_v24 }
 0x592   : > { %v6122_v20 = vrot.slane %v5979_v6, %v14704_v48  ;;  %v6235_v31 = vsub.f32 %v16834_v63, %v5979_v6  ;;  %12408 = vpow2.f32 %v6294_v43  ;;  %12206 = vmatpush3.bf16.msra.mxu1 %v15124_v53  ;;  %v6136_v46 = vsel %vm5565_vm12, %v6114_v19, %v6135_v3 }
 0x593   : > { %v12399_v11 = vpop.eup %12398  ;;  %12212 = vmatprep.subr.bf16.mxu1 %v15152_v21  ;;  %v12215_v27 = vpack.c.bf16 %v2174_v36, %v2038_v50  ;;  %v2175_v10 = vcombine.high %v15116_v12, %v15159_v38  ;;  %v16835_v55 = vcombine.high %v15102_v33, %v15090_v47  ;;  %v2039_v28 = vcombine.high %v15099_v25, %v15107_v59 }
 0x594   : > { %v6298_v58 = vmul.f32 1.442695, %v6235_v31  ;;  %v6123_v13 = vsel %vm5418_vm6, %v6122_v20, %v6118_v30  ;;  %v15227_v39 = vpop.eup %12400  ;;  %11822 = vmatprep.mubr.msk.f32.mxu1 %vm5184_vm3, %v12399_v11  ;;  %v6650_v53 = vsel %vm5184_vm3, %v12399_v11, 0.0  ;;  %v2021_v37 = vrot.slane %v2007_v8, %v16821_v41 }
 0x595   : > { %v6137_v14 = vsel %vm5567_vm13, %v6123_v13, %v6136_v46  ;;  %11816 = vmatmul.mubr.msk.f32.vlgmr.msra.gmra.mrb[68].mxu0 %vm5184_vm3, %v15227_v39  ;;  %6651 = vadd.xlane.f32.xlu1 %v6650_v53  ;;  %v2157_v24 = vrot.slane %v16835_v55, %v16821_v41  ;;  %v2125_v4 = vrot.slane %v2111_v7, %v16821_v41  ;;  %v6572_v30 = vsel %vm5184_vm3, %v14864_v9, 0.0 }
 0x596   : > { %12410 = vpow2.f32 %v6298_v58  ;;  %12210 = vmatpush3.bf16.msra.mxu0 %v15136_v17  ;;  %6141 = vxpose.xlu0.b32.end [2/2] (short) (narrow) %v6137_v14, 16  ;;  %v12219_v47 = vpack.c.bf16 %v2175_v10, %v2039_v28  ;;  %v1989_v33 = vrot.slane %v1975_v15, %v16821_v41  ;;  %v6578_v20 = vsel %vm5184_vm3, %v14881_v34, 0.0 }
 0x597   : > { %v12403_v0 = vpop.eup %12402  ;;  %12216 = vmatprep.subr.bf16.mxu0 %v12215_v27  ;;  %v2176_v17 = vcombine.low %v2125_v4, %v2157_v24  ;;  %v2177_v6 = vcombine.high %v2125_v4, %v2157_v24  ;;  %v6581_v63 = vsel %vm5184_vm3, %v14889_v32, 0.0  ;;  %v6587_v31 = vsel %vm5184_vm3, %v14910_v44, 0.0 }
 0x598   : > { %v12405_v36 = vpop.eup %12404  ;;  %11829 = vmatprep.mubr.msk.f32.mxu0 %vm5184_vm3, %v12403_v0  ;;  %v6656_v12 = vsel %vm5184_vm3, %v12403_v0, 0.0  ;;  %v2040_v25 = vcombine.low %v1989_v33, %v2021_v37  ;;  %v2041_v19 = vcombine.high %v1989_v33, %v2021_v37  ;;  %v6593_v8 = vsel %vm5184_vm3, %v14923_v56, 0.0 }
 0x599   : > { %11823 = vmatmul.mubr.msk.f32.vlgmr.msra.gmra.mrb[52].mxu1 %vm5184_vm3, %v12405_v36  ;;  %6657 = vadd.xlane.f32.xlu1 %v6656_v12  ;;  %v6599_v9 = vsel %vm5184_vm3, %v14944_v1, 0.0  ;;  %v6605_v34 = vsel %vm5184_vm3, %v14977_v26, 0.0  ;;  %v6611_v32 = vsel %vm5184_vm3, %v15003_v40, 0.0  ;;  %v6617_v44 = vsel %vm5184_vm3, %v15055_v29, 0.0 }
 0x59a   : > { %12214 = vmatpush3.bf16.msra.mxu1 %v15152_v21  ;;  %v15255_v18 = vpack.c.bf16 %v2176_v17, %v2040_v25  ;;  %v15259_v21 = vpack.c.bf16 %v2177_v6, %v2041_v19  ;;  %v6623_v56 = vsel %vm5184_vm3, %v15126_v62, 0.0  ;;  %v6629_v1 = vsel %vm5184_vm3, %v15161_v23, 0.0 }
 0x59b   : > { %v12407_v38 = vpop.eup %12406  ;;  %12220 = vmatprep.subr.bf16.mxu1 %v12219_v47  ;;  %v6635_v26 = vsel %vm5184_vm3, %v15184_v52, 0.0  ;;  %v6641_v40 = vsel %vm5184_vm3, %v15205_v57, 0.0  ;;  %v6647_v29 = vsel %vm5184_vm3, %v15227_v39, 0.0  ;;  %v6653_v50 = vsel %vm5184_vm3, %v12405_v36, 0.0 }
 0x59c   : > { %v12409_v59 = vpop.eup %12408  ;;  %11836 = vmatprep.mubr.msk.f32.mxu1 %vm5184_vm3, %v12407_v38  ;;  %v6662_v43 = vsel %vm5184_vm3, %v12407_v38, 0.0 }
 0x59d   : > { %11830 = vmatmul.mubr.msk.f32.vlgmr.msra.gmra.mrb[70].mxu0 %vm5184_vm3, %v12409_v59  ;;  %6663 = vadd.xlane.f32.xlu1 %v6662_v43  ;;  %v6659_v62 = vsel %vm5184_vm3, %v12409_v59, 0.0 }
 0x59e   : > { %12218 = vmatpush3.bf16.msra.mxu0 %v12215_v27 }
 0x59f   : > { %12224 = vmatprep.subr.bf16.mxu0 %v15255_v18 }
 0x5a0   : > { %v12411_v22 = vpop.eup %12410 }
 0x5a1   : > { %11837 = vmatmul.mubr.msk.f32.vlgmr.msra.gmra.mrb[54].mxu1 %vm5184_vm3, %v12411_v22  ;;  %v6665_v23 = vsel %vm5184_vm3, %v12411_v22, 0.0 }
 0x5a2   : > { %12222 = vmatpush3.bf16.msra.mxu1 %v12219_v47 }
 0x5a3   : > { %12228 = vmatprep.subr.bf16.mxu1 %v15259_v21 }
 0x5c3   : > { %6573 = vadd.xlane.f32.xlu0 %v6572_v30 }
 0x5c7   : > { %6579 = vadd.xlane.f32.xlu0 %v6578_v20 }
 0x5cb   : > { %6582 = vadd.xlane.f32.xlu0 %v6581_v63 }
 0x5cf   : > { %6588 = vadd.xlane.f32.xlu0 %v6587_v31 }
 0x5d3   : > { %6594 = vadd.xlane.f32.xlu0 %v6593_v8 }
 0x5d6   : > { %v15351_v17 = vpop.xlane.xlu1 %6576 }
 0x5d7   : > { %6600 = vadd.xlane.f32.xlu0 %v6599_v9  ;;  %16841 = vst [vmem:[#allocation52_spill] sm:$0xff] %v15351_v17 }
 0x5db   : > { %6606 = vadd.xlane.f32.xlu0 %v6605_v34 }
 0x5df   : > { %6612 = vadd.xlane.f32.xlu0 %v6611_v32 }
 0x5e2   : > { %v15353_v38 = vpop.xlane.xlu1 %6585 }
 0x5e3   : > { %6618 = vadd.xlane.f32.xlu0 %v6617_v44  ;;  %16842 = vst [vmem:[#allocation38_spill] sm:$0xff] %v15353_v38 }
 0x5e7   : > { %6624 = vadd.xlane.f32.xlu0 %v6623_v56 }
 0x5ea   : > { %v15360_v6 = vpop.xlane.xlu1 %6591 }
 0x5eb   : > { %6630 = vadd.xlane.f32.xlu0 %v6629_v1  ;;  %16844 = vst [vmem:[#allocation37_spill] sm:$0xff] %v15360_v6 }
 0x5ef   : > { %6636 = vadd.xlane.f32.xlu0 %v6635_v26 }
 0x5f2   : > { %v15362_v19 = vpop.xlane.xlu1 %6597 }
 0x5f3   : > { %6642 = vadd.xlane.f32.xlu0 %v6641_v40  ;;  %16845 = vst [vmem:[#allocation15_spill] sm:$0xff] %v15362_v19 }
 0x5f6   : > { %v15369_v63 = vpop.xlane.xlu1 %6603 }
 0x5f7   : > { %6648 = vadd.xlane.f32.xlu0 %v6647_v29  ;;  %16847 = vst [vmem:[#allocation46_spill] sm:$0xff] %v15369_v63 }
 0x5fb   : > { %6654 = vadd.xlane.f32.xlu0 %v6653_v50 }
 0x5fe   : > { %v15379_v32 = vpop.xlane.xlu1 %6609 }
 0x5ff   : > { %6660 = vadd.xlane.f32.xlu0 %v6659_v62  ;;  %16850 = vst [vmem:[#allocation14_spill] sm:$0xff] %v15379_v32 }
 0x603   : > { %6666 = vadd.xlane.f32.xlu0 %v6665_v23 }
 0x606   : > { %v15383_v56 = vpop.xlane.xlu1 %6615 }
 0x607   : > { %16852 = vst [vmem:[#allocation28_spill] sm:$0xff] %v15383_v56 }
 0x60e   : > { %v15391_v29 = vpop.xlane.xlu1 %6621 }
 0x60f   : > { %16855 = vst [vmem:[#allocation48_spill] sm:$0xff] %v15391_v29 }
 0x612   : > { %v6156_v3 = vpop.trf.xlu0 }
 0x613   : > { %v6303_v52 = vrot.slane %v6156_v3, %v14780_v42  ;;  %v6347_v57 = vrot.slane %v6156_v3, %v14777_v5  ;;  %v6314_v13 = vrot.slane %v6156_v3, %v14785_v45  ;;  %v6325_v14 = vrot.slane %v6156_v3, %v14789_v54 }
 0x614   : > { %v6336_v0 = vrot.slane %v6156_v3, %v14794_v35  ;;  %v6358_v12 = vrot.slane %v6156_v3, %v14800_v2  ;;  %v6369_v59 = vrot.slane %v6156_v3, %v14804_v51  ;;  %v6380_v30 = vrot.slane %v6156_v3, %v14809_v49 }
 0x615   : > { %6305 = vbcast.lane.b32.xlu1 %v6303_v52, 256 }
 0x616   : > { %v15294_v11 = vpop.trf.xlu0 }
 0x617   : > { %v15299_v7 = vrot.slane %v15294_v11, %v14789_v54  ;;  %v15309_v39 = vrot.slane %v15294_v11, %v14794_v35  ;;  %v15314_v15 = vrot.slane %v15294_v11, %v14777_v5  ;;  %v15324_v10 = vrot.slane %v15294_v11, %v14800_v2  ;;  %v16897_v2 = vld [vmem:[#allocation70_spill] sm:$0xff]  ;;  %v16901_v54 = vld [vmem:[#allocation16_spill] sm:$0xff]  ;;  %v16906_v5 = vld [vmem:[#allocation39_spill] sm:$0xff] }
 0x618   : > { %v15329_v55 = vrot.slane %v15294_v11, %v14804_v51  ;;  %v15339_v37 = vrot.slane %v15294_v11, %v14809_v49  ;;  %v6391_v31 = vrot.slane %v15294_v11, %v14780_v42  ;;  %v6402_v1 = vrot.slane %v15294_v11, %v14785_v45  ;;  %v16894_v51 = vld [vmem:[#allocation60_spill] sm:$0xff] }
 0x619   : > { %6309 = vbcast.lane.b32.xlu1 %v6303_v52, 264  ;;  %6353 = vbcast.lane.b32.xlu0 %v6347_v57, 264  ;;  %v15401_v52 = vpop.xlane.xlu1 %6627 }
 0x61a   : > { %16858 = vst [vmem:[#allocation21_spill] sm:$0xff] %v15401_v52 }
 0x61b   : > { %v15301_v58 = vpop.f32.mrb[56].mxu0 }
 0x61c   : > { %16836 = vst [vmem:[#allocation51_spill] sm:$0xff] %v15301_v58  ;;  %v15304_v46 = vpop.f32.mrb[57].mxu0 }
 0x61d   : > { %6316 = vbcast.lane.b32.xlu1 %v6314_v13, 256  ;;  %6415 = vbcast.lane.b32.xlu0 %v15299_v7, 256 }
 0x621   : > { %6320 = vbcast.lane.b32.xlu1 %v6314_v13, 264  ;;  %6426 = vbcast.lane.b32.xlu0 %v15309_v39, 256 }
 0x623   : > { %v15316_v53 = vpop.f32.mrb[40].mxu1 }
 0x624   : > { %16837 = vst [vmem:[#allocation45_spill] sm:$0xff] %v15316_v53  ;;  %v15319_v27 = vpop.f32.mrb[41].mxu1 }
 0x625   : > { %6327 = vbcast.lane.b32.xlu1 %v6325_v14, 256  ;;  %6437 = vbcast.lane.b32.xlu0 %v15314_v15, 256 }
 0x629   : > { %6331 = vbcast.lane.b32.xlu1 %v6325_v14, 264  ;;  %6448 = vbcast.lane.b32.xlu0 %v15324_v10, 256 }
 0x62b   : > { %v15331_v24 = vpop.f32.mrb[58].mxu0 }
 0x62c   : > { %16838 = vst [vmem:[#allocation41_spill] sm:$0xff] %v15331_v24  ;;  %v15334_v28 = vpop.f32.mrb[59].mxu0 }
 0x62d   : > { %6338 = vbcast.lane.b32.xlu1 %v6336_v0, 256  ;;  %6459 = vbcast.lane.b32.xlu0 %v15329_v55, 256 }
 0x631   : > { %6342 = vbcast.lane.b32.xlu1 %v6336_v0, 264  ;;  %6470 = vbcast.lane.b32.xlu0 %v15339_v37, 256 }
 0x633   : > { %v15342_v4 = vpop.f32.mrb[42].mxu1 }
 0x634   : > { %16839 = vst [vmem:[#allocation53_spill] sm:$0xff] %v15342_v4  ;;  %v15344_v36 = vpop.f32.mrb[43].mxu1 }
 0x635   : > { %6349 = vbcast.lane.b32.xlu1 %v6347_v57, 256 }
 0x638   : > { %v15347_v47 = vpop.f32.mrb[60].mxu0 }
 0x639   : > { %16840 = vst [vmem:[#allocation36_spill] sm:$0xff] %v15347_v47  ;;  %6360 = vbcast.lane.b32.xlu1 %v6358_v12, 256  ;;  %v15349_v33 = vpop.f32.mrb[61].mxu0 }
 0x63d   : > { %6364 = vbcast.lane.b32.xlu1 %v6358_v12, 264  ;;  %v15414_v12 = vpop.xlane.xlu1 %6633 }
 0x63e   : > { %16863 = vst [vmem:[#allocation47_spill] sm:$0xff] %v15414_v12 }
 0x63f   : > { %v15355_v25 = vpop.f32.mrb[44].mxu1 }
 0x640   : > { %16843 = vst [vmem:[#allocation32_spill] sm:$0xff] %v15355_v25  ;;  %v15358_v43 = vpop.f32.mrb[45].mxu1  ;;  %v16928_v25 = vld [vmem:[#allocation30_spill] sm:$0xff] }
 0x641   : > { %6371 = vbcast.lane.b32.xlu1 %v6369_v59, 256  ;;  %v15426_v29 = vpop.xlane.xlu1 %6639 }
 0x642   : > { %16867 = vst [vmem:[#allocation59_spill] sm:$0xff] %v15426_v29 }
 0x645   : > { %6375 = vbcast.lane.b32.xlu1 %v6369_v59, 264  ;;  %v15439_v32 = vpop.xlane.xlu1 %6645 }
 0x646   : > { %16873 = vst [vmem:[#allocation120_spill] sm:$0xff] %v15439_v32 }
 0x647   : > { %v15364_v22 = vpop.f32.mrb[62].mxu0 }
 0x648   : > { %16846 = vst [vmem:[#allocation13_spill] sm:$0xff] %v15364_v22  ;;  %v15367_v20 = vpop.f32.mrb[63].mxu0  ;;  %v16927_v22 = vld [vmem:[#allocation18_spill] sm:$0xff] }
 0x649   : > { %6382 = vbcast.lane.b32.xlu1 %v6380_v30, 256  ;;  %v2182_v47 = vcombine.low %v16928_v25, %v16927_v22 }
 0x64d   : > { %6386 = vbcast.lane.b32.xlu1 %v6380_v30, 264 }
 0x64f   : > { %v15373_v8 = vpop.f32.mrb[46].mxu1 }
 0x650   : > { %16848 = vst [vmem:[#allocation55_spill] sm:$0xff] %v15373_v8  ;;  %v15375_v9 = vpop.xlane.xlu0 %6573  ;;  %v15377_v34 = vpop.f32.mrb[47].mxu1 }
 0x651   : > { %16849 = vst [vmem:[#allocation34_spill] sm:$0xff] %v15375_v9  ;;  %6393 = vbcast.lane.b32.xlu1 %v6391_v31, 256  ;;  %v16892_v9 = vld [vmem:[#allocation50_spill] sm:$0xff] }
 0x654   : > { %v15381_v44 = vpop.xlane.xlu0 %6579 }
 0x655   : > { %16851 = vst [vmem:[#allocation12_spill] sm:$0xff] %v15381_v44  ;;  %6397 = vbcast.lane.b32.xlu1 %v6391_v31, 264  ;;  %v16890_v44 = vld [vmem:[#allocation98_spill] sm:$0xff] }
 0x658   : > { %v15387_v26 = vpop.f32.mrb[64].mxu0  ;;  %v15389_v40 = vpop.xlane.xlu0 %6582 }
 0x659   : > { %16853 = vst [vmem:[#allocation31_spill] sm:$0xff] %v15387_v26  ;;  %16854 = vst [vmem:[#allocation43_spill] sm:$0xff] %v15389_v40  ;;  %v15393_v50 = vpop.f32.mrb[65].mxu0  ;;  %6404 = vbcast.lane.b32.xlu1 %v6402_v1, 256  ;;  %v16889_v40 = vld [vmem:[#allocation75_spill] sm:$0xff] }
 0x65c   : > { %v15395_v62 = vpop.f32.mrb[48].mxu1  ;;  %v15397_v23 = vpop.xlane.xlu0 %6588 }
 0x65d   : > { %16856 = vst [vmem:[#allocation101_spill] sm:$0xff] %v15395_v62  ;;  %16857 = vst [vmem:[#allocation95_spill] sm:$0xff] %v15397_v23  ;;  %v15399_v3 = vpop.f32.mrb[49].mxu1  ;;  %6408 = vbcast.lane.b32.xlu1 %v6402_v1, 264  ;;  %v16886_v23 = vld [vmem:[#allocation65_spill] sm:$0xff]  ;;  %v16925_v62 = vld [vmem:[#allocation82_spill] sm:$0xff] }
 0x660   : > { %v15403_v57 = vpop.f32.mrb[66].mxu0  ;;  %v15405_v11 = vpop.xlane.xlu0 %6594 }
 0x661   : > { %16859 = vst [vmem:[#allocation54_spill] sm:$0xff] %v15403_v57  ;;  %16860 = vst [vmem:[#allocation33_spill] sm:$0xff] %v15405_v11  ;;  %v15407_v13 = vpop.f32.mrb[67].mxu0  ;;  %6419 = vbcast.lane.b32.xlu1 %v15299_v7, 264  ;;  %v16924_v57 = vld [vmem:[#allocation92_spill] sm:$0xff] }
 0x662   : > { %v2318_v26 = vcombine.low %v16925_v62, %v16924_v57 }
 0x664   : > { %v15410_v14 = vpop.f32.mrb[50].mxu1  ;;  %v15412_v0 = vpop.xlane.xlu0 %6600 }
 0x665   : > { %16861 = vst [vmem:[#allocation17_spill] sm:$0xff] %v15410_v14  ;;  %16862 = vst [vmem:[#allocation23_spill] sm:$0xff] %v15412_v0  ;;  %v15416_v59 = vpop.f32.mrb[51].mxu1  ;;  %6430 = vbcast.lane.b32.xlu1 %v15309_v39, 264  ;;  %v16885_v0 = vld [vmem:[#allocation44_spill] sm:$0xff] }
 0x668   : > { %v15419_v30 = vpop.f32.mrb[68].mxu0  ;;  %v15421_v31 = vpop.xlane.xlu0 %6606 }
 0x669   : > { %16864 = vst [vmem:[#allocation42_spill] sm:$0xff] %v15419_v30  ;;  %16865 = vst [vmem:[#allocation56_spill] sm:$0xff] %v15421_v31  ;;  %v15423_v1 = vpop.f32.mrb[69].mxu0  ;;  %6441 = vbcast.lane.b32.xlu1 %v15314_v15, 264 }
 0x66a   : > { %16866 = vst [vmem:[#allocation26_spill] sm:$0xff] %v15423_v1 }
 0x66c   : > { %v15428_v7 = vpop.f32.mrb[52].mxu1  ;;  %v15430_v52 = vpop.xlane.xlu0 %6612 }
 0x66d   : > { %16868 = vst [vmem:[#allocation40_spill] sm:$0xff] %v15428_v7  ;;  %16869 = vst [vmem:[#allocation57_spill] sm:$0xff] %v15430_v52  ;;  %v15432_v56 = vpop.f32.mrb[53].mxu1  ;;  %6452 = vbcast.lane.b32.xlu1 %v15324_v10, 264  ;;  %v15451_v52 = vpop.xlane.xlu1 %6651 }
 0x66e   : > { %16870 = vst [vmem:[#allocation117_spill] sm:$0xff] %v15432_v56  ;;  %16878 = vst [vmem:[#allocation125_spill] sm:$0xff] %v15451_v52  ;;  %v16887_v52 = vld [vmem:[#allocation27_spill] sm:$0xff] }
 0x66f   : > { %v1959_v38 = vcombine.high %v16887_v52, %v16886_v23  ;;  %v16899_v52 = vld [vmem:[#allocation25_spill] sm:$0xff] }
 0x670   : > { %v15435_v12 = vpop.f32.mrb[70].mxu0  ;;  %v15437_v39 = vpop.xlane.xlu0 %6618 }
 0x671   : > { %16871 = vst [vmem:[#allocation118_spill] sm:$0xff] %v15435_v12  ;;  %16872 = vst [vmem:[#allocation119_spill] sm:$0xff] %v15437_v39  ;;  %v15441_v31 = vpop.f32.mrb[71].mxu0  ;;  %6463 = vbcast.lane.b32.xlu1 %v15329_v55, 264  ;;  %v15457_v39 = vpop.xlane.xlu1 %6657  ;;  %v2095_v55 = vcombine.high %v16815_v60, %v16814_v16  ;;  %v16895_v16 = vld [vmem:[#allocation24_spill] sm:$0xff]  ;;  %v16923_v12 = vld [vmem:[#allocation62_spill] sm:$0xff] }
 0x672   : > { %16874 = vst [vmem:[#allocation121_spill] sm:$0xff] %v15441_v31  ;;  %16881 = vst [vmem:[#allocation128_spill] sm:$0xff] %v15457_v39  ;;  %v16891_v39 = vld [vmem:[#allocation90_spill] sm:$0xff]  ;;  %v1943_v60 = vcombine.high %v16895_v16, %v16894_v51 }
 0x673   : > { %v2079_v17 = vcombine.high %v16891_v39, %v16890_v44 }
 0x674   : > { %v15444_v15 = vpop.f32.mrb[54].mxu1  ;;  %v15446_v29 = vpop.xlane.xlu0 %6624 }
 0x675   : > { %16875 = vst [vmem:[#allocation122_spill] sm:$0xff] %v15444_v15  ;;  %16876 = vst [vmem:[#allocation123_spill] sm:$0xff] %v15446_v29  ;;  %v15448_v63 = vpop.f32.mrb[55].mxu1  ;;  %6474 = vbcast.lane.b32.xlu1 %v15339_v37, 264  ;;  %v15461_v11 = vpop.xlane.xlu1 %6663 }
 0x676   : > { %16877 = vst [vmem:[#allocation124_spill] sm:$0xff] %v15448_v63  ;;  %16883 = vst [vmem:[#allocation130_spill] sm:$0xff] %v15461_v11  ;;  %v16893_v11 = vld [vmem:[#allocation19_spill] sm:$0xff] }
 0x677   : > { %v1927_v49 = vcombine.high %v16893_v11, %v16892_v9 }
 0x678   : > { %v15453_v10 = vpop.xlane.xlu0 %6630 }
 0x679   : > { %16879 = vst [vmem:[#allocation126_spill] sm:$0xff] %v15453_v10  ;;  %v16888_v10 = vld [vmem:[#allocation85_spill] sm:$0xff] }
 0x67c   : > { %v15455_v19 = vpop.xlane.xlu0 %6636 }
 0x67d   : > { %16880 = vst [vmem:[#allocation127_spill] sm:$0xff] %v15455_v19  ;;  %v2063_v19 = vcombine.high %v16889_v40, %v16888_v10  ;;  %v16900_v10 = vld [vmem:[#allocation20_spill] sm:$0xff] }
 0x67e   : > { %v1911_v44 = vcombine.high %v16901_v54, %v16900_v10  ;;  %v16905_v10 = vld [vmem:[#allocation67_spill] sm:$0xff] }
 0x680   : > { %v15459_v32 = vpop.xlane.xlu0 %6642 }
 0x681   : > { %16882 = vst [vmem:[#allocation129_spill] sm:$0xff] %v15459_v32 }
 0x684   : > { %v15465_v29 = vpop.xlane.xlu0 %6648 }
 0x685   : > { %16884 = vst [vmem:[#allocation131_spill] sm:$0xff] %v15465_v29  ;;  %v16896_v29 = vld [vmem:[#allocation80_spill] sm:$0xff] }
 0x686   : > { %v2047_v35 = vcombine.high %v16897_v2, %v16896_v29 }
 0x687   : > { %v6306_v6 = vpop.permute.xlu1 %6305 }
 0x688   : > { %v6476_v37 = vsub.f32 %v16885_v0, %v6306_v6  ;;  %v16898_v6 = vld [vmem:[#allocation29_spill] sm:$0xff]  ;;  %v15495_v2 = vpop.xlane.xlu0 %6654 }
 0x689   : > { %v15481_v0 = vrot.slane %v2095_v55, %v16898_v6  ;;  %v15487_v39 = vrot.slane %v1959_v38, %v16898_v6  ;;  %v15490_v9 = vrot.slane %v2063_v19, %v16898_v6  ;;  %v15493_v51 = vrot.slane %v2079_v17, %v16898_v6  ;;  %16902 = vst [vmem:[#allocation44_spill] sm:$0xff] %v15495_v2  ;;  %v16903_v55 = vld [vmem:[#allocation68_spill] sm:$0xff] }
 0x68a   : > { %v6508_v32 = vmul.f32 1.442695, %v6476_v37  ;;  %v15498_v11 = vrot.slane %v1927_v49, %v16898_v6  ;;  %v15504_v54 = vrot.slane %v2047_v35, %v16898_v6  ;;  %v15510_v37 = vrot.slane %v1911_v44, %v16898_v6 }
 0x68b   : > { %v6310_v23 = vpop.permute.xlu1 %6309  ;;  %v2158_v38 = vcombine.low %v15493_v51, %v15481_v0 }
 0x68c   : > { %12412 = vpow2.f32 %v6508_v32  ;;  %v6477_v40 = vsub.f32 %v16899_v52, %v6310_v23  ;;  %v15501_v32 = vrot.slane %v1943_v60, %v16898_v6  ;;  %v2126_v16 = vcombine.low %v15504_v54, %v15490_v9  ;;  %v15518_v23 = vpop.xlane.xlu0 %6660 }
 0x68d   : > { %v1990_v35 = vcombine.low %v15510_v37, %v15498_v11  ;;  %16904 = vst [vmem:[#allocation65_spill] sm:$0xff] %v15518_v23 }
 0x68e   : > { %v6510_v29 = vmul.f32 1.442695, %v6477_v40  ;;  %v2022_v49 = vcombine.low %v15501_v32, %v15487_v39  ;;  %v2166_v40 = vrot.slane %v2158_v38, %v16821_v41 }
 0x68f   : > { %v6317_v19 = vpop.permute.xlu1 %6316  ;;  %v1998_v42 = vrot.slane %v1990_v35, %v16821_v41  ;;  %v16908_v35 = vld [vmem:[#allocation35_spill] sm:$0xff] }
 0x690   : > { %12414 = vpow2.f32 %v6510_v29  ;;  %v6478_v17 = vsub.f32 %v16903_v55, %v6317_v19  ;;  %v2030_v44 = vrot.slane %v2022_v49, %v16821_v41  ;;  %v2134_v19 = vrot.slane %v2126_v16, %v16821_v41 }
 0x692   : > { %v6512_v60 = vmul.f32 1.442695, %v6478_v17  ;;  %v2178_v23 = vcombine.low %v2134_v19, %v2166_v40 }
 0x693   : > { %v6321_v52 = vpop.permute.xlu1 %6320 }
 0x694   : > { %12416 = vpow2.f32 %v6512_v60  ;;  %v6479_v29 = vsub.f32 %v16905_v10, %v6321_v52  ;;  %v15528_v60 = vpop.xlane.xlu0 %6666  ;;  %v2042_v52 = vcombine.low %v1998_v42, %v2030_v44 }
 0x695   : > { %16907 = vst [vmem:[#allocation27_spill] sm:$0xff] %v15528_v60  ;;  %v1991_v60 = vcombine.high %v15510_v37, %v15498_v11  ;;  %v16914_v11 = vld [vmem:[#allocation49_spill] sm:$0xff]  ;;  %v16915_v37 = vld [vmem:[#allocation22_spill] sm:$0xff] }
 0x696   : > { %v12413_v55 = vpop.eup %12412  ;;  %v6514_v2 = vmul.f32 1.442695, %v6479_v29  ;;  %v15531_v29 = vpack.c.bf16 %v2178_v23, %v2042_v52  ;;  %v2179_v52 = vcombine.high %v2134_v19, %v2166_v40 }
 0x697   : > { %11843 = vmatprep.mubr.msk.f32.mxu0 %vm5184_vm3, %v12413_v55  ;;  %v6328_v17 = vpop.permute.xlu1 %6327  ;;  %v6668_v45 = vsel %vm5184_vm3, %v12413_v55, 0.0  ;;  %v2159_v55 = vcombine.high %v15493_v51, %v15481_v0  ;;  %v16910_v0 = vld [vmem:[#allocation58_spill] sm:$0xff] }
 0x698   : > { %12418 = vpow2.f32 %v6514_v2  ;;  %v6480_v38 = vsub.f32 %v16906_v5, %v6328_v17  ;;  %v6354_v17 = vpop.permute.xlu0 %6353 }
 0x699   : > { %6669 = vadd.xlane.f32.xlu1 %v6668_v45  ;;  %v6485_v51 = vsub.f32 %v16910_v0, %v6354_v17  ;;  %v16916_v17 = vld [vmem:[#allocation76_spill] sm:$0xff] }
 0x69a   : > { %v12415_v49 = vpop.eup %12414  ;;  %v6516_v10 = vmul.f32 1.442695, %v6480_v38  ;;  %v16921_v0 = vld [vmem:[#allocation100_spill] sm:$0xff] }
 0x69b   : > { %11844 = vmatmul.mubr.msk.f32.vlgmr.msra.gmra.mrb[72].mxu0 %vm5184_vm3, %v12415_v49  ;;  %v6332_v16 = vpop.permute.xlu1 %6331  ;;  %v6671_v15 = vsel %vm5184_vm3, %v12415_v49, 0.0  ;;  %v16909_v49 = vld [vmem:[#allocation74_spill] sm:$0xff] }
 0x69c   : > { %12420 = vpow2.f32 %v6516_v10  ;;  %12226 = vmatpush3.bf16.msra.mxu0 %v15255_v18  ;;  %v6481_v2 = vsub.f32 %v16908_v35, %v6332_v16  ;;  %6672 = vadd.xlane.f32.xlu0 %v6671_v15  ;;  %v2023_v15 = vcombine.high %v15501_v32, %v15487_v39  ;;  %v2127_v10 = vcombine.high %v15504_v54, %v15490_v9  ;;  %v16911_v32 = vld [vmem:[#allocation108_spill] sm:$0xff]  ;;  %v16912_v9 = vld [vmem:[#allocation102_spill] sm:$0xff]  ;;  %v16913_v54 = vld [vmem:[#allocation73_spill] sm:$0xff] }
 0x69d   : > { %12232 = vmatprep.subr.bf16.mxu0 %v15531_v29  ;;  %v2043_v16 = vcombine.high %v1998_v42, %v2030_v44  ;;  %v15554_v39 = vrot.slane %v2159_v55, %v16821_v41  ;;  %v2366_v42 = vcombine.low %v16912_v9, %v16911_v32 }
 0x69e   : > { %v12417_v5 = vpop.eup %12416  ;;  %v6518_v45 = vmul.f32 1.442695, %v6481_v2  ;;  %v2037_v55 = vrot.slane %v2023_v15, %v16821_v41  ;;  %v2005_v15 = vrot.slane %v1991_v60, %v16821_v41 }
 0x69f   : > { %11850 = vmatprep.mubr.msk.f32.mxu1 %vm5184_vm3, %v12417_v5  ;;  %v6339_v23 = vpop.permute.xlu1 %6338  ;;  %v6674_v38 = vsel %vm5184_vm3, %v12417_v5, 0.0  ;;  %v15550_v19 = vpack.c.bf16 %v2179_v52, %v2043_v16  ;;  %v2141_v52 = vrot.slane %v2127_v10, %v16821_v41  ;;  %v16919_v16 = vld [vmem:[#allocation86_spill] sm:$0xff]  ;;  %v15580_v8 = vrot.slane %v2366_v42, %v16898_v6 }
 0x6a0   : > { %12422 = vpow2.f32 %v6518_v45  ;;  %v6482_v18 = vsub.f32 %v16909_v49, %v6339_v23  ;;  %6675 = vadd.xlane.f32.xlu1 %v6674_v38  ;;  %v2198_v45 = vcombine.low %v16915_v37, %v16914_v11  ;;  %v16917_v23 = vld [vmem:[#allocation66_spill] sm:$0xff]  ;;  %v2045_v58 = vcombine.high %v2005_v15, %v2037_v55 }
 0x6a1   : > { %v2230_v38 = vcombine.low %v16917_v23, %v16916_v17  ;;  %v2180_v10 = vcombine.low %v2141_v52, %v15554_v39 }
 0x6a2   : > { %v12419_v35 = vpop.eup %12418  ;;  %v6520_v2 = vmul.f32 1.442695, %v6482_v18  ;;  %v16918_v18 = vld [vmem:[#allocation96_spill] sm:$0xff] }
 0x6a3   : > { %11851 = vmatmul.mubr.msk.f32.vlgmr.msra.gmra.mrb[56].mxu1 %vm5184_vm3, %v12419_v35  ;;  %v6343_v40 = vpop.permute.xlu1 %6342  ;;  %v6677_v5 = vsel %vm5184_vm3, %v12419_v35, 0.0  ;;  %v2334_v35 = vcombine.low %v16919_v16, %v16918_v18  ;;  %v15586_v4 = vrot.slane %v2230_v38, %v16898_v6 }
 0x6a4   : > { %12424 = vpow2.f32 %v6520_v2  ;;  %12230 = vmatpush3.bf16.msra.mxu1 %v15259_v21  ;;  %v6483_v44 = vsub.f32 %v16913_v54, %v6343_v40  ;;  %6678 = vadd.xlane.f32.xlu0 %v6677_v5  ;;  %v16920_v21 = vld [vmem:[#allocation105_spill] sm:$0xff]  ;;  %v6526_v40 = vmul.f32 1.442695, %v6485_v51  ;;  %v16922_v54 = vld [vmem:[#allocation72_spill] sm:$0xff] }
 0x6a5   : > { %12236 = vmatprep.subr.bf16.mxu1 %v15550_v19  ;;  %v2350_v2 = vcombine.low %v16921_v0, %v16920_v21  ;;  %v2214_v7 = vcombine.low %v16923_v12, %v16922_v54  ;;  %v16926_v51 = vld [vmem:[#allocation61_spill] sm:$0xff]  ;;  %v15589_v24 = vrot.slane %v2334_v35, %v16898_v6  ;;  %v15603_v35 = vrot.slane %v2318_v26, %v16898_v6 }
 0x6a6   : > { %v12421_v49 = vpop.eup %12420  ;;  %v6522_v5 = vmul.f32 1.442695, %v6483_v44 }
 0x6a7   : > { %11857 = vmatprep.mubr.msk.f32.mxu0 %vm5184_vm3, %v12421_v49  ;;  %v6350_v30 = vpop.permute.xlu1 %6349  ;;  %v6680_v14 = vsel %vm5184_vm3, %v12421_v49, 0.0  ;;  %v2044_v49 = vcombine.low %v2005_v15, %v2037_v55  ;;  %v15592_v53 = vrot.slane %v2350_v2, %v16898_v6  ;;  %v2382_v26 = vcombine.low %v15603_v35, %v15589_v24 }
 0x6a8   : > { %12426 = vpow2.f32 %v6522_v5  ;;  %v6484_v44 = vsub.f32 %v16926_v51, %v6350_v30  ;;  %6681 = vadd.xlane.f32.xlu1 %v6680_v14  ;;  %v15595_v5 = vrot.slane %v2198_v45, %v16898_v6  ;;  %v15598_v14 = vrot.slane %v2214_v7, %v16898_v6  ;;  %v16929_v45 = vld [vmem:[#allocation81_spill] sm:$0xff] }
 0x6a9   : > { %12428 = vpow2.f32 %v6526_v40  ;;  %v12239_v38 = vpack.c.bf16 %v2180_v10, %v2044_v49  ;;  %v2414_v2 = vcombine.low %v15592_v53, %v15580_v8  ;;  %v2390_v56 = vrot.slane %v2382_v26, %v16821_v41 }
 0x6aa   : > { %v12423_v60 = vpop.eup %12422  ;;  %v6524_v42 = vmul.f32 1.442695, %v6484_v44  ;;  %v15610_v44 = vrot.slane %v2182_v47, %v16898_v6  ;;  %v2278_v10 = vcombine.low %v15598_v14, %v15586_v4  ;;  %v16930_v47 = vld [vmem:[#allocation79_spill] sm:$0xff] }
 0x6ab   : > { %11858 = vmatmul.mubr.msk.f32.vlgmr.msra.gmra.mrb[74].mxu0 %vm5184_vm3, %v12423_v60  ;;  %v6361_v30 = vpop.permute.xlu1 %6360  ;;  %v6683_v51 = vsel %vm5184_vm3, %v12423_v60, 0.0 }
 0x6ac   : > { %12430 = vpow2.f32 %v6524_v42  ;;  %12234 = vmatpush3.bf16.msra.mxu0 %v15531_v29  ;;  %v6486_v40 = vsub.f32 %v16929_v45, %v6361_v30  ;;  %6684 = vadd.xlane.f32.xlu0 %v6683_v51  ;;  %v2181_v42 = vcombine.high %v2141_v52, %v15554_v39  ;;  %v2246_v30 = vcombine.low %v15610_v44, %v15595_v5 }
 0x6ad   : > { %12240 = vmatprep.subr.bf16.mxu0 %v12239_v38  ;;  %v2422_v45 = vrot.slane %v2414_v2, %v16821_v41 }
 0x6ae   : > { %v12425_v7 = vpop.eup %12424  ;;  %v6528_v49 = vmul.f32 1.442695, %v6486_v40  ;;  %v2286_v40 = vrot.slane %v2278_v10, %v16821_v41  ;;  %v12243_v39 = vpack.c.bf16 %v2181_v42, %v2045_v58  ;;  %v2254_v55 = vrot.slane %v2246_v30, %v16821_v41 }
 0x6af   : > { %11864 = vmatprep.mubr.msk.f32.mxu1 %vm5184_vm3, %v12425_v7  ;;  %v6365_v60 = vpop.permute.xlu1 %6364  ;;  %v6686_v29 = vsel %vm5184_vm3, %v12425_v7, 0.0  ;;  %v2446_v15 = vcombine.low %v2390_v56, %v2422_v45 }
 0x6b0   : > { %12432 = vpow2.f32 %v6528_v49  ;;  %v6487_v51 = vsub.f32 %v16930_v47, %v6365_v60  ;;  %6687 = vadd.xlane.f32.xlu1 %v6686_v29  ;;  %v16931_v49 = vld [vmem:[#allocation64_spill] sm:$0xff]  ;;  %v2310_v26 = vcombine.low %v2254_v55, %v2286_v40 }
 0x6b2   : > { %v12427_v63 = vpop.eup %12426  ;;  %v6530_v31 = vmul.f32 1.442695, %v6487_v51  ;;  %v12247_v42 = vpack.c.bf16 %v2446_v15, %v2310_v26  ;;  %v2415_v51 = vcombine.high %v15592_v53, %v15580_v8  ;;  %v2311_v15 = vcombine.high %v2254_v55, %v2286_v40 }
 0x6b3   : > { %11865 = vmatmul.mubr.msk.f32.vlgmr.msra.gmra.mrb[58].mxu1 %vm5184_vm3, %v12427_v63  ;;  %v6372_v7 = vpop.permute.xlu1 %6371  ;;  %v6689_v52 = vsel %vm5184_vm3, %v12427_v63, 0.0  ;;  %v12429_v1 = vpop.eup %12428  ;;  %v2247_v8 = vcombine.high %v15610_v44, %v15595_v5  ;;  %v2367_v55 = vcombine.high %v16912_v9, %v16911_v32  ;;  %v2335_v32 = vcombine.high %v16919_v16, %v16918_v18 }
 0x6b4   : > { %12434 = vpow2.f32 %v6530_v31  ;;  %12238 = vmatpush3.bf16.msra.mxu1 %v15550_v19  ;;  %v6488_v60 = vsub.f32 %v16931_v49, %v6372_v7  ;;  %6690 = vadd.xlane.f32.xlu0 %v6689_v52  ;;  %v6695_v58 = vsel %vm5184_vm3, %v12429_v1, 0.0  ;;  %v16932_v31 = vld [vmem:[#allocation63_spill] sm:$0xff]  ;;  %v2447_v49 = vcombine.high %v2390_v56, %v2422_v45 }
 0x6b5   : > { %12244 = vmatprep.subr.bf16.mxu1 %v12243_v39  ;;  %v2351_v9 = vcombine.high %v16921_v0, %v16920_v21  ;;  %v15686_v18 = vrot.slane %v2367_v55, %v16898_v6 }
 0x6b6   : > { %v12431_v2 = vpop.eup %12430  ;;  %v6532_v10 = vmul.f32 1.442695, %v6488_v60  ;;  %v6416_v60 = vpop.permute.xlu0 %6415  ;;  %v15647_v45 = vpack.c.bf16 %v2447_v49, %v2311_v15 }
 0x6b7   : > { %11871 = vmatprep.mubr.msk.f32.mxu0 %vm5184_vm3, %v12431_v2  ;;  %v6376_v29 = vpop.permute.xlu1 %6375  ;;  %v6692_v63 = vsel %vm5184_vm3, %v12431_v2, 0.0  ;;  %v16933_v2 = vld [vmem:[#allocation88_spill] sm:$0xff] }
 0x6b8   : > { %12436 = vpow2.f32 %v6532_v10  ;;  %v6489_v19 = vsub.f32 %v16932_v31, %v6376_v29  ;;  %6696 = vadd.xlane.f32.xlu0 %v6695_v58  ;;  %11872 = vmatmul.mubr.msk.f32.vlgmr.msra.gmra.mrb[76].mxu0 %vm5184_vm3, %v12429_v1  ;;  %v2279_v1 = vcombine.high %v15598_v14, %v15586_v4  ;;  %v15651_v58 = vrot.slane %v2415_v51, %v16821_v41 }
 0x6b9   : > { %12242 = vmatpush3.bf16.msra.mxu0 %v12239_v38  ;;  %6693 = vadd.xlane.f32.xlu1 %v6692_v63  ;;  %v2383_v38 = vcombine.high %v15603_v35, %v15589_v24  ;;  %v16934_v24 = vld [vmem:[#allocation87_spill] sm:$0xff]  ;;  %v2261_v31 = vrot.slane %v2247_v8, %v16821_v41 }
 0x6ba   : > { %v12433_v30 = vpop.eup %12432  ;;  %v6534_v47 = vmul.f32 1.442695, %v6489_v19  ;;  %12248 = vmatprep.subr.bf16.mxu0 %v12247_v42  ;;  %v15656_v14 = vrot.slane %v2279_v1, %v16821_v41  ;;  %v15661_v44 = vpop.permute.xlu0 %6426  ;;  %v2319_v1 = vcombine.high %v16925_v62, %v16924_v57  ;;  %v15699_v57 = vrot.slane %v2335_v32, %v16898_v6 }
 0x6bb   : > { %11878 = vmatprep.mubr.msk.f32.mxu1 %vm5184_vm3, %v12433_v30  ;;  %v6383_v7 = vpop.permute.xlu1 %6382  ;;  %v6698_v52 = vsel %vm5184_vm3, %v12433_v30, 0.0  ;;  %v15659_v5 = vrot.slane %v2383_v38, %v16821_v41  ;;  %v2231_v30 = vcombine.high %v16917_v23, %v16916_v17  ;;  %v2215_v17 = vcombine.high %v16923_v12, %v16922_v54  ;;  %v16937_v12 = vld [vmem:[#allocation69_spill] sm:$0xff] }
 0x6bc   : > { %12438 = vpow2.f32 %v6534_v47  ;;  %v6490_v10 = vsub.f32 %v16933_v2, %v6383_v7  ;;  %v16935_v47 = vld [vmem:[#allocation71_spill] sm:$0xff]  ;;  %v16936_v7 = vld [vmem:[#allocation78_spill] sm:$0xff]  ;;  %v2312_v49 = vcombine.low %v2261_v31, %v15656_v14 }
 0x6bd   : > { %6699 = vadd.xlane.f32.xlu1 %v6698_v52  ;;  %v2448_v19 = vcombine.low %v15659_v5, %v15651_v58  ;;  %v6496_v52 = vsub.f32 %v16936_v7, %v6416_v60  ;;  %v15696_v62 = vrot.slane %v2231_v30, %v16898_v6  ;;  %v15702_v60 = vrot.slane %v2351_v9, %v16898_v6 }
 0x6be   : > { %v12435_v26 = vpop.eup %12434  ;;  %v6536_v53 = vmul.f32 1.442695, %v6490_v10  ;;  %v2199_v10 = vcombine.high %v16915_v37, %v16914_v11  ;;  %v2183_v11 = vcombine.high %v16928_v25, %v16927_v22  ;;  %v6438_v37 = vpop.permute.xlu0 %6437  ;;  %v15709_v22 = vrot.slane %v2215_v17, %v16898_v6 }
 0x6bf   : > { %11879 = vmatmul.mubr.msk.f32.vlgmr.msra.gmra.mrb[60].mxu1 %vm5184_vm3, %v12435_v26  ;;  %v6387_v56 = vpop.permute.xlu1 %6386  ;;  %v6701_v29 = vsel %vm5184_vm3, %v12435_v26, 0.0  ;;  %v15689_v21 = vpack.c.bf16 %v2448_v19, %v2312_v49  ;;  %v6548_v38 = vmul.f32 1.442695, %v6496_v52  ;;  %v15712_v26 = vrot.slane %v2319_v1, %v16898_v6  ;;  %v16939_v19 = vld [vmem:[#allocation99_spill] sm:$0xff] }
 0x6c0   : > { %12440 = vpow2.f32 %v6536_v53  ;;  %12246 = vmatpush3.bf16.msra.mxu1 %v12243_v39  ;;  %v6491_v4 = vsub.f32 %v16934_v24, %v6387_v56  ;;  %6702 = vadd.xlane.f32.xlu0 %v6701_v29  ;;  %v15706_v25 = vrot.slane %v2199_v10, %v16898_v6  ;;  %v2430_v53 = vcombine.low %v15702_v60, %v15686_v18  ;;  %v16941_v10 = vld [vmem:[#allocation84_spill] sm:$0xff] }
 0x6c1   : > { %12252 = vmatprep.subr.bf16.mxu1 %v15647_v45  ;;  %v2449_v29 = vcombine.high %v15659_v5, %v15651_v58  ;;  %v15721_v24 = vrot.slane %v2183_v11, %v16898_v6  ;;  %v2398_v55 = vcombine.low %v15712_v26, %v15699_v57  ;;  %v6498_v58 = vsub.f32 %v16939_v19, %v15661_v44 }
 0x6c2   : > { %v12437_v35 = vpop.eup %12436  ;;  %v6538_v40 = vmul.f32 1.442695, %v6491_v4  ;;  %v16938_v4 = vld [vmem:[#allocation94_spill] sm:$0xff]  ;;  %v6449_v5 = vpop.permute.xlu0 %6448  ;;  %v15738_v7 = vrot.slane %v2430_v53, %v16821_v41  ;;  %v6500_v17 = vsub.f32 %v16941_v10, %v6438_v37  ;;  %v2399_v19 = vcombine.high %v15712_v26, %v15699_v57  ;;  %v16946_v26 = vld [vmem:[#allocation83_spill] sm:$0xff] }
 0x6c3   : > { %11885 = vmatprep.mubr.msk.f32.mxu0 %vm5184_vm3, %v12437_v35  ;;  %v6394_v39 = vpop.permute.xlu1 %6393  ;;  %v6704_v63 = vsel %vm5184_vm3, %v12437_v35, 0.0  ;;  %v2406_v52 = vrot.slane %v2398_v55, %v16821_v41  ;;  %v16944_v55 = vld [vmem:[#allocation97_spill] sm:$0xff] }
 0x6c4   : > { %12442 = vpow2.f32 %v6538_v40  ;;  %v6492_v51 = vsub.f32 %v16935_v47, %v6394_v39  ;;  %6705 = vadd.xlane.f32.xlu1 %v6704_v63  ;;  %v2294_v40 = vcombine.low %v15709_v22, %v15696_v62  ;;  %v2313_v39 = vcombine.high %v2261_v31, %v15656_v14  ;;  %v16940_v14 = vld [vmem:[#allocation93_spill] sm:$0xff] }
 0x6c5   : > { %v2262_v47 = vcombine.low %v15721_v24, %v15706_v25  ;;  %v6556_v37 = vmul.f32 1.442695, %v6500_v17 }
 0x6c6   : > { %v12439_v2 = vpop.eup %12438  ;;  %v6540_v23 = vmul.f32 1.442695, %v6492_v51  ;;  %v15734_v32 = vpack.c.bf16 %v2449_v29, %v2313_v39  ;;  %v15744_v31 = vrot.slane %v2294_v40, %v16821_v41  ;;  %v6460_v11 = vpop.permute.xlu0 %6459  ;;  %v2431_v29 = vcombine.high %v15702_v60, %v15686_v18  ;;  %v16945_v18 = vld [vmem:[#allocation91_spill] sm:$0xff] }
 0x6c7   : > { %11886 = vmatmul.mubr.msk.f32.vlgmr.msra.gmra.mrb[78].mxu0 %vm5184_vm3, %v12439_v2  ;;  %v6398_v16 = vpop.permute.xlu1 %6397  ;;  %v6707_v0 = vsel %vm5184_vm3, %v12439_v2, 0.0  ;;  %v6552_v2 = vmul.f32 1.442695, %v6498_v58  ;;  %v6504_v60 = vsub.f32 %v16945_v18, %v6460_v11 }
 0x6c8   : > { %12444 = vpow2.f32 %v6540_v23  ;;  %12250 = vmatpush3.bf16.msra.mxu0 %v12247_v42  ;;  %v6493_v54 = vsub.f32 %v16937_v12, %v6398_v16  ;;  %6708 = vadd.xlane.f32.xlu0 %v6707_v0  ;;  %v2270_v16 = vrot.slane %v2262_v47, %v16821_v41  ;;  %v2450_v0 = vcombine.low %v2406_v52, %v15738_v7  ;;  %v16942_v12 = vld [vmem:[#allocation77_spill] sm:$0xff] }
 0x6c9   : > { %12256 = vmatprep.subr.bf16.mxu0 %v15689_v21  ;;  %v2445_v57 = vrot.slane %v2431_v29, %v16821_v41  ;;  %v16949_v29 = vld [vmem:[#allocation89_spill] sm:$0xff] }
 0x6ca   : > { %v12441_v15 = vpop.eup %12440  ;;  %v6542_v42 = vmul.f32 1.442695, %v6493_v54 }
 0x6cb   : > { %11892 = vmatprep.mubr.msk.f32.mxu1 %vm5184_vm3, %v12441_v15  ;;  %v6405_v8 = vpop.permute.xlu1 %6404  ;;  %v6710_v56 = vsel %vm5184_vm3, %v12441_v15, 0.0 }
 0x6cc   : > { %12446 = vpow2.f32 %v6542_v42  ;;  %v6494_v35 = vsub.f32 %v16938_v4, %v6405_v8  ;;  %6711 = vadd.xlane.f32.xlu1 %v6710_v56  ;;  %v16943_v42 = vld [vmem:[#allocation104_spill] sm:$0xff] }
 0x6cd   : > { %12448 = vpow2.f32 %v6548_v38  ;;  %v2314_v38 = vcombine.low %v2270_v16, %v15744_v31  ;;  %v6502_v53 = vsub.f32 %v16943_v42, %v6449_v5  ;;  %v2263_v5 = vcombine.high %v15721_v24, %v15706_v25  ;;  %v16947_v24 = vld [vmem:[#allocation107_spill] sm:$0xff] }
 0x6ce   : > { %v12443_v63 = vpop.eup %12442  ;;  %v6544_v30 = vmul.f32 1.442695, %v6494_v35  ;;  %v6564_v25 = vmul.f32 1.442695, %v6504_v60 }
 0x6cf   : > { %11893 = vmatmul.mubr.msk.f32.vlgmr.msra.gmra.mrb[62].mxu1 %vm5184_vm3, %v12443_v63  ;;  %v6409_v51 = vpop.permute.xlu1 %6408  ;;  %v6713_v9 = vsel %vm5184_vm3, %v12443_v63, 0.0  ;;  %v12263_v35 = vpack.c.bf16 %v2450_v0, %v2314_v38  ;;  %v2295_v63 = vcombine.high %v15709_v22, %v15696_v62  ;;  %v2451_v22 = vcombine.high %v2406_v52, %v15738_v7  ;;  %v16948_v0 = vld [vmem:[#allocation103_spill] sm:$0xff] }
 0x6d0   : > { %12450 = vpow2.f32 %v6544_v30  ;;  %12254 = vmatpush3.bf16.msra.mxu1 %v15647_v45  ;;  %v6495_v44 = vsub.f32 %v16940_v14, %v6409_v51  ;;  %6714 = vadd.xlane.f32.xlu0 %v6713_v9  ;;  %v6471_v30 = vpop.permute.xlu0 %6470  ;;  %v2315_v14 = vcombine.high %v2270_v16, %v15744_v31  ;;  %v2277_v7 = vrot.slane %v2263_v5, %v16821_v41 }
 0x6d1   : > { %12260 = vmatprep.subr.bf16.mxu1 %v15734_v32 }
 0x6d2   : > { %v12445_v49 = vpop.eup %12444  ;;  %v6546_v23 = vmul.f32 1.442695, %v6495_v44  ;;  %v6506_v44 = vsub.f32 %v16947_v24, %v6471_v30 }
 0x6d3   : > { %11899 = vmatprep.mubr.msk.f32.mxu0 %vm5184_vm3, %v12445_v49  ;;  %v6420_v1 = vpop.permute.xlu1 %6419  ;;  %v6716_v45 = vsel %vm5184_vm3, %v12445_v49, 0.0  ;;  %v2309_v49 = vrot.slane %v2295_v63, %v16821_v41 }
 0x6d4   : > { %12452 = vpow2.f32 %v6546_v23  ;;  %v6497_v54 = vsub.f32 %v16942_v12, %v6420_v1  ;;  %6717 = vadd.xlane.f32.xlu0 %v6716_v45  ;;  %v12267_v1 = vpack.c.bf16 %v2451_v22, %v2315_v14  ;;  %v6568_v12 = vmul.f32 1.442695, %v6506_v44 }
 0x6d5   : > { %12454 = vpow2.f32 %v6552_v2  ;;  %v2413_v2 = vrot.slane %v2399_v19, %v16821_v41 }
 0x6d6   : > { %v12447_v15 = vpop.eup %12446  ;;  %v6550_v8 = vmul.f32 1.442695, %v6497_v54  ;;  %v2316_v54 = vcombine.low %v2277_v7, %v2309_v49 }
 0x6d7   : > { %v12449_v56 = vpop.eup %12448  ;;  %11900 = vmatmul.mubr.msk.f32.vlgmr.msra.gmra.mrb[80].mxu0 %vm5184_vm3, %v12447_v15  ;;  %v6431_v4 = vpop.permute.xlu1 %6430  ;;  %v6719_v40 = vsel %vm5184_vm3, %v12447_v15, 0.0  ;;  %v2452_v45 = vcombine.low %v2413_v2, %v2445_v57 }
 0x6d8   : > { %12456 = vpow2.f32 %v6550_v8  ;;  %12258 = vmatpush3.bf16.msra.mxu0 %v15689_v21  ;;  %v6499_v39 = vsub.f32 %v16944_v55, %v6431_v4  ;;  %11913 = vmatprep.mubr.msk.f32.mxu0 %vm5184_vm3, %v12449_v56  ;;  %v6560_v21 = vmul.f32 1.442695, %v6502_v53  ;;  %v6728_v23 = vsel %vm5184_vm3, %v12449_v56, 0.0 }
 0x6d9   : > { %12264 = vmatprep.subr.bf16.mxu0 %v12263_v35  ;;  %6720 = vadd.xlane.f32.xlu1 %v6719_v40  ;;  %12458 = vpow2.f32 %v6556_v37  ;;  %v12271_v53 = vpack.c.bf16 %v2452_v45, %v2316_v54  ;;  %v2453_v8 = vcombine.high %v2413_v2, %v2445_v57  ;;  %v2317_v40 = vcombine.high %v2277_v7, %v2309_v49 }
 0x6da   : > { %v12451_v58 = vpop.eup %12450  ;;  %v6554_v47 = vmul.f32 1.442695, %v6499_v39 }
 0x6db   : > { %11906 = vmatprep.mubr.msk.f32.mxu1 %vm5184_vm3, %v12451_v58  ;;  %v6442_v51 = vpop.permute.xlu1 %6441  ;;  %v6722_v62 = vsel %vm5184_vm3, %v12451_v58, 0.0  ;;  %v12275_v18 = vpack.c.bf16 %v2453_v8, %v2317_v40  ;;  %v16950_v58 = vld [vmem:[#allocation106_spill] sm:$0xff] }
 0x6dc   : > { %12460 = vpow2.f32 %v6554_v47  ;;  %v6501_v9 = vsub.f32 %v16946_v26, %v6442_v51  ;;  %6723 = vadd.xlane.f32.xlu0 %v6722_v62 }
 0x6dd   : > { %12462 = vpow2.f32 %v6560_v21 }
 0x6de   : > { %v12453_v10 = vpop.eup %12452  ;;  %v6558_v17 = vmul.f32 1.442695, %v6501_v9 }
 0x6df   : > { %11907 = vmatmul.mubr.msk.f32.vlgmr.msra.gmra.mrb[64].mxu1 %vm5184_vm3, %v12453_v10  ;;  %v6453_v52 = vpop.permute.xlu1 %6452  ;;  %v6725_v31 = vsel %vm5184_vm3, %v12453_v10, 0.0  ;;  %v12455_v16 = vpop.eup %12454 }
 0x6e0   : > { %12464 = vpow2.f32 %v6558_v17  ;;  %12262 = vmatpush3.bf16.msra.mxu1 %v15734_v32  ;;  %v6503_v11 = vsub.f32 %v16948_v0, %v6453_v52  ;;  %6729 = vadd.xlane.f32.xlu0 %v6728_v23  ;;  %v6734_v42 = vsel %vm5184_vm3, %v12455_v16, 0.0 }
 0x6e1   : > { %12466 = vpow2.f32 %v6564_v25  ;;  %11920 = vmatprep.mubr.msk.f32.mxu1 %vm5184_vm3, %v12455_v16  ;;  %12268 = vmatprep.subr.bf16.mxu1 %v12267_v1 }
 0x6e2   : > { %v12457_v38 = vpop.eup %12456  ;;  %v6562_v15 = vmul.f32 1.442695, %v6503_v11  ;;  %6726 = vadd.xlane.f32.xlu1 %v6725_v31 }
 0x6e3   : > { %11914 = vmatmul.mubr.msk.f32.vlgmr.msra.gmra.mrb[82].mxu0 %vm5184_vm3, %v12457_v38  ;;  %v6464_v37 = vpop.permute.xlu1 %6463  ;;  %v6731_v32 = vsel %vm5184_vm3, %v12457_v38, 0.0  ;;  %v12459_v56 = vpop.eup %12458 }
 0x6e4   : > { %12468 = vpow2.f32 %v6562_v15  ;;  %12266 = vmatpush3.bf16.msra.mxu0 %v12263_v35  ;;  %v6505_v4 = vsub.f32 %v16949_v29, %v6464_v37  ;;  %6735 = vadd.xlane.f32.xlu0 %v6734_v42  ;;  %v6740_v19 = vsel %vm5184_vm3, %v12459_v56, 0.0 }
 0x6e5   : > { %12470 = vpow2.f32 %v6568_v12  ;;  %11927 = vmatprep.mubr.msk.f32.mxu0 %vm5184_vm3, %v12459_v56  ;;  %12272 = vmatprep.subr.bf16.mxu0 %v12271_v53 }
 0x6e6   : > { %v12461_v55 = vpop.eup %12460  ;;  %v6566_v39 = vmul.f32 1.442695, %v6505_v4  ;;  %6732 = vadd.xlane.f32.xlu1 %v6731_v32 }
 0x6e7   : > { %11921 = vmatmul.mubr.msk.f32.vlgmr.msra.gmra.mrb[66].mxu1 %vm5184_vm3, %v12461_v55  ;;  %v6475_v63 = vpop.permute.xlu1 %6474  ;;  %v6737_v60 = vsel %vm5184_vm3, %v12461_v55, 0.0  ;;  %v12463_v35 = vpop.eup %12462 }
 0x6e8   : > { %12472 = vpow2.f32 %v6566_v39  ;;  %12270 = vmatpush3.bf16.msra.mxu1 %v12267_v1  ;;  %v6507_v5 = vsub.f32 %v16950_v58, %v6475_v63  ;;  %6741 = vadd.xlane.f32.xlu0 %v6740_v19  ;;  %v6746_v26 = vsel %vm5184_vm3, %v12463_v35, 0.0 }
 0x6e9   : > { %11934 = vmatprep.mubr.msk.f32.mxu1 %vm5184_vm3, %v12463_v35  ;;  %12276 = vmatprep.subr.bf16.mxu1 %v12275_v18 }
 0x6ea   : > { %v12465_v21 = vpop.eup %12464  ;;  %v6570_v30 = vmul.f32 1.442695, %v6507_v5  ;;  %6738 = vadd.xlane.f32.xlu1 %v6737_v60 }
 0x6eb   : > { %v12467_v47 = vpop.eup %12466  ;;  %11928 = vmatmul.mubr.msk.f32.vlgmr.msra.gmra.mrb[84].mxu0 %vm5184_vm3, %v12465_v21  ;;  %v6743_v51 = vsel %vm5184_vm3, %v12465_v21, 0.0 }
 0x6ec   : > { %12474 = vpow2.f32 %v6570_v30  ;;  %12274 = vmatpush3.bf16.msra.mxu0 %v12271_v53  ;;  %11941 = vmatprep.mubr.msk.f32.mxu0 %vm5184_vm3, %v12467_v47  ;;  %v6752_v25 = vsel %vm5184_vm3, %v12467_v47, 0.0 }
 0x6ee   : > { %v12469_v62 = vpop.eup %12468  ;;  %6744 = vadd.xlane.f32.xlu1 %v6743_v51 }
 0x6ef   : > { %v12471_v22 = vpop.eup %12470  ;;  %11935 = vmatmul.mubr.msk.f32.vlgmr.msra.gmra.mrb[68].mxu1 %vm5184_vm3, %v12469_v62  ;;  %v6749_v57 = vsel %vm5184_vm3, %v12469_v62, 0.0 }
 0x6f0   : > { %12278 = vmatpush3.bf16.msra.mxu1 %v12275_v18  ;;  %11948 = vmatprep.mubr.msk.f32.mxu1 %vm5184_vm3, %v12471_v22  ;;  %v6758_v49 = vsel %vm5184_vm3, %v12471_v22, 0.0 }
 0x6f1   : > { %6750 = vadd.xlane.f32.xlu0 %v6749_v57 }
 0x6f2   : > { %v12473_v9 = vpop.eup %12472  ;;  %6747 = vadd.xlane.f32.xlu1 %v6746_v26 }
 0x6f3   : > { %11942 = vmatmul.mubr.msk.f32.vlgmr.msra.gmra.mrb[86].mxu0 %vm5184_vm3, %v12473_v9  ;;  %v6755_v14 = vsel %vm5184_vm3, %v12473_v9, 0.0 }
 0x6f5   : > { %6756 = vadd.xlane.f32.xlu0 %v6755_v14 }
 0x6f6   : > { %v12475_v24 = vpop.eup %12474  ;;  %6753 = vadd.xlane.f32.xlu1 %v6752_v25 }
 0x6f7   : > { %11949 = vmatmul.mubr.msk.f32.vlgmr.msra.gmra.mrb[70].mxu1 %vm5184_vm3, %v12475_v24  ;;  %v6761_v44 = vsel %vm5184_vm3, %v12475_v24, 0.0 }
 0x6f9   : > { %6762 = vadd.xlane.f32.xlu0 %v6761_v44 }
 0x6fa   : > { %6759 = vadd.xlane.f32.xlu1 %v6758_v49 }
 0x726   : > { %v6670_v10 = vpop.xlane.xlu1 %6669 }
 0x727   : > { %v6799_v29 = vrot.slane %v6670_v10, %v14701_v61 }
 0x729   : > { %v6673_v2 = vpop.xlane.xlu0 %6672 }
 0x72a   : > { %v6803_v38 = vrot.slane %v6673_v2, %v14704_v48 }
 0x72c   : > { %v6804_v19 = vsel %vm5418_vm6, %v6803_v38, %v6799_v29 }
 0x72d   : > { %v6676_v7 = vpop.xlane.xlu1 %6675 }
 0x72e   : > { %v6808_v15 = vrot.slane %v6676_v7, %v14701_v61 }
 0x731   : > { %v6679_v17 = vpop.xlane.xlu0 %6678 }
 0x732   : > { %v6812_v12 = vrot.slane %v6679_v17, %v14704_v48 }
 0x734   : > { %v6813_v4 = vsel %vm5418_vm6, %v6812_v12, %v6808_v15 }
 0x735   : > { %v6682_v23 = vpop.xlane.xlu1 %6681  ;;  %v6940_v35 = vsel %vm5555_vm7, %v6813_v4, %v6804_v19 }
 0x736   : > { %v6817_v53 = vrot.slane %v6682_v23, %v14701_v61 }
 0x739   : > { %v6685_v52 = vpop.xlane.xlu0 %6684 }
 0x73a   : > { %v6821_v54 = vrot.slane %v6685_v52, %v14704_v48 }
 0x73c   : > { %v6822_v39 = vsel %vm5418_vm6, %v6821_v54, %v6817_v53 }
 0x73d   : > { %v6688_v31 = vpop.xlane.xlu1 %6687  ;;  %v6941_v30 = vsel %vm5557_vm8, %v6822_v39, %v6940_v35 }
 0x73e   : > { %v6826_v40 = vrot.slane %v6688_v31, %v14701_v61 }
 0x741   : > { %v6691_v1 = vpop.xlane.xlu0 %6690 }
 0x742   : > { %v6830_v37 = vrot.slane %v6691_v1, %v14704_v48 }
 0x744   : > { %v6831_v18 = vsel %vm5418_vm6, %v6830_v37, %v6826_v40 }
 0x745   : > { %v6697_v16 = vpop.xlane.xlu0 %6696  ;;  %v6942_v51 = vsel %vm5559_vm9, %v6831_v18, %v6941_v30 }
 0x746   : > { %v6694_v45 = vpop.xlane.xlu1 %6693  ;;  %v6839_v32 = vrot.slane %v6697_v16, %v14704_v48 }
 0x747   : > { %v6835_v8 = vrot.slane %v6694_v45, %v14701_v61 }
 0x749   : > { %v6840_v58 = vsel %vm5418_vm6, %v6839_v32, %v6835_v8 }
 0x74a   : > { %v6700_v11 = vpop.xlane.xlu1 %6699  ;;  %v6943_v57 = vsel %vm5561_vm10, %v6840_v58, %v6942_v51 }
 0x74b   : > { %v6844_v60 = vrot.slane %v6700_v11, %v14701_v61 }
 0x74d   : > { %v6703_v0 = vpop.xlane.xlu0 %6702 }
 0x74e   : > { %v6848_v55 = vrot.slane %v6703_v0, %v14704_v48 }
 0x750   : > { %v6849_v47 = vsel %vm5418_vm6, %v6848_v55, %v6844_v60 }
 0x751   : > { %v6706_v56 = vpop.xlane.xlu1 %6705  ;;  %v6944_v14 = vsel %vm5563_vm11, %v6849_v47, %v6943_v57 }
 0x752   : > { %v6853_v5 = vrot.slane %v6706_v56, %v14701_v61 }
 0x755   : > { %v6709_v42 = vpop.xlane.xlu0 %6708 }
 0x756   : > { %v6857_v63 = vrot.slane %v6709_v42, %v14704_v48 }
 0x758   : > { %v6858_v62 = vsel %vm5418_vm6, %v6857_v63, %v6853_v5 }
 0x759   : > { %v6712_v21 = vpop.xlane.xlu1 %6711  ;;  %v6945_v24 = vsel %vm5565_vm12, %v6858_v62, %v6944_v14 }
 0x75a   : > { %v6862_v26 = vrot.slane %v6712_v21, %v14701_v61 }
 0x75d   : > { %v6715_v22 = vpop.xlane.xlu0 %6714 }
 0x75e   : > { %v6866_v9 = vrot.slane %v6715_v22, %v14704_v48 }
 0x760   : > { %v6867_v25 = vsel %vm5418_vm6, %v6866_v9, %v6862_v26 }
 0x761   : > { %v6946_v44 = vsel %vm5567_vm13, %v6867_v25, %v6945_v24  ;;  %v6718_v49 = vpop.xlane.xlu0 %6717 }
 0x762   : > { %6956 = vxpose.xlu1.b32.start [1/2] (short) (narrow) %v6946_v44, 16  ;;  %v6871_v15 = vrot.slane %v6718_v49, %v14701_v61 }
 0x766   : > { %v6721_v10 = vpop.xlane.xlu1 %6720 }
 0x767   : > { %v6875_v37 = vrot.slane %v6721_v10, %v14704_v48 }
 0x769   : > { %v6724_v2 = vpop.xlane.xlu0 %6723  ;;  %v6876_v5 = vsel %vm5418_vm6, %v6875_v37, %v6871_v15 }
 0x76a   : > { %v6880_v42 = vrot.slane %v6724_v2, %v14701_v61 }
 0x76d   : > { %v6730_v17 = vpop.xlane.xlu0 %6729 }
 0x76e   : > { %v11845_v7 = vpop.f32.mrb[72].mxu0  ;;  %v6889_v56 = vrot.slane %v6730_v17, %v14701_v61 }
 0x76f   : > { %v6727_v52 = vpop.xlane.xlu1 %6726  ;;  %v8726_v23 = vpop.f32.mrb[73].mxu0 }
 0x770   : > { %v6884_v54 = vrot.slane %v6727_v52, %v14704_v48 }
 0x771   : > { %v6736_v31 = vpop.xlane.xlu0 %6735 }
 0x772   : > { %v6885_v63 = vsel %vm5418_vm6, %v6884_v54, %v6880_v42  ;;  %v6898_v19 = vrot.slane %v6736_v31, %v14701_v61 }
 0x773   : > { %v6733_v1 = vpop.xlane.xlu1 %6732  ;;  %v6947_v62 = vsel %vm5555_vm7, %v6885_v63, %v6876_v5 }
 0x774   : > { %v6893_v38 = vrot.slane %v6733_v1, %v14704_v48 }
 0x775   : > { %v6742_v11 = vpop.xlane.xlu0 %6741 }
 0x776   : > { %v11852_v45 = vpop.f32.mrb[56].mxu1  ;;  %v6894_v35 = vsel %vm5418_vm6, %v6893_v38, %v6889_v56  ;;  %v6907_v58 = vrot.slane %v6742_v11, %v14701_v61 }
 0x777   : > { %v6739_v16 = vpop.xlane.xlu1 %6738  ;;  %v8807_v0 = vpop.f32.mrb[57].mxu1  ;;  %v6948_v9 = vsel %vm5557_vm8, %v6894_v35, %v6947_v62 }
 0x778   : > { %v6902_v53 = vrot.slane %v6739_v16, %v14704_v48 }
 0x77a   : > { %v6903_v21 = vsel %vm5418_vm6, %v6902_v53, %v6898_v19 }
 0x77b   : > { %v6745_v12 = vpop.xlane.xlu1 %6744  ;;  %v6949_v25 = vsel %vm5559_vm9, %v6903_v21, %v6948_v9 }
 0x77c   : > { %v6911_v29 = vrot.slane %v6745_v12, %v14704_v48 }
 0x77e   : > { %v6751_v32 = vpop.xlane.xlu0 %6750  ;;  %v11859_v8 = vpop.f32.mrb[74].mxu0  ;;  %v6912_v22 = vsel %vm5418_vm6, %v6911_v29, %v6907_v58 }
 0x77f   : > { %v6748_v4 = vpop.xlane.xlu1 %6747  ;;  %v10222_v40 = vcombine.low %v11845_v7, %v11859_v8  ;;  %v10223_v55 = vcombine.high %v11845_v7, %v11859_v8  ;;  %v8888_v39 = vpop.f32.mrb[75].mxu0  ;;  %v6920_v30 = vrot.slane %v6751_v32, %v14704_v48  ;;  %v6950_v24 = vsel %vm5561_vm10, %v6912_v22, %v6949_v25 }
 0x780   : > { %v9950_v18 = vcombine.low %v8726_v23, %v8888_v39  ;;  %v9951_v60 = vcombine.high %v8726_v23, %v8888_v39  ;;  %v6916_v47 = vrot.slane %v6748_v4, %v14701_v61 }
 0x781   : > { %v10230_v49 = vrot.slane %v10222_v40, %v16898_v6  ;;  %v10237_v2 = vrot.slane %v10223_v55, %v16898_v6 }
 0x782   : > { %v6757_v51 = vpop.xlane.xlu0 %6756  ;;  %v6921_v44 = vsel %vm5418_vm6, %v6920_v30, %v6916_v47  ;;  %v9958_v11 = vrot.slane %v9950_v18, %v16898_v6  ;;  %v9965_v37 = vrot.slane %v9951_v60, %v16898_v6 }
 0x783   : > { %v6929_v57 = vrot.slane %v6757_v51, %v14704_v48  ;;  %v6754_v26 = vpop.xlane.xlu1 %6753  ;;  %v6951_v15 = vsel %vm5563_vm11, %v6921_v44, %v6950_v24 }
 0x784   : > { %v6925_v14 = vrot.slane %v6754_v26, %v14701_v61 }
 0x786   : > { %v6763_v10 = vpop.xlane.xlu0 %6762  ;;  %v11866_v17 = vpop.f32.mrb[58].mxu1  ;;  %v6930_v7 = vsel %vm5418_vm6, %v6929_v57, %v6925_v14 }
 0x787   : > { %v6938_v52 = vrot.slane %v6763_v10, %v14704_v48  ;;  %v6760_v23 = vpop.xlane.xlu1 %6759  ;;  %v10238_v1 = vcombine.low %v11852_v45, %v11866_v17  ;;  %v10239_v31 = vcombine.high %v11852_v45, %v11866_v17  ;;  %v8969_v16 = vpop.f32.mrb[59].mxu1  ;;  %v6952_v48 = vsel %vm5565_vm12, %v6930_v7, %v6951_v15 }
 0x788   : > { %v6934_v12 = vrot.slane %v6760_v23, %v14701_v61  ;;  %v9966_v54 = vcombine.low %v8807_v0, %v8969_v16  ;;  %v9967_v38 = vcombine.high %v8807_v0, %v8969_v16 }
 0x789   : > { %v10246_v42 = vrot.slane %v10238_v1, %v16898_v6  ;;  %v10253_v53 = vrot.slane %v10239_v31, %v16898_v6 }
 0x78a   : > { %v6939_v32 = vsel %vm5418_vm6, %v6938_v52, %v6934_v12  ;;  %v9974_v45 = vrot.slane %v9966_v54, %v16898_v6  ;;  %v9981_v8 = vrot.slane %v9967_v38, %v16898_v6 }
 0x78b   : > { %v10286_v56 = vcombine.low %v10230_v49, %v10246_v42  ;;  %v10287_v61 = vcombine.high %v10230_v49, %v10246_v42  ;;  %v10302_v29 = vcombine.low %v10237_v2, %v10253_v53  ;;  %v10303_v0 = vcombine.high %v10237_v2, %v10253_v53  ;;  %v11873_v4 = vpop.f32.mrb[76].mxu0 }
 0x78c   : > { %v10014_v40 = vcombine.low %v9958_v11, %v9974_v45  ;;  %v10015_v55 = vcombine.high %v9958_v11, %v9974_v45  ;;  %v10030_v39 = vcombine.low %v9965_v37, %v9981_v8  ;;  %v10031_v63 = vcombine.high %v9965_v37, %v9981_v8  ;;  %v9050_v19 = vpop.f32.mrb[77].mxu0 }
 0x78d   : > { %v6953_v18 = vsel %vm5567_vm13, %v6939_v32, %v6952_v48  ;;  %v10294_v57 = vrot.slane %v10286_v56, %v16821_v41  ;;  %v10301_v26 = vrot.slane %v10287_v61, %v16821_v41  ;;  %v15882_v9 = vrot.slane %v10302_v29, %v16821_v41 }
 0x78e   : > { %6957 = vxpose.xlu1.b32.end [2/2] (short) (narrow) %v6953_v18, 16  ;;  %v10022_v22 = vrot.slane %v10014_v40, %v16821_v41  ;;  %v10029_v44 = vrot.slane %v10015_v55, %v16821_v41  ;;  %v10038_v49 = vrot.slane %v10030_v39, %v16821_v41  ;;  %v10045_v17 = vrot.slane %v10031_v63, %v16821_v41 }
 0x78f   : > { %v10317_v7 = vrot.slane %v10303_v0, %v16821_v41 }
 0x792   : > { %v11880_v60 = vpop.f32.mrb[60].mxu1 }
 0x793   : > { %v9131_v35 = vpop.f32.mrb[61].mxu1 }
 0x79a   : > { %v11887_v58 = vpop.f32.mrb[78].mxu0 }
 0x79b   : > { %v10254_v5 = vcombine.low %v11873_v4, %v11887_v58  ;;  %v10255_v21 = vcombine.high %v11873_v4, %v11887_v58  ;;  %v9212_v30 = vpop.f32.mrb[79].mxu0 }
 0x79c   : > { %v9982_v47 = vcombine.low %v9050_v19, %v9212_v30  ;;  %v9983_v51 = vcombine.high %v9050_v19, %v9212_v30 }
 0x79d   : > { %v10262_v52 = vrot.slane %v10254_v5, %v16898_v6  ;;  %v10269_v23 = vrot.slane %v10255_v21, %v16898_v6 }
 0x79e   : > { %v9990_v16 = vrot.slane %v9982_v47, %v16898_v6  ;;  %v9997_v11 = vrot.slane %v9983_v51, %v16898_v6 }
 0x7a2   : > { %v11894_v62 = vpop.f32.mrb[62].mxu1 }
 0x7a3   : > { %v10270_v14 = vcombine.low %v11880_v60, %v11894_v62  ;;  %v10271_v25 = vcombine.high %v11880_v60, %v11894_v62  ;;  %v9293_v24 = vpop.f32.mrb[63].mxu1 }
 0x7a4   : > { %v9998_v2 = vcombine.low %v9131_v35, %v9293_v24  ;;  %v9999_v10 = vcombine.high %v9131_v35, %v9293_v24 }
 0x7a5   : > { %v10278_v1 = vrot.slane %v10270_v14, %v16898_v6  ;;  %v10285_v31 = vrot.slane %v10271_v25, %v16898_v6 }
 0x7a6   : > { %v10006_v12 = vrot.slane %v9998_v2, %v16898_v6  ;;  %v10013_v54 = vrot.slane %v9999_v10, %v16898_v6 }
 0x7a7   : > { %v10318_v38 = vcombine.low %v10262_v52, %v10278_v1  ;;  %v10319_v15 = vcombine.high %v10262_v52, %v10278_v1  ;;  %v10334_v37 = vcombine.low %v10269_v23, %v10285_v31  ;;  %v10335_v42 = vcombine.high %v10269_v23, %v10285_v31  ;;  %v16951_v52 = vld [vmem:[#allocation26_spill] sm:$0xff]  ;;  %v16952_v23 = vld [vmem:[#allocation117_spill] sm:$0xff]  ;;  %v16954_v31 = vld [vmem:[#allocation124_spill] sm:$0xff] }
 0x7a8   : > { %v10046_v53 = vcombine.low %v9990_v16, %v10006_v12  ;;  %v10047_v48 = vcombine.high %v9990_v16, %v10006_v12  ;;  %v10062_v32 = vcombine.low %v9997_v11, %v10013_v54  ;;  %v10063_v45 = vcombine.high %v9997_v11, %v10013_v54  ;;  %v16953_v1 = vld [vmem:[#allocation121_spill] sm:$0xff] }
 0x7a9   : > { %v10326_v8 = vrot.slane %v10318_v38, %v16821_v41  ;;  %v10333_v56 = vrot.slane %v10319_v15, %v16821_v41  ;;  %v10342_v61 = vrot.slane %v10334_v37, %v16821_v41  ;;  %v10349_v29 = vrot.slane %v10335_v42, %v16821_v41 }
 0x7aa   : > { %v11901_v0 = vpop.f32.mrb[80].mxu0  ;;  %v10054_v4 = vrot.slane %v10046_v53, %v16821_v41  ;;  %v10061_v40 = vrot.slane %v10047_v48, %v16821_v41  ;;  %v10070_v55 = vrot.slane %v10062_v32, %v16821_v41  ;;  %v10077_v39 = vrot.slane %v10063_v45, %v16821_v41 }
 0x7ab   : > { %v9374_v63 = vpop.f32.mrb[81].mxu0  ;;  %v10350_v19 = vcombine.low %v10294_v57, %v10326_v8  ;;  %v10351_v18 = vcombine.high %v10294_v57, %v10326_v8  ;;  %v10352_v60 = vcombine.low %v10301_v26, %v10333_v56  ;;  %v10353_v35 = vcombine.high %v10301_v26, %v10333_v56 }
 0x7ac   : > { %v10078_v58 = vcombine.low %v10022_v22, %v10054_v4  ;;  %v10079_v5 = vcombine.high %v10022_v22, %v10054_v4  ;;  %v10080_v21 = vcombine.low %v10029_v44, %v10061_v40  ;;  %v10081_v30 = vcombine.high %v10029_v44, %v10061_v40 }
 0x7ad   : > { %v10082_v47 = vcombine.low %v10038_v49, %v10070_v55  ;;  %v10083_v51 = vcombine.high %v10038_v49, %v10070_v55  ;;  %v10084_v62 = vcombine.low %v10045_v17, %v10077_v39  ;;  %v10085_v14 = vcombine.high %v10045_v17, %v10077_v39 }
 0x7ae   : > { %v15905_v25 = vadd.f32 %v10078_v58, %v15304_v46  ;;  %v15908_v24 = vadd.f32 %v10079_v5, %v15319_v27  ;;  %v15911_v2 = vadd.f32 %v10080_v21, %v15334_v28  ;;  %v15914_v57 = vadd.f32 %v10081_v30, %v15344_v36 }
 0x7af   : > { %v15917_v22 = vadd.f32 %v10082_v47, %v15349_v33  ;;  %v15920_v26 = vadd.f32 %v10083_v51, %v15358_v43  ;;  %v15923_v44 = vadd.f32 %v10084_v62, %v15367_v20  ;;  %v15926_v46 = vadd.f32 %v10085_v14, %v15377_v34 }
 0x7b0   : > { %v15929_v27 = vadd.f32 %v10350_v19, %v15393_v50  ;;  %v15932_v28 = vadd.f32 %v10351_v18, %v15399_v3  ;;  %v15935_v36 = vadd.f32 %v10352_v60, %v15407_v13  ;;  %v15938_v33 = vadd.f32 %v10353_v35, %v15416_v59 }
 0x7b1   : > { %v10354_v43 = vcombine.low %v15882_v9, %v10342_v61  ;;  %v10355_v20 = vcombine.high %v15882_v9, %v10342_v61  ;;  %v10356_v49 = vcombine.low %v10317_v7, %v10349_v29  ;;  %v10357_v10 = vcombine.high %v10317_v7, %v10349_v29 }
 0x7b2   : > { %v11908_v34 = vpop.f32.mrb[64].mxu1 }
 0x7b3   : > { %v9455_v17 = vpop.f32.mrb[65].mxu1  ;;  %v15943_v50 = vadd.f32 %v10354_v43, %v16951_v52  ;;  %v15946_v3 = vadd.f32 %v10355_v20, %v16952_v23  ;;  %v15949_v13 = vadd.f32 %v10356_v49, %v16953_v1  ;;  %v15952_v59 = vadd.f32 %v10357_v10, %v16954_v31 }
 0x7b5   : > { %16955 = vst [vmem:[#allocation85_spill] sm:$0xff] %v15952_v59  ;;  %v17010_v59 = vld [vmem:[#allocation131_spill] sm:$0xff] }
 0x7b6   : > { %v11915_v16 = vpop.f32.mrb[82].mxu0 }
 0x7b7   : > { %v10358_v11 = vcombine.low %v11901_v0, %v11915_v16  ;;  %v10359_v12 = vcombine.high %v11901_v0, %v11915_v16  ;;  %v9536_v9 = vpop.f32.mrb[83].mxu0 }
 0x7b8   : > { %v10086_v54 = vcombine.low %v9374_v63, %v9536_v9  ;;  %v10087_v7 = vcombine.high %v9374_v63, %v9536_v9 }
 0x7b9   : > { %v10366_v32 = vrot.slane %v10358_v11, %v16898_v6  ;;  %v10373_v45 = vrot.slane %v10359_v12, %v16898_v6 }
 0x7ba   : > { %v11922_v38 = vpop.f32.mrb[66].mxu1  ;;  %v10094_v61 = vrot.slane %v10086_v54, %v16898_v6  ;;  %v10101_v29 = vrot.slane %v10087_v7, %v16898_v6 }
 0x7bb   : > { %v10374_v15 = vcombine.low %v11908_v34, %v11922_v38  ;;  %v10375_v37 = vcombine.high %v11908_v34, %v11922_v38  ;;  %v9617_v42 = vpop.f32.mrb[67].mxu1 }
 0x7bc   : > { %v10102_v53 = vcombine.low %v9455_v17, %v9617_v42  ;;  %v10103_v48 = vcombine.high %v9455_v17, %v9617_v42 }
 0x7bd   : > { %v10382_v8 = vrot.slane %v10374_v15, %v16898_v6  ;;  %v10389_v56 = vrot.slane %v10375_v37, %v16898_v6 }
 0x7be   : > { %v10110_v0 = vrot.slane %v10102_v53, %v16898_v6  ;;  %v10117_v4 = vrot.slane %v10103_v48, %v16898_v6  ;;  %v11929_v40 = vpop.f32.mrb[84].mxu0 }
 0x7bf   : > { %v10422_v55 = vcombine.low %v10366_v32, %v10382_v8  ;;  %v10423_v39 = vcombine.high %v10366_v32, %v10382_v8  ;;  %v10438_v63 = vcombine.low %v10373_v45, %v10389_v56  ;;  %v10439_v19 = vcombine.high %v10373_v45, %v10389_v56  ;;  %v9698_v18 = vpop.f32.mrb[85].mxu0 }
 0x7c0   : > { %v10150_v60 = vcombine.low %v10094_v61, %v10110_v0  ;;  %v10151_v35 = vcombine.high %v10094_v61, %v10110_v0  ;;  %v10166_v58 = vcombine.low %v10101_v29, %v10117_v4  ;;  %v10167_v5 = vcombine.high %v10101_v29, %v10117_v4 }
 0x7c1   : > { %v10430_v10 = vrot.slane %v10422_v55, %v16821_v41  ;;  %v10437_v34 = vrot.slane %v10423_v39, %v16821_v41  ;;  %v15965_v17 = vrot.slane %v10438_v63, %v16821_v41  ;;  %v15968_v52 = vrot.slane %v10439_v19, %v16821_v41 }
 0x7c2   : > { %v11936_v21 = vpop.f32.mrb[68].mxu1  ;;  %v10158_v16 = vrot.slane %v10150_v60, %v16821_v41  ;;  %v10165_v11 = vrot.slane %v10151_v35, %v16821_v41  ;;  %v10174_v54 = vrot.slane %v10166_v58, %v16821_v41  ;;  %v10181_v7 = vrot.slane %v10167_v5, %v16821_v41 }
 0x7c3   : > { %v9779_v30 = vpop.f32.mrb[69].mxu1 }
 0x7c6   : > { %v11943_v47 = vpop.f32.mrb[86].mxu0 }
 0x7c7   : > { %v10390_v51 = vcombine.low %v11929_v40, %v11943_v47  ;;  %v10391_v62 = vcombine.high %v11929_v40, %v11943_v47  ;;  %v9860_v14 = vpop.f32.mrb[87].mxu0 }
 0x7c8   : > { %v10118_v43 = vcombine.low %v9698_v18, %v9860_v14  ;;  %v10119_v20 = vcombine.high %v9698_v18, %v9860_v14 }
 0x7c9   : > { %v10398_v38 = vrot.slane %v10390_v51, %v16898_v6  ;;  %v10405_v15 = vrot.slane %v10391_v62, %v16898_v6 }
 0x7ca   : > { %v11950_v49 = vpop.f32.mrb[70].mxu1  ;;  %v10126_v53 = vrot.slane %v10118_v43, %v16898_v6  ;;  %v10133_v48 = vrot.slane %v10119_v20, %v16898_v6 }
 0x7cb   : > { %v10406_v23 = vcombine.low %v11936_v21, %v11950_v49  ;;  %v10407_v1 = vcombine.high %v11936_v21, %v11950_v49  ;;  %v9941_v31 = vpop.f32.mrb[71].mxu1 }
 0x7cc   : > { %v10134_v12 = vcombine.low %v9779_v30, %v9941_v31  ;;  %v10135_v9 = vcombine.high %v9779_v30, %v9941_v31  ;;  %v16956_v31 = vld [vmem:[#allocation51_spill] sm:$0xff] }
 0x7cd   : > { %v10414_v37 = vrot.slane %v10406_v23, %v16898_v6  ;;  %v10421_v42 = vrot.slane %v10407_v1, %v16898_v6 }
 0x7ce   : > { %v10142_v32 = vrot.slane %v10134_v12, %v16898_v6  ;;  %v10149_v45 = vrot.slane %v10135_v9, %v16898_v6  ;;  %v16957_v9 = vld [vmem:[#allocation45_spill] sm:$0xff] }
 0x7cf   : > { %v10454_v8 = vcombine.low %v10398_v38, %v10414_v37  ;;  %v10455_v56 = vcombine.high %v10398_v38, %v10414_v37  ;;  %v10470_v61 = vcombine.low %v10405_v15, %v10421_v42  ;;  %v10471_v29 = vcombine.high %v10405_v15, %v10421_v42  ;;  %v16958_v15 = vld [vmem:[#allocation41_spill] sm:$0xff] }
 0x7d0   : > { %v10182_v0 = vcombine.low %v10126_v53, %v10142_v32  ;;  %v10183_v4 = vcombine.high %v10126_v53, %v10142_v32  ;;  %v10198_v40 = vcombine.low %v10133_v48, %v10149_v45  ;;  %v10199_v55 = vcombine.high %v10133_v48, %v10149_v45  ;;  %v16963_v53 = vld [vmem:[#allocation55_spill] sm:$0xff] }
 0x7d1   : > { %v10462_v39 = vrot.slane %v10454_v8, %v16821_v41  ;;  %v10469_v63 = vrot.slane %v10455_v56, %v16821_v41  ;;  %v10478_v19 = vrot.slane %v10470_v61, %v16821_v41  ;;  %v10485_v18 = vrot.slane %v10471_v29, %v16821_v41  ;;  %v16964_v32 = vld [vmem:[#allocation31_spill] sm:$0xff]  ;;  %v16965_v8 = vld [vmem:[#allocation101_spill] sm:$0xff]  ;;  %v16966_v61 = vld [vmem:[#allocation54_spill] sm:$0xff] }
 0x7d2   : > { %v10190_v60 = vrot.slane %v10182_v0, %v16821_v41  ;;  %v10197_v6 = vrot.slane %v10183_v4, %v16821_v41  ;;  %v10206_v35 = vrot.slane %v10198_v40, %v16821_v41  ;;  %v10213_v58 = vrot.slane %v10199_v55, %v16821_v41  ;;  %v16967_v0 = vld [vmem:[#allocation17_spill] sm:$0xff] }
 0x7d3   : > { %v10486_v5 = vcombine.low %v10430_v10, %v10462_v39  ;;  %v10487_v21 = vcombine.high %v10430_v10, %v10462_v39  ;;  %v10488_v30 = vcombine.low %v10437_v34, %v10469_v63  ;;  %v10489_v47 = vcombine.high %v10437_v34, %v10469_v63  ;;  %v16959_v10 = vld [vmem:[#allocation53_spill] sm:$0xff]  ;;  %v16960_v34 = vld [vmem:[#allocation36_spill] sm:$0xff] }
 0x7d4   : > { %v10214_v51 = vcombine.low %v10158_v16, %v10190_v60  ;;  %v10215_v62 = vcombine.high %v10158_v16, %v10190_v60  ;;  %v10216_v14 = vcombine.low %v10165_v11, %v10197_v6  ;;  %v10217_v43 = vcombine.high %v10165_v11, %v10197_v6  ;;  %v16961_v11 = vld [vmem:[#allocation32_spill] sm:$0xff]  ;;  %v16968_v60 = vld [vmem:[#allocation42_spill] sm:$0xff] }
 0x7d5   : > { %v10218_v20 = vcombine.low %v10174_v54, %v10206_v35  ;;  %v10219_v49 = vcombine.high %v10174_v54, %v10206_v35  ;;  %v10220_v23 = vcombine.low %v10181_v7, %v10213_v58  ;;  %v10221_v1 = vcombine.high %v10181_v7, %v10213_v58  ;;  %v16962_v54 = vld [vmem:[#allocation13_spill] sm:$0xff]  ;;  %v16969_v35 = vld [vmem:[#allocation40_spill] sm:$0xff] }
 0x7d6   : > { %v15991_v12 = vadd.f32 %v16956_v31, %v10214_v51  ;;  %v15994_v38 = vadd.f32 %v16957_v9, %v10215_v62  ;;  %v15997_v41 = vadd.f32 %v16958_v15, %v10216_v14  ;;  %v16000_v37 = vadd.f32 %v16959_v10, %v10217_v43  ;;  %v16974_v62 = vld [vmem:[#allocation109_spill] sm:$0xff]  ;;  %v16979_v10 = vld [vmem:[#allocation114_spill] sm:$0xff] }
 0x7d7   : > { %v16003_v16 = vadd.f32 %v16960_v34, %v10218_v20  ;;  %v16006_v42 = vadd.f32 %v16961_v11, %v10219_v49  ;;  %v16009_v7 = vadd.f32 %v16962_v54, %v10220_v23  ;;  %v16012_v48 = vadd.f32 %v16963_v53, %v10221_v1  ;;  %v16977_v20 = vld [vmem:[#allocation112_spill] sm:$0xff]  ;;  %v16978_v1 = vld [vmem:[#allocation113_spill] sm:$0xff]  ;;  %v16980_v11 = vld [vmem:[#allocation115_spill] sm:$0xff] }
 0x7d8   : > { %v16015_v45 = vadd.f32 %v16964_v32, %v10486_v5  ;;  %v16018_v56 = vadd.f32 %v16965_v8, %v10487_v21  ;;  %v16021_v29 = vadd.f32 %v16966_v61, %v10488_v30  ;;  %v16024_v4 = vadd.f32 %v16967_v0, %v10489_v47  ;;  %v16970_v5 = vld [vmem:[#allocation118_spill] sm:$0xff]  ;;  %v16981_v32 = vld [vmem:[#allocation116_spill] sm:$0xff] }
 0x7d9   : > { %v10490_v40 = vcombine.low %v15965_v17, %v10478_v19  ;;  %v10491_v55 = vcombine.high %v15965_v17, %v10478_v19  ;;  %v10492_v39 = vcombine.low %v15968_v52, %v10485_v18  ;;  %v10493_v63 = vcombine.high %v15968_v52, %v10485_v18  ;;  %v16972_v30 = vld [vmem:[#allocation122_spill] sm:$0xff]  ;;  %v16976_v18 = vld [vmem:[#allocation111_spill] sm:$0xff] }
 0x7da   : > { %v16975_v17 = vld [vmem:[#allocation110_spill] sm:$0xff] }
 0x7db   : > { %v16031_v6 = vadd.f32 %v16968_v60, %v10490_v40  ;;  %v16034_v58 = vadd.f32 %v16969_v35, %v10491_v55  ;;  %v16037_v21 = vadd.f32 %v16970_v5, %v10492_v39  ;;  %v16040_v47 = vadd.f32 %v16972_v30, %v10493_v63  ;;  %v16982_v63 = vld [vmem:[#allocation34_spill] sm:$0xff]  ;;  %v16983_v5 = vld [vmem:[#allocation52_spill] sm:$0xff] }
 0x7dd   : > { %16971 = vst [vmem:[#allocation75_spill] sm:$0xff] %v16037_v21  ;;  %16973 = vst [vmem:[#allocation98_spill] sm:$0xff] %v16040_v47 }
 0x80a   : > { %v6972_v51 = vpop.trf.xlu1 }
 0x80b   : > { %v7037_v14 = vrot.slane %v6972_v51, %v16974_v62  ;;  %v6993_v19 = vrot.slane %v6972_v51, %v16975_v17  ;;  %v7004_v23 = vrot.slane %v6972_v51, %v16976_v18  ;;  %v7015_v15 = vrot.slane %v6972_v51, %v16977_v20 }
 0x80c   : > { %v7026_v53 = vrot.slane %v6972_v51, %v16978_v1  ;;  %v7048_v61 = vrot.slane %v6972_v51, %v16979_v10  ;;  %v7059_v0 = vrot.slane %v6972_v51, %v16980_v11  ;;  %v7070_v40 = vrot.slane %v6972_v51, %v16981_v32 }
 0x80d   : > { %7043 = vbcast.lane.b32.xlu1 %v7037_v14, 264  ;;  %6995 = vbcast.lane.b32.xlu0 %v6993_v19, 256 }
 0x80e   : > { %v6973_v52 = vpop.trf.xlu1 }
 0x80f   : > { %v7092_v43 = vrot.slane %v6973_v52, %v16976_v18  ;;  %v7103_v49 = vrot.slane %v6973_v52, %v16977_v20  ;;  %v7114_v31 = vrot.slane %v6973_v52, %v16978_v1  ;;  %v7125_v9 = vrot.slane %v6973_v52, %v16974_v62  ;;  %v16984_v62 = vld [vmem:[#allocation12_spill] sm:$0xff] }
 0x810   : > { %v7136_v34 = vrot.slane %v6973_v52, %v16979_v10  ;;  %v7147_v54 = vrot.slane %v6973_v52, %v16980_v11  ;;  %v7158_v8 = vrot.slane %v6973_v52, %v16981_v32  ;;  %v7081_v55 = vrot.slane %v6973_v52, %v16975_v17  ;;  %v16985_v52 = vld [vmem:[#allocation43_spill] sm:$0xff] }
 0x811   : > { %6999 = vbcast.lane.b32.xlu0 %v6993_v19, 264  ;;  %7094 = vbcast.lane.b32.xlu1 %v7092_v43, 256  ;;  %v16062_v1 = vstv %s264_s9 }
 0x815   : > { %7006 = vbcast.lane.b32.xlu0 %v7004_v23, 256  ;;  %7105 = vbcast.lane.b32.xlu1 %v7103_v49, 256 }
 0x819   : > { %7010 = vbcast.lane.b32.xlu0 %v7004_v23, 264  ;;  %7116 = vbcast.lane.b32.xlu1 %v7114_v31, 256 }
 0x81d   : > { %7017 = vbcast.lane.b32.xlu0 %v7015_v15, 256  ;;  %7127 = vbcast.lane.b32.xlu1 %v7125_v9, 256 }
 0x821   : > { %7021 = vbcast.lane.b32.xlu0 %v7015_v15, 264  ;;  %7138 = vbcast.lane.b32.xlu1 %v7136_v34, 256 }
 0x825   : > { %7028 = vbcast.lane.b32.xlu0 %v7026_v53, 256  ;;  %7149 = vbcast.lane.b32.xlu1 %v7147_v54, 256 }
 0x829   : > { %7032 = vbcast.lane.b32.xlu0 %v7026_v53, 264  ;;  %7160 = vbcast.lane.b32.xlu1 %v7158_v8, 256 }
 0x82d   : > { %7039 = vbcast.lane.b32.xlu0 %v7037_v14, 256 }
 0x831   : > { %7050 = vbcast.lane.b32.xlu0 %v7048_v61, 256 }
 0x835   : > { %7054 = vbcast.lane.b32.xlu0 %v7048_v61, 264 }
 0x839   : > { %7061 = vbcast.lane.b32.xlu0 %v7059_v0, 256 }
 0x83d   : > { %7065 = vbcast.lane.b32.xlu0 %v7059_v0, 264  ;;  %v16988_v0 = vld [vmem:[#allocation23_spill] sm:$0xff] }
 0x841   : > { %7072 = vbcast.lane.b32.xlu0 %v7070_v40, 256 }
 0x845   : > { %7076 = vbcast.lane.b32.xlu0 %v7070_v40, 264 }
 0x849   : > { %7083 = vbcast.lane.b32.xlu0 %v7081_v55, 256 }
 0x84d   : > { %7087 = vbcast.lane.b32.xlu0 %v7081_v55, 264 }
 0x851   : > { %7098 = vbcast.lane.b32.xlu0 %v7092_v43, 264 }
 0x855   : > { %7109 = vbcast.lane.b32.xlu0 %v7103_v49, 264 }
 0x859   : > { %7120 = vbcast.lane.b32.xlu0 %v7114_v31, 264  ;;  %v16986_v31 = vld [vmem:[#allocation38_spill] sm:$0xff] }
 0x85d   : > { %7131 = vbcast.lane.b32.xlu0 %v7125_v9, 264 }
 0x861   : > { %7142 = vbcast.lane.b32.xlu0 %v7136_v34, 264 }
 0x865   : > { %7153 = vbcast.lane.b32.xlu0 %v7147_v54, 264 }
 0x869   : > { %7164 = vbcast.lane.b32.xlu0 %v7158_v8, 264  ;;  %v16987_v8 = vld [vmem:[#allocation95_spill] sm:$0xff] }
 0x87f   : > { %v6996_v39 = vpop.permute.xlu0 %6995  ;;  %v7044_v34 = vpop.permute.xlu1 %7043 }
 0x880   : > { %v7198_v60 = vadd.f32 %v6996_v39, %v16982_v63  ;;  %v7207_v40 = vadd.f32 %v7044_v34, %v16988_v0 }
 0x882   : > { %12476 = vrcp.f32 %v7198_v60 }
 0x883   : > { %v7000_v35 = vpop.permute.xlu0 %6999 }
 0x884   : > { %v7199_v30 = vadd.f32 %v7000_v35, %v16983_v5 }
 0x886   : > { %12478 = vrcp.f32 %v7199_v30 }
 0x887   : > { %v7007_v51 = vpop.permute.xlu0 %7006 }
 0x888   : > { %v7200_v14 = vadd.f32 %v7007_v51, %v16984_v62 }
 0x88a   : > { %12480 = vrcp.f32 %v7200_v14 }
 0x88b   : > { %v7011_v17 = vpop.permute.xlu0 %7010 }
 0x88c   : > { %v12477_v19 = vpop.eup %12476  ;;  %v7201_v18 = vadd.f32 %v7011_v17, %v16985_v52 }
 0x88d   : > { %v7262_v43 = vmul.f32 %v12477_v19, %v7198_v60 }
 0x88e   : > { %12482 = vrcp.f32 %v7201_v18 }
 0x88f   : > { %v7294_v20 = vsub.f32 2.0, %v7262_v43  ;;  %v7018_v49 = vpop.permute.xlu0 %7017 }
 0x890   : > { %v12479_v23 = vpop.eup %12478  ;;  %v7202_v9 = vadd.f32 %v7018_v49, %v16986_v31 }
 0x891   : > { %v7326_v15 = vmul.f32 %v12477_v19, %v7294_v20  ;;  %v7263_v10 = vmul.f32 %v12479_v23, %v7199_v30  ;;  %v16989_v30 = vld [vmem:[#allocation37_spill] sm:$0xff] }
 0x892   : > { %12484 = vrcp.f32 %v7202_v9 }
 0x893   : > { %v10495_v11 = vmul.f32 %v16062_v1, %v7326_v15  ;;  %v7295_v54 = vsub.f32 2.0, %v7263_v10  ;;  %v7022_v53 = vpop.permute.xlu0 %7021 }
 0x894   : > { %v12481_v32 = vpop.eup %12480  ;;  %v7203_v61 = vadd.f32 %v7022_v53, %v16987_v8 }
 0x895   : > { %v7327_v55 = vmul.f32 %v12479_v23, %v7295_v54  ;;  %v7264_v39 = vmul.f32 %v12481_v32, %v7200_v14  ;;  %10561 = vperm.xlu1 %12346, %v10495_v11   ;;  %v16990_v14 = vld [vmem:[#allocation33_spill] sm:$0xff]  ;;  %v16991_v54 = vld [vmem:[#allocation15_spill] sm:$0xff] }
 0x896   : > { %12486 = vrcp.f32 %v7203_v61 }
 0x897   : > { %v10496_v63 = vmul.f32 %v16062_v1, %v7327_v55  ;;  %v7296_v60 = vsub.f32 2.0, %v7264_v39  ;;  %v7029_v35 = vpop.permute.xlu0 %7028  ;;  %12488 = vrcp.f32 %v7207_v40 }
 0x898   : > { %v12483_v5 = vpop.eup %12482  ;;  %v7204_v51 = vadd.f32 %v7029_v35, %v16989_v30  ;;  %v7095_v30 = vpop.permute.xlu1 %7094 }
 0x899   : > { %v7328_v62 = vmul.f32 %v12481_v32, %v7296_v60  ;;  %v7265_v17 = vmul.f32 %v12483_v5, %v7201_v18  ;;  %10566 = vperm.xlu0 %12347, %v10496_v63  }
 0x89a   : > { %12490 = vrcp.f32 %v7204_v51 }
 0x89b   : > { %v10497_v19 = vmul.f32 %v16062_v1, %v7328_v62  ;;  %v7297_v52 = vsub.f32 2.0, %v7265_v17  ;;  %v7033_v43 = vpop.permute.xlu0 %7032 }
 0x89c   : > { %v12485_v20 = vpop.eup %12484  ;;  %v7205_v49 = vadd.f32 %v7033_v43, %v16990_v14  ;;  %v16993_v43 = vld [vmem:[#allocation56_spill] sm:$0xff] }
 0x89d   : > { %v7329_v23 = vmul.f32 %v12483_v5, %v7297_v52  ;;  %v7266_v31 = vmul.f32 %v12485_v20, %v7202_v9  ;;  %10571 = vperm.xlu1 %12346, %v10497_v19   ;;  %v16992_v9 = vld [vmem:[#allocation46_spill] sm:$0xff] }
 0x89e   : > { %12492 = vrcp.f32 %v7205_v49 }
 0x89f   : > { %v10498_v15 = vmul.f32 %v16062_v1, %v7329_v23  ;;  %v7298_v10 = vsub.f32 2.0, %v7266_v31  ;;  %v7040_v34 = vpop.permute.xlu0 %7039 }
 0x8a0   : > { %v12487_v11 = vpop.eup %12486  ;;  %v7206_v18 = vadd.f32 %v7040_v34, %v16991_v54  ;;  %v16994_v54 = vld [vmem:[#allocation14_spill] sm:$0xff] }
 0x8a1   : > { %v7330_v53 = vmul.f32 %v12485_v20, %v7298_v10  ;;  %v7267_v32 = vmul.f32 %v12487_v11, %v7203_v61  ;;  %10576 = vperm.xlu0 %12347, %v10498_v15   ;;  %v12489_v8 = vpop.eup %12488 }
 0x8a2   : > { %12494 = vrcp.f32 %v7206_v18  ;;  %v7271_v62 = vmul.f32 %v12489_v8, %v7207_v40 }
 0x8a3   : > { %v10499_v0 = vmul.f32 %v16062_v1, %v7330_v53  ;;  %v7299_v55 = vsub.f32 2.0, %v7267_v32  ;;  %v7051_v39 = vpop.permute.xlu0 %7050 }
 0x8a4   : > { %v12491_v63 = vpop.eup %12490  ;;  %v7208_v60 = vadd.f32 %v7051_v39, %v16992_v9  ;;  %v7303_v31 = vsub.f32 2.0, %v7271_v62  ;;  %v16995_v9 = vld [vmem:[#allocation57_spill] sm:$0xff] }
 0x8a5   : > { %v7331_v35 = vmul.f32 %v12487_v11, %v7299_v55  ;;  %v7268_v5 = vmul.f32 %v12491_v63, %v7204_v51  ;;  %10581 = vperm.xlu1 %12346, %v10499_v0   ;;  %v7106_v11 = vpop.permute.xlu1 %7105 }
 0x8a6   : > { %12496 = vrcp.f32 %v7208_v60  ;;  %v7335_v0 = vmul.f32 %v12489_v8, %v7303_v31  ;;  %v16996_v8 = vld [vmem:[#allocation28_spill] sm:$0xff] }
 0x8a7   : > { %v10500_v17 = vmul.f32 %v16062_v1, %v7331_v35  ;;  %v7300_v19 = vsub.f32 2.0, %v7268_v5  ;;  %v7055_v61 = vpop.permute.xlu0 %7054 }
 0x8a8   : > { %v12493_v52 = vpop.eup %12492  ;;  %v7209_v20 = vadd.f32 %v7055_v61, %v16993_v43 }
 0x8a9   : > { %v7332_v14 = vmul.f32 %v12491_v63, %v7300_v19  ;;  %v7269_v23 = vmul.f32 %v12493_v52, %v7205_v49  ;;  %10586 = vperm.xlu0 %12347, %v10500_v17   ;;  %v7117_v17 = vpop.permute.xlu1 %7116  ;;  %v10504_v19 = vmul.f32 %v16062_v1, %v7335_v0 }
 0x8aa   : > { %12498 = vrcp.f32 %v7209_v20 }
 0x8ab   : > { %v10501_v15 = vmul.f32 %v16062_v1, %v7332_v14  ;;  %v7301_v10 = vsub.f32 2.0, %v7269_v23  ;;  %v7062_v51 = vpop.permute.xlu0 %7061  ;;  %v16997_v23 = vld [vmem:[#allocation21_spill] sm:$0xff] }
 0x8ac   : > { %v12495_v34 = vpop.eup %12494  ;;  %v7210_v40 = vadd.f32 %v7062_v51, %v16994_v54  ;;  %v7216_v31 = vadd.f32 %v7095_v30, %v16997_v23 }
 0x8ad   : > { %v7333_v53 = vmul.f32 %v12493_v52, %v7301_v10  ;;  %v7270_v32 = vmul.f32 %v12495_v34, %v7206_v18  ;;  %10591 = vperm.xlu1 %12346, %v10501_v15  }
 0x8ae   : > { %12500 = vrcp.f32 %v7210_v40 }
 0x8af   : > { %v10502_v55 = vmul.f32 %v16062_v1, %v7333_v53  ;;  %v7302_v39 = vsub.f32 2.0, %v7270_v32  ;;  %v7066_v49 = vpop.permute.xlu0 %7065  ;;  %v7128_v53 = vpop.permute.xlu1 %7127  ;;  %v16998_v32 = vld [vmem:[#allocation119_spill] sm:$0xff] }
 0x8b0   : > { %v12497_v63 = vpop.eup %12496  ;;  %v7211_v35 = vadd.f32 %v7066_v49, %v16995_v9 }
 0x8b1   : > { %v7334_v5 = vmul.f32 %v12495_v34, %v7302_v39  ;;  %v7272_v62 = vmul.f32 %v12497_v63, %v7208_v60  ;;  %10596 = vperm.xlu0 %12347, %v10502_v55   ;;  %v16999_v55 = vld [vmem:[#allocation47_spill] sm:$0xff] }
 0x8b2   : > { %12502 = vrcp.f32 %v7211_v35  ;;  %v7218_v39 = vadd.f32 %v7106_v11, %v16999_v55 }
 0x8b3   : > { %v10503_v61 = vmul.f32 %v16062_v1, %v7334_v5  ;;  %v7304_v18 = vsub.f32 2.0, %v7272_v62  ;;  %v7073_v52 = vpop.permute.xlu0 %7072  ;;  %v17000_v62 = vld [vmem:[#allocation48_spill] sm:$0xff]  ;;  %v7139_v23 = vpop.permute.xlu1 %7138 }
 0x8b4   : > { %v12499_v43 = vpop.eup %12498  ;;  %v7212_v14 = vadd.f32 %v7073_v52, %v16996_v8 }
 0x8b5   : > { %v7336_v15 = vmul.f32 %v12497_v63, %v7304_v18  ;;  %v7273_v10 = vmul.f32 %v12499_v43, %v7209_v20  ;;  %10601 = vperm.xlu1 %12346, %v10503_v61   ;;  %10606 = vperm.xlu0 %12347, %v10504_v19   ;;  %v17001_v61 = vld [vmem:[#allocation59_spill] sm:$0xff] }
 0x8b6   : > { %12504 = vrcp.f32 %v7212_v14  ;;  %v7220_v18 = vadd.f32 %v7117_v17, %v17001_v61 }
 0x8b7   : > { %v10505_v60 = vmul.f32 %v16062_v1, %v7336_v15  ;;  %v7305_v51 = vsub.f32 2.0, %v7273_v10  ;;  %v7077_v34 = vpop.permute.xlu0 %7076  ;;  %12506 = vrcp.f32 %v7216_v31  ;;  %v17002_v10 = vld [vmem:[#allocation123_spill] sm:$0xff] }
 0x8b8   : > { %v12501_v54 = vpop.eup %12500  ;;  %v7213_v0 = vadd.f32 %v7077_v34, %v16998_v32 }
 0x8b9   : > { %v7337_v49 = vmul.f32 %v12499_v43, %v7305_v51  ;;  %v7274_v9 = vmul.f32 %v12501_v54, %v7210_v40  ;;  %10611 = vperm.xlu1 %12346, %v10505_v60   ;;  %v17003_v51 = vld [vmem:[#allocation120_spill] sm:$0xff] }
 0x8ba   : > { %12508 = vrcp.f32 %v7213_v0  ;;  %v7222_v34 = vadd.f32 %v7128_v53, %v17003_v51 }
 0x8bb   : > { %v10506_v30 = vmul.f32 %v16062_v1, %v7337_v49  ;;  %v7306_v20 = vsub.f32 2.0, %v7274_v9  ;;  %v7084_v63 = vpop.permute.xlu0 %7083  ;;  %12510 = vrcp.f32 %v7218_v39 }
 0x8bc   : > { %v12503_v5 = vpop.eup %12502  ;;  %v7214_v19 = vadd.f32 %v7084_v63, %v17000_v62  ;;  %v17005_v62 = vld [vmem:[#allocation125_spill] sm:$0xff] }
 0x8bd   : > { %v7338_v52 = vmul.f32 %v12501_v54, %v7306_v20  ;;  %v7275_v8 = vmul.f32 %v12503_v5, %v7211_v35  ;;  %10616 = vperm.xlu0 %12347, %v10506_v30   ;;  %v7150_v30 = vpop.permute.xlu1 %7149  ;;  %v17004_v20 = vld [vmem:[#allocation126_spill] sm:$0xff]  ;;  %v7224_v61 = vadd.f32 %v7139_v23, %v17005_v62 }
 0x8be   : > { %12512 = vrcp.f32 %v7214_v19 }
 0x8bf   : > { %v10507_v11 = vmul.f32 %v16062_v1, %v7338_v52  ;;  %v7307_v40 = vsub.f32 2.0, %v7275_v8  ;;  %v7088_v43 = vpop.permute.xlu0 %7087  ;;  %12514 = vrcp.f32 %v7220_v18 }
 0x8c0   : > { %v12505_v15 = vpop.eup %12504  ;;  %v7215_v60 = vadd.f32 %v7088_v43, %v17002_v10  ;;  %v17006_v10 = vld [vmem:[#allocation127_spill] sm:$0xff] }
 0x8c1   : > { %v7339_v32 = vmul.f32 %v12503_v5, %v7307_v40  ;;  %v7276_v55 = vmul.f32 %v12505_v15, %v7212_v14  ;;  %10621 = vperm.xlu1 %12346, %v10507_v11   ;;  %v12507_v17 = vpop.eup %12506 }
 0x8c2   : > { %12516 = vrcp.f32 %v7215_v60  ;;  %v7280_v53 = vmul.f32 %v12507_v17, %v7216_v31 }
 0x8c3   : > { %v10508_v35 = vmul.f32 %v16062_v1, %v7339_v32  ;;  %v7308_v54 = vsub.f32 2.0, %v7276_v55  ;;  %v7099_v49 = vpop.permute.xlu0 %7098  ;;  %12518 = vrcp.f32 %v7222_v34  ;;  %v17007_v32 = vld [vmem:[#allocation128_spill] sm:$0xff] }
 0x8c4   : > { %v12509_v9 = vpop.eup %12508  ;;  %v7217_v63 = vadd.f32 %v7099_v49, %v17004_v20  ;;  %v16101_v55 = vadd.f32 %v7150_v30, %v17007_v32  ;;  %v7312_v23 = vsub.f32 2.0, %v7280_v53 }
 0x8c5   : > { %v7340_v52 = vmul.f32 %v12505_v15, %v7308_v54  ;;  %v7277_v8 = vmul.f32 %v12509_v9, %v7213_v0  ;;  %10626 = vperm.xlu0 %12347, %v10508_v35   ;;  %v12511_v14 = vpop.eup %12510  ;;  %v7161_v0 = vpop.permute.xlu1 %7160 }
 0x8c6   : > { %12520 = vrcp.f32 %v7217_v63  ;;  %v7282_v15 = vmul.f32 %v12511_v14, %v7218_v39  ;;  %v7344_v53 = vmul.f32 %v12507_v17, %v7312_v23 }
 0x8c7   : > { %v10509_v5 = vmul.f32 %v16062_v1, %v7340_v52  ;;  %v7309_v11 = vsub.f32 2.0, %v7277_v8  ;;  %v7110_v40 = vpop.permute.xlu0 %7109  ;;  %12522 = vrcp.f32 %v7224_v61  ;;  %v17008_v8 = vld [vmem:[#allocation129_spill] sm:$0xff] }
 0x8c8   : > { %v12513_v43 = vpop.eup %12512  ;;  %v7219_v51 = vadd.f32 %v7110_v40, %v17006_v10  ;;  %v17009_v40 = vld [vmem:[#allocation130_spill] sm:$0xff] }
 0x8c9   : > { %v7341_v49 = vmul.f32 %v12509_v9, %v7309_v11  ;;  %v7278_v20 = vmul.f32 %v12513_v43, %v7214_v19  ;;  %10631 = vperm.xlu1 %12346, %v10509_v5   ;;  %v12515_v31 = vpop.eup %12514  ;;  %v16107_v30 = vadd.f32 %v7161_v0, %v17009_v40  ;;  %v7314_v11 = vsub.f32 2.0, %v7282_v15 }
 0x8ca   : > { %12524 = vrcp.f32 %v7219_v51  ;;  %v7284_v39 = vmul.f32 %v12515_v31, %v7220_v18 }
 0x8cb   : > { %v10510_v35 = vmul.f32 %v16062_v1, %v7341_v49  ;;  %v7310_v54 = vsub.f32 2.0, %v7278_v20  ;;  %v7121_v62 = vpop.permute.xlu0 %7120  ;;  %12526 = vrcp.f32 %v16101_v55  ;;  %v7346_v23 = vmul.f32 %v12511_v14, %v7314_v11 }
 0x8cc   : > { %v12517_v52 = vpop.eup %12516  ;;  %v7221_v47 = vadd.f32 %v7121_v62, %v17008_v8  ;;  %v7316_v15 = vsub.f32 2.0, %v7284_v39 }
 0x8cd   : > { %v7342_v9 = vmul.f32 %v12513_v43, %v7310_v54  ;;  %v7279_v19 = vmul.f32 %v12517_v52, %v7215_v60  ;;  %10636 = vperm.xlu0 %12347, %v10510_v35   ;;  %v12519_v5 = vpop.eup %12518  ;;  %v10513_v60 = vmul.f32 %v16062_v1, %v7344_v53 }
 0x8ce   : > { %12528 = vrcp.f32 %v7221_v47  ;;  %v7286_v43 = vmul.f32 %v12519_v5, %v7222_v34  ;;  %v10515_v34 = vmul.f32 %v16062_v1, %v7346_v23 }
 0x8cf   : > { %v10511_v10 = vmul.f32 %v16062_v1, %v7342_v9  ;;  %v7311_v32 = vsub.f32 2.0, %v7279_v19  ;;  %v7132_v49 = vpop.permute.xlu0 %7131  ;;  %12530 = vrcp.f32 %v16107_v30  ;;  %v17011_v9 = vld [vmem:[#allocation44_spill] sm:$0xff] }
 0x8d0   : > { %v12521_v20 = vpop.eup %12520  ;;  %v7223_v62 = vadd.f32 %v7132_v49, %v17010_v59 }
 0x8d1   : > { %v7343_v8 = vmul.f32 %v12517_v52, %v7311_v32  ;;  %v7281_v0 = vmul.f32 %v12521_v20, %v7217_v63  ;;  %10641 = vperm.xlu1 %12346, %v10511_v10   ;;  %v12523_v17 = vpop.eup %12522  ;;  %v7318_v63 = vsub.f32 2.0, %v7286_v43  ;;  %v7348_v10 = vmul.f32 %v12515_v31, %v7316_v15 }
 0x8d2   : > { %12532 = vrcp.f32 %v7223_v62  ;;  %v7288_v52 = vmul.f32 %v12523_v17, %v7224_v61 }
 0x8d3   : > { %v10512_v18 = vmul.f32 %v16062_v1, %v7343_v8  ;;  %v7313_v35 = vsub.f32 2.0, %v7281_v0  ;;  %v7143_v54 = vpop.permute.xlu0 %7142  ;;  %v17012_v8 = vld [vmem:[#allocation65_spill] sm:$0xff] }
 0x8d4   : > { %v12525_v40 = vpop.eup %12524  ;;  %v7225_v19 = vadd.f32 %v7143_v54, %v17011_v9 }
 0x8d5   : > { %v7345_v59 = vmul.f32 %v12521_v20, %v7313_v35  ;;  %v7283_v49 = vmul.f32 %v12525_v40, %v7219_v51  ;;  %10646 = vperm.xlu0 %12347, %v10512_v18   ;;  %10651 = vperm.xlu1 %12346, %v10513_v60   ;;  %v12527_v53 = vpop.eup %12526  ;;  %v7350_v51 = vmul.f32 %v12519_v5, %v7318_v63  ;;  %v7320_v20 = vsub.f32 2.0, %v7288_v52  ;;  %v17013_v35 = vld [vmem:[#allocation27_spill] sm:$0xff] }
 0x8d6   : > { %12534 = vrcp.f32 %v7225_v19  ;;  %v10517_v60 = vmul.f32 %v16062_v1, %v7348_v10  ;;  %v7290_v43 = vmul.f32 %v12527_v53, %v16101_v55 }
 0x8d7   : > { %v10514_v14 = vmul.f32 %v16062_v1, %v7345_v59  ;;  %v7315_v11 = vsub.f32 2.0, %v7283_v49  ;;  %v7154_v39 = vpop.permute.xlu0 %7153  ;;  %v7352_v5 = vmul.f32 %v12523_v17, %v7320_v20 }
 0x8d8   : > { %v12529_v32 = vpop.eup %12528  ;;  %v7227_v0 = vadd.f32 %v7154_v39, %v17012_v8  ;;  %v7322_v49 = vsub.f32 2.0, %v7290_v43 }
 0x8d9   : > { %v7347_v21 = vmul.f32 %v12525_v40, %v7315_v11  ;;  %v7285_v54 = vmul.f32 %v12529_v32, %v7221_v47  ;;  %10656 = vperm.xlu0 %12347, %v10514_v14   ;;  %10661 = vperm.xlu1 %12346, %v10515_v34   ;;  %v12531_v61 = vpop.eup %12530  ;;  %v10519_v47 = vmul.f32 %v16062_v1, %v7350_v51 }
 0x8da   : > { %12536 = vrcp.f32 %v7227_v0  ;;  %v7292_v63 = vmul.f32 %v12531_v61, %v16107_v30  ;;  %v10521_v14 = vmul.f32 %v16062_v1, %v7352_v5 }
 0x8db   : > { %v10516_v31 = vmul.f32 %v16062_v1, %v7347_v21  ;;  %v7317_v23 = vsub.f32 2.0, %v7285_v54  ;;  %v7165_v15 = vpop.permute.xlu0 %7164 }
 0x8dc   : > { %v12533_v18 = vpop.eup %12532  ;;  %v7229_v9 = vadd.f32 %v7165_v15, %v17013_v35  ;;  %v7324_v11 = vsub.f32 2.0, %v7292_v63  ;;  %v12542_v63 = vld [vmem:[%s12894_s30 + $0x10] sm:$0xff] }
 0x8dd   : > { %v7349_v59 = vmul.f32 %v12529_v32, %v7317_v23  ;;  %v7287_v40 = vmul.f32 %v12533_v18, %v7223_v62  ;;  %10666 = vperm.xlu0 %12347, %v10516_v31   ;;  %10671 = vperm.xlu1 %12346, %v10517_v60   ;;  %v7354_v62 = vmul.f32 %v12527_v53, %v7322_v49 }
 0x8de   : > { %12538 = vrcp.f32 %v7229_v9  ;;  %v7356_v51 = vmul.f32 %v12531_v61, %v7324_v11 }
 0x8df   : > { %v10518_v55 = vmul.f32 %v16062_v1, %v7349_v59  ;;  %v7319_v52 = vsub.f32 2.0, %v7287_v40  ;;  %v10523_v30 = vmul.f32 %v16062_v1, %v7354_v62 }
 0x8e0   : > { %v12535_v21 = vpop.eup %12534  ;;  %v10525_v53 = vmul.f32 %v16062_v1, %v7356_v51 }
 0x8e1   : > { %v7351_v34 = vmul.f32 %v12533_v18, %v7319_v52  ;;  %v7289_v10 = vmul.f32 %v12535_v21, %v7225_v19  ;;  %10676 = vperm.xlu0 %12347, %v10518_v55   ;;  %10681 = vperm.xlu1 %12346, %v10519_v47  }
 0x8e3   : > { %v10520_v39 = vmul.f32 %v16062_v1, %v7351_v34  ;;  %v7321_v32 = vsub.f32 2.0, %v7289_v10 }
 0x8e4   : > { %v12537_v17 = vpop.eup %12536 }
 0x8e5   : > { %v7353_v8 = vmul.f32 %v12535_v21, %v7321_v32  ;;  %v7291_v54 = vmul.f32 %v12537_v17, %v7227_v0  ;;  %10686 = vperm.xlu0 %12347, %v10520_v39   ;;  %10691 = vperm.xlu1 %12346, %v10521_v14   ;;  %v12545_v32 = vld [vmem:[%s12894_s30 + $0x28] sm:$0xff] }
 0x8e7   : > { %v10522_v20 = vmul.f32 %v16062_v1, %v7353_v8  ;;  %v7323_v19 = vsub.f32 2.0, %v7291_v54  ;;  %v12546_v54 = vld [vmem:[%s12894_s30 + $0x30] sm:$0xff] }
 0x8e8   : > { %v12539_v60 = vpop.eup %12538 }
 0x8e9   : > { %v7355_v43 = vmul.f32 %v12537_v17, %v7323_v19  ;;  %v7293_v31 = vmul.f32 %v12539_v60, %v7229_v9  ;;  %10696 = vperm.xlu0 %12347, %v10522_v20   ;;  %10701 = vperm.xlu1 %12346, %v10523_v30   ;;  %v12540_v9 = vld [vmem:[%s12894_s30] sm:$0xff] }
 0x8eb   : > { %v10524_v0 = vmul.f32 %v16062_v1, %v7355_v43  ;;  %v7325_v23 = vsub.f32 2.0, %v7293_v31  ;;  %v12548_v31 = vld [vmem:[%s12894_s30 + $0x48] sm:$0xff] }
 0x8ed   : > { %v7357_v15 = vmul.f32 %v12539_v60, %v7325_v23  ;;  %10706 = vperm.xlu0 %12347, %v10524_v0   ;;  %10711 = vperm.xlu1 %12346, %v10525_v53   ;;  %v12549_v0 = vld [vmem:[%s12894_s30 + $0x40] sm:$0xff] }
 0x8ef   : > { %v10526_v61 = vmul.f32 %v16062_v1, %v7357_v15  ;;  %v12541_v1 = vld [vmem:[%s12894_s30 + $0x8] sm:$0xff] }
 0x8f1   : > { %10716 = vperm.xlu0 %12347, %v10526_v61   ;;  %v12550_v61 = vld [vmem:[%s12894_s30 + $0x50] sm:$0xff] }
 0x914   : > { %v10562_v18 = vpop.permute.xlu1 %10561 }
 0x915   : > { %v10719_v35 = vmul.f32 %v10562_v18, %v15905_v25 }
 0x917   : > { %v10751_v59 = vadd.f32 %v12540_v9, %v10719_v35  ;;  %v12551_v35 = vld [vmem:[%s12894_s30 + $0x58] sm:$0xff] }
 0x918   : > { %v10567_v40 = vpop.permute.xlu0 %10566 }
 0x919   : > { %10783 = vst.msk [vmem:[%s16136_s29] sm:$0xff] %vm276_vm0, %v10751_v59  ;;  %v10720_v47 = vmul.f32 %v10567_v40, %v15991_v12  ;;  %v12543_v12 = vld [vmem:[%s12894_s30 + $0x18] sm:$0xff] }
 0x91b   : > { %v10752_v5 = vadd.f32 %v12541_v1, %v10720_v47 }
 0x91c   : > { %v10572_v49 = vpop.permute.xlu1 %10571 }
 0x91d   : > { %10784 = vst.msk [vmem:[%s16136_s29 + $0x8] sm:$0xff] %vm276_vm0, %v10752_v5  ;;  %v10721_v25 = vmul.f32 %v10572_v49, %v15908_v24  ;;  %v12544_v24 = vld [vmem:[%s12894_s30 + $0x20] sm:$0xff] }
 0x91f   : > { %v10753_v55 = vadd.f32 %v12542_v63, %v10721_v25 }
 0x920   : > { %v10577_v52 = vpop.permute.xlu0 %10576 }
 0x921   : > { %10785 = vst.msk [vmem:[%s16136_s29 + $0x10] sm:$0xff] %vm276_vm0, %v10753_v55  ;;  %v10722_v21 = vmul.f32 %v10577_v52, %v15994_v38  ;;  %v12554_v55 = vld [vmem:[%s12894_s30 + $0x70] sm:$0xff] }
 0x923   : > { %v10754_v34 = vadd.f32 %v12543_v12, %v10722_v21  ;;  %v12555_v12 = vld [vmem:[%s12894_s30 + $0x78] sm:$0xff] }
 0x924   : > { %v10582_v10 = vpop.permute.xlu1 %10581 }
 0x925   : > { %10786 = vst.msk [vmem:[%s16136_s29 + $0x18] sm:$0xff] %vm276_vm0, %v10754_v34  ;;  %v10723_v14 = vmul.f32 %v10582_v10, %v15911_v2 }
 0x927   : > { %v10755_v62 = vadd.f32 %v12544_v24, %v10723_v14  ;;  %v12556_v14 = vld [vmem:[%s12894_s30 + $0x80] sm:$0xff] }
 0x928   : > { %v10587_v11 = vpop.permute.xlu0 %10586 }
 0x929   : > { %10787 = vst.msk [vmem:[%s16136_s29 + $0x20] sm:$0xff] %vm276_vm0, %v10755_v62  ;;  %v10724_v39 = vmul.f32 %v10587_v11, %v15997_v41  ;;  %v12547_v41 = vld [vmem:[%s12894_s30 + $0x38] sm:$0xff] }
 0x92b   : > { %v10756_v38 = vadd.f32 %v12545_v32, %v10724_v39  ;;  %v12557_v39 = vld [vmem:[%s12894_s30 + $0x88] sm:$0xff] }
 0x92c   : > { %v10592_v17 = vpop.permute.xlu1 %10591 }
 0x92d   : > { %10788 = vst.msk [vmem:[%s16136_s29 + $0x28] sm:$0xff] %vm276_vm0, %v10756_v38  ;;  %v10725_v8 = vmul.f32 %v10592_v17, %v15914_v57  ;;  %v12558_v38 = vld [vmem:[%s12894_s30 + $0x90] sm:$0xff] }
 0x92f   : > { %v10757_v2 = vadd.f32 %v12546_v54, %v10725_v8 }
 0x930   : > { %v10597_v30 = vpop.permute.xlu0 %10596 }
 0x931   : > { %10789 = vst.msk [vmem:[%s16136_s29 + $0x30] sm:$0xff] %vm276_vm0, %v10757_v2  ;;  %v10726_v51 = vmul.f32 %v10597_v30, %v16000_v37  ;;  %v12559_v2 = vld [vmem:[%s12894_s30 + $0x98] sm:$0xff]  ;;  %v12560_v30 = vld [vmem:[%s12894_s30 + $0xa0] sm:$0xff] }
 0x933   : > { %v10758_v20 = vadd.f32 %v12547_v41, %v10726_v51 }
 0x934   : > { %v10607_v19 = vpop.permute.xlu0 %10606  ;;  %v10602_v60 = vpop.permute.xlu1 %10601 }
 0x935   : > { %10790 = vst.msk [vmem:[%s16136_s29 + $0x38] sm:$0xff] %vm276_vm0, %v10758_v20  ;;  %v10728_v57 = vmul.f32 %v10607_v19, %v16003_v16  ;;  %v10727_v43 = vmul.f32 %v10602_v60, %v15917_v22  ;;  %v12561_v60 = vld [vmem:[%s12894_s30 + $0xa8] sm:$0xff] }
 0x937   : > { %v10760_v53 = vadd.f32 %v12548_v31, %v10728_v57  ;;  %v10759_v23 = vadd.f32 %v12549_v0, %v10727_v43  ;;  %v12562_v57 = vld [vmem:[%s12894_s30 + $0xb0] sm:$0xff] }
 0x938   : > { %v10612_v37 = vpop.permute.xlu1 %10611 }
 0x939   : > { %10792 = vst.msk [vmem:[%s16136_s29 + $0x48] sm:$0xff] %vm276_vm0, %v10760_v53  ;;  %10791 = vst.msk [vmem:[%s16136_s29 + $0x40] sm:$0xff] %vm276_vm0, %v10759_v23  ;;  %v10729_v15 = vmul.f32 %v10612_v37, %v15920_v26  ;;  %v12552_v26 = vld [vmem:[%s12894_s30 + $0x60] sm:$0xff]  ;;  %v12563_v23 = vld [vmem:[%s12894_s30 + $0xb8] sm:$0xff] }
 0x93a   : > { %v12564_v37 = vld [vmem:[%s12894_s30 + $0xc0] sm:$0xff] }
 0x93b   : > { %v10761_v18 = vadd.f32 %v12550_v61, %v10729_v15 }
 0x93c   : > { %v10617_v16 = vpop.permute.xlu0 %10616 }
 0x93d   : > { %10793 = vst.msk [vmem:[%s16136_s29 + $0x50] sm:$0xff] %vm276_vm0, %v10761_v18  ;;  %v10730_v22 = vmul.f32 %v10617_v16, %v16006_v42  ;;  %v12553_v42 = vld [vmem:[%s12894_s30 + $0x68] sm:$0xff] }
 0x93f   : > { %v10762_v9 = vadd.f32 %v12551_v35, %v10730_v22  ;;  %v12565_v22 = vld [vmem:[%s12894_s30 + $0xc8] sm:$0xff]  ;;  %v12566_v35 = vld [vmem:[%s12894_s30 + $0xd0] sm:$0xff] }
 0x940   : > { %v10622_v59 = vpop.permute.xlu1 %10621 }
 0x941   : > { %10794 = vst.msk [vmem:[%s16136_s29 + $0x58] sm:$0xff] %vm276_vm0, %v10762_v9  ;;  %v10731_v40 = vmul.f32 %v10622_v59, %v15923_v44 }
 0x943   : > { %v10763_v47 = vadd.f32 %v12552_v26, %v10731_v40 }
 0x944   : > { %v10627_v1 = vpop.permute.xlu0 %10626 }
 0x945   : > { %10795 = vst.msk [vmem:[%s16136_s29 + $0x60] sm:$0xff] %vm276_vm0, %v10763_v47  ;;  %v10732_v5 = vmul.f32 %v10627_v1, %v16009_v7  ;;  %v12568_v1 = vld [vmem:[%s12894_s30 + $0xe0] sm:$0xff] }
 0x947   : > { %v10764_v49 = vadd.f32 %v12553_v42, %v10732_v5 }
 0x948   : > { %v10632_v25 = vpop.permute.xlu1 %10631 }
 0x949   : > { %10796 = vst.msk [vmem:[%s16136_s29 + $0x68] sm:$0xff] %vm276_vm0, %v10764_v49  ;;  %v10733_v63 = vmul.f32 %v10632_v25, %v15926_v46  ;;  %v17014_v25 = vld [vmem:[#allocation75_spill] sm:$0xff] }
 0x94b   : > { %v10765_v44 = vadd.f32 %v12554_v55, %v10733_v63 }
 0x94c   : > { %v10637_v52 = vpop.permute.xlu0 %10636 }
 0x94d   : > { %10797 = vst.msk [vmem:[%s16136_s29 + $0x70] sm:$0xff] %vm276_vm0, %v10765_v44  ;;  %v10734_v21 = vmul.f32 %v10637_v52, %v16012_v48  ;;  %v12570_v52 = vld [vmem:[%s12894_s30 + $0xf0] sm:$0xff] }
 0x94f   : > { %v10766_v7 = vadd.f32 %v12555_v12, %v10734_v21 }
 0x950   : > { %v10642_v34 = vpop.permute.xlu1 %10641 }
 0x951   : > { %10798 = vst.msk [vmem:[%s16136_s29 + $0x78] sm:$0xff] %vm276_vm0, %v10766_v7  ;;  %v10735_v10 = vmul.f32 %v10642_v34, %v15929_v27  ;;  %v17016_v7 = vld [vmem:[#allocation98_spill] sm:$0xff] }
 0x953   : > { %v10767_v46 = vadd.f32 %v12556_v14, %v10735_v10  ;;  %v12571_v10 = vld [vmem:[%s12894_s30 + $0xf8] sm:$0xff] }
 0x954   : > { %v10647_v24 = vpop.permute.xlu0 %10646  ;;  %v10652_v62 = vpop.permute.xlu1 %10651 }
 0x955   : > { %10799 = vst.msk [vmem:[%s16136_s29 + $0x80] sm:$0xff] %vm276_vm0, %v10767_v46  ;;  %v10736_v11 = vmul.f32 %v10647_v24, %v16015_v45  ;;  %v10737_v48 = vmul.f32 %v10652_v62, %v15932_v28 }
 0x957   : > { %v10768_v32 = vadd.f32 %v12557_v39, %v10736_v11  ;;  %v10769_v17 = vadd.f32 %v12558_v38, %v10737_v48 }
 0x958   : > { %v10657_v8 = vpop.permute.xlu0 %10656  ;;  %v10662_v27 = vpop.permute.xlu1 %10661 }
 0x959   : > { %10800 = vst.msk [vmem:[%s16136_s29 + $0x88] sm:$0xff] %vm276_vm0, %v10768_v32  ;;  %10801 = vst.msk [vmem:[%s16136_s29 + $0x90] sm:$0xff] %vm276_vm0, %v10769_v17  ;;  %v10738_v54 = vmul.f32 %v10657_v8, %v16018_v56  ;;  %v10739_v45 = vmul.f32 %v10662_v27, %v15935_v36 }
 0x95b   : > { %v10770_v28 = vadd.f32 %v12559_v2, %v10738_v54  ;;  %v10771_v51 = vadd.f32 %v12560_v30, %v10739_v45 }
 0x95c   : > { %v10667_v41 = vpop.permute.xlu0 %10666  ;;  %v10672_v20 = vpop.permute.xlu1 %10671 }
 0x95d   : > { %10802 = vst.msk [vmem:[%s16136_s29 + $0x98] sm:$0xff] %vm276_vm0, %v10770_v28  ;;  %10803 = vst.msk [vmem:[%s16136_s29 + $0xa0] sm:$0xff] %vm276_vm0, %v10771_v51  ;;  %v10740_v19 = vmul.f32 %v10667_v41, %v16021_v29  ;;  %v10741_v56 = vmul.f32 %v10672_v20, %v15938_v33 }
 0x95f   : > { %v10772_v36 = vadd.f32 %v12561_v60, %v10740_v19  ;;  %v10773_v43 = vadd.f32 %v12562_v57, %v10741_v56 }
 0x960   : > { %v10677_v31 = vpop.permute.xlu0 %10676  ;;  %v10682_v53 = vpop.permute.xlu1 %10681 }
 0x961   : > { %10804 = vst.msk [vmem:[%s16136_s29 + $0xa8] sm:$0xff] %vm276_vm0, %v10772_v36  ;;  %10805 = vst.msk [vmem:[%s16136_s29 + $0xb0] sm:$0xff] %vm276_vm0, %v10773_v43  ;;  %v10742_v0 = vmul.f32 %v10677_v31, %v16024_v4  ;;  %v10743_v29 = vmul.f32 %v10682_v53, %v15943_v50 }
 0x963   : > { %v10774_v33 = vadd.f32 %v12563_v23, %v10742_v0  ;;  %v10775_v15 = vadd.f32 %v12564_v37, %v10743_v29 }
 0x964   : > { %v10687_v61 = vpop.permute.xlu0 %10686  ;;  %v10692_v18 = vpop.permute.xlu1 %10691 }
 0x965   : > { %10806 = vst.msk [vmem:[%s16136_s29 + $0xb8] sm:$0xff] %vm276_vm0, %v10774_v33  ;;  %10807 = vst.msk [vmem:[%s16136_s29 + $0xc0] sm:$0xff] %vm276_vm0, %v10775_v15  ;;  %v10744_v16 = vmul.f32 %v10687_v61, %v16031_v6  ;;  %v10745_v4 = vmul.f32 %v10692_v18, %v15946_v3  ;;  %v12567_v3 = vld [vmem:[%s12894_s30 + $0xd8] sm:$0xff] }
 0x967   : > { %v10776_v50 = vadd.f32 %v12565_v22, %v10744_v16  ;;  %v10777_v9 = vadd.f32 %v12566_v35, %v10745_v4 }
 0x968   : > { %v10697_v59 = vpop.permute.xlu0 %10696  ;;  %v10702_v40 = vpop.permute.xlu1 %10701 }
 0x969   : > { %10808 = vst.msk [vmem:[%s16136_s29 + $0xc8] sm:$0xff] %vm276_vm0, %v10776_v50  ;;  %10809 = vst.msk [vmem:[%s16136_s29 + $0xd0] sm:$0xff] %vm276_vm0, %v10777_v9  ;;  %v10746_v26 = vmul.f32 %v10697_v59, %v16034_v58  ;;  %v10747_v6 = vmul.f32 %v10702_v40, %v15949_v13  ;;  %v17015_v58 = vld [vmem:[#allocation85_spill] sm:$0xff] }
 0x96a   : > { %v12569_v13 = vld [vmem:[%s12894_s30 + $0xe8] sm:$0xff] }
 0x96b   : > { %v10778_v47 = vadd.f32 %v12567_v3, %v10746_v26  ;;  %v10779_v5 = vadd.f32 %v12568_v1, %v10747_v6 }
 0x96c   : > { %v10707_v42 = vpop.permute.xlu0 %10706  ;;  %v10712_v49 = vpop.permute.xlu1 %10711 }
 0x96d   : > { %10810 = vst.msk [vmem:[%s16136_s29 + $0xd8] sm:$0xff] %vm276_vm0, %v10778_v47  ;;  %10811 = vst.msk [vmem:[%s16136_s29 + $0xe0] sm:$0xff] %vm276_vm0, %v10779_v5  ;;  %v10748_v63 = vmul.f32 %v10707_v42, %v17014_v25  ;;  %v10749_v55 = vmul.f32 %v10712_v49, %v17015_v58 }
 0x96f   : > { %v10780_v44 = vadd.f32 %v12569_v13, %v10748_v63  ;;  %v10781_v21 = vadd.f32 %v12570_v52, %v10749_v55 }
 0x970   : > { %v10717_v12 = vpop.permute.xlu0 %10716 }
 0x971   : > { %10812 = vst.msk [vmem:[%s16136_s29 + $0xe8] sm:$0xff] %vm276_vm0, %v10780_v44  ;;  %10813 = vst.msk [vmem:[%s16136_s29 + $0xf0] sm:$0xff] %vm276_vm0, %v10781_v21  ;;  %v10750_v34 = vmul.f32 %v10717_v12, %v17016_v7 }
 0x973   : > { %v10782_v14 = vadd.f32 %v12571_v10, %v10750_v34 }
 0x975   : > { %10814 = vst.msk [vmem:[%s16136_s29 + $0xf8] sm:$0xff] %vm276_vm0, %v10782_v14 }
 0x976   : > { %12643 = shalt.err (!%p12640_p7)
}
 0x977   : > { %s12644_s15 = scalar_lea.hbm %s16266_s27, 4096  ;;  %s12648_s24 = scalar_lea.hbm %s16319_s4, 8192 }
 0x978   : > { %p12645_p9 = scmp.ne.s32.totalorder %s16266_s27, %s12644_s15  ;;  %p12649_p5 = scmp.lt.u32.totalorder %s16266_s27, %s16319_s4 }
 0x979   : > { %p12650_p11 = scmp.lt.u32.totalorder %s12648_s24, %s12644_s15  ;;  %p12652_p4 = scmp.lt.u32.totalorder %s12644_s15, %s16266_s27 }
 0x97a   : > { %p12646_p1 = pnand %p12645_p9, %p12837_p12 }
 0x97b   : > { %p12651_p2 = por %p12650_p11, %p12649_p5 }
 0x97c   : > { %p12647_p0 = pneg %p12646_p1 }
 0x97d   : > { %p12653_p6 = por %p12652_p4, %p12651_p2 }
 0x97f   : > { %p12654_p8 = pnand %p12653_p6, %p12647_p0 }
 0x981   : > { %12657 = shalt.err (!%p12654_p8)
}
 0x982   : > { %s12713_s9 = smov 128   ;;  %s12714_s29 = smov 8  }
 0x983   : > { %12285 = dma.vmem_to_hbm [thread:$0]  (%p12837_p12), %s16268_s16, 4096, %s16266_s27, %s10816_s3, %s12713_s9, %s12713_s9, %s12714_s29  }
 0x984 PF: > { %s10844_s10 = sand.u32 1, %s12688_s17   ;;  %p17017_p10 = scmp.ne.s32.totalorder %s16531_s23, 0 }
 0x985   : > { %p17018_p13 = scmp.ge.s32.totalorder %s12700_s20, 2  ;;  %s10845_s5 = scalar_lea.sflag [#allocation5], %s10844_s10 }
 0x987   : > { %p12296_p3 = pnand %p17018_p13, %p17017_p10 }
 0x989   : > { %12683 = dma.done.wait (!%p12296_p3), %s10845_s5, 4096  }
 0x98a   : > { %12685 = vsyncadd (!%p12296_p3), %s10845_s5, 4294963200  ;;  %p19_p7 = scmp.ge.s32.totalorder %s12799_s28, 4   ;;  %s17019_s17 = smov %s12692_s18 }
 0x98b   : > { %s17020_s18 = smov %s12696_s19  ;;  %s17021_s19 = smov %s12833_s21 }
 0x98c   : > { %s17022_s20 = smov %s12799_s28  ;;  %21 = sbr.rel (!%p19_p7) target bundleno = 8 (0x8), region = 85 }
 0x993   :  { %10850 = vsyncpa [#allocation4], 1 }
 0x994   :  { %10852 = vsyncpa [#allocation4 + $0x1], 1 }
 0x995   :  { %10853 = vsyncpa [#allocation7], 1 }
 0x996   :  { %10854 = vsyncpa [#allocation5], 1 }
 0x997   :  { %10856 = vsyncpa [#allocation5 + $0x1], 1 }

</bundles_post_ra>
